<compile_context>
chip_gen: v6e
topology: v6e:2x2x1
jax: 0.10.0
libtpu: 0.0.40
codegen_flags: <defaults>
</compile_context>

<pallas_src>
import math

import numpy as np
import jax
import jax.numpy as jnp
from jax import lax
from jax.experimental import pallas as pl
from jax.experimental.pallas import tpu as pltpu


# --------------------------------------------------------------------------
# Pallas kernel: ConvGRU recurrence for one layer (whole sequence).
#   xa_ref : (Bt, H, W, 3*C)  precomputed  [conv_zr_x(x)+b_zr | conv_h1(x)+b_h1]
#   wh_ref : (KH*KW, C, 3*C)  fused hidden-side weight  [conv_zr_h | conv_h2]
#   b3_ref : (1, 3*C)         [zeros(2C) | b_h2]
#   y_ref  : (Bt, H, W, C)    per-step output h_t
#   h_out  : (Bt, H, W, C)    final state (written only at t == T-1)
#   h_sc   : VMEM scratch     recurrent hidden state
# --------------------------------------------------------------------------
def make_convgru_kernel(KH, KW, Chid):
    ph, pw = KH // 2, KW // 2
    C = Chid

    def kernel(xa_ref, wh_ref, b3_ref, y_ref, h_out_ref, h_sc):
        t = pl.program_id(1)

        @pl.when(t == 0)
        def _():
            h_sc[...] = jnp.zeros_like(h_sc)

        xa = xa_ref[...]                       # (Bt, H, W, 3C), f32
        h_prev = h_sc[...]                     # (Bt, H, W, C),  f32
        Bt, H, W, _ = h_prev.shape
        M = Bt * H * W

        # "same" zero padding of the hidden state for the KHxKW conv
        hp = h_prev
        if ph > 0:
            zH = jnp.zeros((Bt, ph, W, C), jnp.float32)
            hp = jnp.concatenate([zH, hp, zH], axis=1)
        if pw > 0:
            zW = jnp.zeros((Bt, H + 2 * ph, pw, C), jnp.float32)
            hp = jnp.concatenate([zW, hp, zW], axis=2)

        # hidden-side conv as KH*KW accumulating MXU matmuls; the first
        # contribution is seeded with the combined bias row.
        bias = b3_ref[...]                     # (1, 3C)
        acc = None
        for dh in range(KH):
            for dw in range(KW):
                patch = hp[:, dh:dh + H, dw:dw + W, :].reshape(M, C)
                contrib = jnp.dot(patch, wh_ref[dh * KW + dw],
                                  preferred_element_type=jnp.float32)
                acc = (contrib + bias) if acc is None else (acc + contrib)
        hconv = acc.reshape(Bt, H, W, 3 * C)   # [zr_h | h2] contributions

        # gates: one wide sigmoid over the 2C z/r slab
        zr = jax.nn.sigmoid(xa[..., :2 * C] + hconv[..., :2 * C])
        z = zr[..., :C]
        r = zr[..., C:2 * C]
        h_tilde = jnp.tanh(xa[..., 2 * C:] + r * hconv[..., 2 * C:])
        h_new = (1.0 - z) * h_tilde + z * h_prev

        h_sc[...] = h_new
        y_ref[...] = h_new.astype(y_ref.dtype)

        @pl.when(t == pl.num_programs(1) - 1)
        def _():
            h_out_ref[...] = h_new.astype(h_out_ref.dtype)

    return kernel


def convgru_layer(xa, wh_kcc, b3_row, hidden_dim, KH, KW, batch_tiles=None):
    """Recurrent ConvGRU layer.

    xa:     (T, B, H, W, 3*hid) precomputed input-side activations (f32)
    wh_kcc: (KH*KW, hid, 3*hid) fused hidden-side weight
    b3_row: (1, 3*hid)
    returns y (T, B, H, W, hid), h_last (B, H, W, hid)
    """
    T, B, H, W, C3 = xa.shape
    C = hidden_dim
    if batch_tiles is None:
        batch_tiles = 2 if (B % 2 == 0 and B >= 2) else 1
    Bt = B // batch_tiles

    kernel = make_convgru_kernel(KH, KW, C)

    y, h_last = pl.pallas_call(
        kernel,
        out_shape=(
            jax.ShapeDtypeStruct((T, B, H, W, C), jnp.float32),
            jax.ShapeDtypeStruct((B, H, W, C), jnp.float32),
        ),
        grid_spec=pltpu.PrefetchScalarGridSpec(
            num_scalar_prefetch=0,
            grid=(batch_tiles, T),
            in_specs=[
                pl.BlockSpec((None, Bt, H, W, C3), lambda bt, t: (t, bt, 0, 0, 0)),
                pl.BlockSpec((KH * KW, C, C3), lambda bt, t: (0, 0, 0)),
                pl.BlockSpec((1, C3), lambda bt, t: (0, 0)),
            ],
            out_specs=[
                pl.BlockSpec((None, Bt, H, W, C), lambda bt, t: (t, bt, 0, 0, 0)),
                pl.BlockSpec((Bt, H, W, C), lambda bt, t: (bt, 0, 0, 0)),
            ],
            scratch_shapes=[
                pltpu.VMEM((Bt, H, W, C), jnp.float32),   # recurrent h state
            ],
        ),
        compiler_params=pltpu.CompilerParams(
            # batch tiles can shard across TensorCores (v7x megacore);
            # time is a sequential recurrence.
            dimension_semantics=("parallel", "arbitrary"),
            vmem_limit_bytes=32 * 1024 * 1024,
        ),
    )(xa, wh_kcc, b3_row)
    return y, h_last


# --------------------------------------------------------------------------
# ConvGRU module wrapper (same interface/semantics as the PyTorch module).
# --------------------------------------------------------------------------
def _extend_for_multilayer(param, num_layers):
    if not isinstance(param, list):
        param = [param] * num_layers
    return param


class ConvGRUPallas:
    def __init__(self, input_size, input_dim, hidden_dim, kernel_size, num_layers,
                 batch_first=True, bias=True, activation="tanh", batchnorm=False,
                 key=None, batch_tiles=None):
        kernel_size = _extend_for_multilayer(kernel_size, num_layers)
        hidden_dim = _extend_for_multilayer(hidden_dim, num_layers)
        assert len(kernel_size) == len(hidden_dim) == num_layers

        self.height, self.width = input_size
        self.input_dim = input_dim
        self.hidden_dim = hidden_dim
        self.kernel_size = kernel_size
        self.num_layers = num_layers
        self.batch_first = batch_first
        self.bias = bias
        self.batch_tiles = batch_tiles
        # TODO(synk): only tanh activation and batchnorm=False are implemented
        # (the original module's batchnorm branch is broken upstream anyway).
        assert activation == "tanh"
        assert not batchnorm

        key = jax.random.PRNGKey(0) if key is None else key
        gain = 5.0 / 3.0  # nn.init.calculate_gain('tanh')

        def xavier(k, shape):
            fan_out = shape[0] * shape[2] * shape[3]
            fan_in = shape[1] * shape[2] * shape[3]
            bound = gain * math.sqrt(6.0 / (fan_in + fan_out))
            return jax.random.uniform(k, shape, jnp.float32, -bound, bound)

        self.params = []
        for i in range(num_layers):
            cur_in = input_dim if i == 0 else hidden_dim[i - 1]
            kh, kw = kernel_size[i]
            C = hidden_dim[i]
            key, k1, k2, k3, k4 = jax.random.split(key, 5)
            w_zr = xavier(k1, (2 * C, cur_in + C, kh, kw))   # OIHW
            w_h1 = xavier(k2, (C, cur_in, kh, kw))
            w_h2 = xavier(k3, (C, C, kh, kw))
            if bias:
                # NOTE: PyTorch reset_parameters() zeroes these biases; small
                # random values are used here to exercise the bias path.
                kb1, kb2, kb3 = jax.random.split(k4, 3)
                b_zr = jax.random.uniform(kb1, (2 * C,), jnp.float32, -0.05, 0.05)
                b_h1 = jax.random.uniform(kb2, (C,), jnp.float32, -0.05, 0.05)
                b_h2 = jax.random.uniform(kb3, (C,), jnp.float32, -0.05, 0.05)
            else:
                b_zr = jnp.zeros((2 * C,), jnp.float32)
                b_h1 = jnp.zeros((C,), jnp.float32)
                b_h2 = jnp.zeros((C,), jnp.float32)

            # ---- derived, kernel-friendly parameters -------------------------
            # input-side (hoisted out of recurrence): out channels [zr | h1]
            w_x_oihw = jnp.concatenate([w_zr[:, :cur_in], w_h1], axis=0)  # (3C, Cin, kh, kw)
            w_x_hwio = jnp.transpose(w_x_oihw, (2, 3, 1, 0))              # (kh, kw, Cin, 3C)
            b_x = jnp.concatenate([b_zr, b_h1], axis=0)                   # (3C,)
            # hidden-side (inside recurrence): out channels [zr_h | h2]
            w_h_oihw = jnp.concatenate([w_zr[:, cur_in:], w_h2], axis=0)  # (3C, C, kh, kw)
            wh_kcc = jnp.transpose(w_h_oihw, (2, 3, 1, 0)).reshape(kh * kw, C, 3 * C)
            b3_row = jnp.concatenate([jnp.zeros((2 * C,), jnp.float32), b_h2]
                                     ).reshape(1, 3 * C)

            self.params.append({
                "raw": (w_zr, b_zr, w_h1, b_h1, w_h2, b_h2),
                "w_x_hwio": w_x_hwio, "b_x": b_x,
                "wh_kcc": wh_kcc, "b3_row": b3_row,
            })

    def _precompute_input_side(self, x_tbhwc, layer_idx):
        """Input-side conv for ALL timesteps at once (outside the recurrence)."""
        p = self.params[layer_idx]
        kh, kw = self.kernel_size[layer_idx]
        T, B, H, W, Cin = x_tbhwc.shape
        xflat = x_tbhwc.reshape(T * B, H, W, Cin)
        xa = lax.conv_general_dilated(
            xflat, p["w_x_hwio"], (1, 1),
            [(kh // 2, kh // 2), (kw // 2, kw // 2)],
            dimension_numbers=("NHWC", "HWIO", "NHWC"))
        xa = xa + p["b_x"][None, None, None, :]
        return xa.reshape(T, B, H, W, -1)

    def __call__(self, input_tensor, hidden_state=None):
        if hidden_state is not None:
            # TODO(synk): external initial hidden states not implemented
            # (module default initializes with zeros).
            raise NotImplementedError()
        x = input_tensor
        if self.batch_first:                       # (b,t,c,h,w) -> (t,b,c,h,w)
            x = jnp.transpose(x, (1, 0, 2, 3, 4))
        x = jnp.transpose(x, (0, 1, 3, 4, 2))      # -> (t,b,h,w,c) internal

        cur = x
        last_state_list = []
        y = None
        for i in range(self.num_layers):
            p = self.params[i]
            kh, kw = self.kernel_size[i]
            xa = self._precompute_input_side(cur, i)
            y, h_last = convgru_layer(xa, p["wh_kcc"], p["b3_row"],
                                      self.hidden_dim[i], kh, kw, self.batch_tiles)
            cur = y
            last_state_list.append(jnp.transpose(h_last, (0, 3, 1, 2)))  # (b,c,h,w)

        # PyTorch module returns only the LAST layer's output, as (t,b,c,h,w)
        layer_output = jnp.transpose(y, (0, 1, 4, 2, 3))
        return [layer_output], last_state_list


# --------------------------------------------------------------------------
# Pure-JAX reference of the PyTorch ConvGRU forward, for verification.
# --------------------------------------------------------------------------
def ref_convgru(x_tbchw, params, hidden_dims, kernel_sizes, num_layers):
    T, B = x_tbchw.shape[0], x_tbchw.shape[1]
    cur = [x_tbchw[t] for t in range(T)]
    last_states = []
    for li in range(num_layers):
        w_zr, b_zr, w_h1, b_h1, w_h2, b_h2 = params[li]["raw"]
        C = hidden_dims[li]
        kh, kw = kernel_sizes[li]
        H, W = cur[0].shape[2], cur[0].shape[3]

        def conv(v, w, b):
            o = lax.conv_general_dilated(
                v, w, (1, 1), [(kh // 2, kh // 2), (kw // 2, kw // 2)],
                dimension_numbers=("NCHW", "OIHW", "NCHW"))
            return o + b[None, :, None, None]

        h = jnp.zeros((B, C, H, W), jnp.float32)
        outs = []
        for t in range(T):
            xt = cur[t]
            combined = jnp.concatenate([xt, h], axis=1)
            zr = jax.nn.sigmoid(conv(combined, w_zr, b_zr))
            z, r = zr[:, :C], zr[:, C:]
            h_ = jnp.tanh(conv(xt, w_h1, b_h1) + r * conv(h, w_h2, b_h2))
            h = (1.0 - z) * h_ + z * h
            outs.append(h)
        cur = outs
        last_states.append(h)
    layer_output = jnp.stack(cur, axis=0)          # (t, b, c, h, w)
    return [layer_output], last_states


if __name__ == "__main__":
    B, T, Cin, H, W = 2, 8, 4, 16, 16
    hidden = [32, 32]
    num_layers = 2

    model = ConvGRUPallas(
        input_size=(H, W), input_dim=Cin, hidden_dim=hidden,
        kernel_size=(3, 3), num_layers=num_layers,
        batch_first=True, bias=True, key=jax.random.PRNGKey(0))

    # batch_first input: (b, t, c, h, w)
    x = jax.random.normal(jax.random.PRNGKey(0), (B, T, Cin, H, W), jnp.float32)

    layer_outputs, last_states = model(x)
    jax.block_until_ready(layer_outputs[0])
    for h in last_states:
        jax.block_until_ready(h)

    # verify against the pure-JAX reference of the PyTorch forward
    x_tb = jnp.transpose(x, (1, 0, 2, 3, 4))       # (t, b, c, h, w)
    ref_outs, ref_states = ref_convgru(
        x_tb, model.params, model.hidden_dim, model.kernel_size, model.num_layers)

    np.testing.assert_allclose(np.asarray(layer_outputs[0]), np.asarray(ref_outs[0]),
                               rtol=2e-4, atol=2e-4)
    for got, want in zip(last_states, ref_states):
        np.testing.assert_allclose(np.asarray(got), np.asarray(want),
                                   rtol=2e-4, atol=2e-4)

    print("KERNEL_OK")
</pallas_src>

<mosaic_0001>
module attributes {stable_mosaic.version = 11 : i64} {
  func.func @kernel(%arg0: i32, %arg1: i32, %arg2: memref<1x1x16x16x96xf32, #tpu.memory_space<vmem>>, %arg3: memref<9x32x96xf32, #tpu.memory_space<vmem>>, %arg4: memref<1x96xf32, #tpu.memory_space<vmem>>, %arg5: memref<1x1x16x16x32xf32, #tpu.memory_space<vmem>>, %arg6: memref<1x16x16x32xf32, #tpu.memory_space<vmem>>, %arg7: memref<1x16x16x32xf32, #tpu.memory_space<vmem>>) attributes {dimension_semantics = [#tpu.dimension_semantics<parallel>, #tpu.dimension_semantics<arbitrary>], iteration_bounds = array<i64: 2, 8>, scalar_prefetch = 0 : i64, scratch_operands = 1 : i64, tpu.core_type = #tpu.core_type<tc>, window_params = [{transform_indices = @transform_0, window_bounds = array<i64: 1, 1, 16, 16, 96>}, {pipeline_mode = #tpu.pipeline_mode<synchronous>, transform_indices = @transform_1, window_bounds = array<i64: 9, 32, 96>}, {pipeline_mode = #tpu.pipeline_mode<synchronous>, transform_indices = @transform_2, window_bounds = array<i64: 1, 96>}, {transform_indices = @transform_3, window_bounds = array<i64: 1, 1, 16, 16, 32>}, {transform_indices = @transform_4, window_bounds = array<i64: 1, 16, 16, 32>}]} {
    %c0_i32 = arith.constant 0 : i32
    %0 = arith.cmpi eq, %arg1, %c0_i32 : i32
    %1 = arith.extui %0 : i1 to i32
    %c0_i32_0 = arith.constant 0 : i32
    %2 = arith.cmpi ne, %1, %c0_i32_0 : i32
    scf.if %2 {
      %cst_52 = arith.constant 0.000000e+00 : f32
      %94 = vector.broadcast %cst_52 : f32 to vector<1x16x16x32xf32>
      %c0_53 = arith.constant 0 : index
      %c0_54 = arith.constant 0 : index
      %c0_55 = arith.constant 0 : index
      %c0_56 = arith.constant 0 : index
      %95 = vector.load %arg7[%c0_53, %c0_54, %c0_55, %c0_56] : memref<1x16x16x32xf32, #tpu.memory_space<vmem>>, vector<1x16x16x32xf32>
      tpu.vector_store %arg7[%c0_53, %c0_54, %c0_55, %c0_56], %94 {strides = array<i32>} : memref<1x16x16x32xf32, #tpu.memory_space<vmem>>, vector<1x16x16x32xf32>,
    } else {
    }
    %c0 = arith.constant 0 : index
    %c0_1 = arith.constant 0 : index
    %c0_2 = arith.constant 0 : index
    %c0_3 = arith.constant 0 : index
    %c0_4 = arith.constant 0 : index
    %3 = vector.load %arg2[%c0, %c0_1, %c0_2, %c0_3, %c0_4] : memref<1x1x16x16x96xf32, #tpu.memory_space<vmem>>, vector<1x1x16x16x96xf32>
    %4 = vector.shape_cast %3 : vector<1x1x16x16x96xf32> to vector<1x16x16x96xf32>
    %c0_5 = arith.constant 0 : index
    %c0_6 = arith.constant 0 : index
    %c0_7 = arith.constant 0 : index
    %c0_8 = arith.constant 0 : index
    %5 = vector.load %arg7[%c0_5, %c0_6, %c0_7, %c0_8] : memref<1x16x16x32xf32, #tpu.memory_space<vmem>>, vector<1x16x16x32xf32>
    %cst = arith.constant 0.000000e+00 : f32
    %6 = vector.broadcast %cst : f32 to vector<1x1x16x32xf32>
    %7 = tpu.concatenate %6, %5, %6 in 1 : vector<1x1x16x32xf32>, vector<1x16x16x32xf32>, vector<1x1x16x32xf32> -> vector<1x18x16x32xf32>
    %cst_9 = arith.constant 0.000000e+00 : f32
    %8 = vector.broadcast %cst_9 : f32 to vector<1x18x1x32xf32>
    %9 = tpu.concatenate %8, %7, %8 in 2 : vector<1x18x1x32xf32>, vector<1x18x16x32xf32>, vector<1x18x1x32xf32> -> vector<1x18x18x32xf32>
    %c0_10 = arith.constant 0 : index
    %c0_11 = arith.constant 0 : index
    %10 = vector.load %arg4[%c0_10, %c0_11] : memref<1x96xf32, #tpu.memory_space<vmem>>, vector<1x96xf32>
    %11 = vector.extract_strided_slice %9 {offsets = [0, 0, 0, 0], sizes = [1, 16, 16, 32], strides = [1, 1, 1, 1]} : vector<1x18x18x32xf32> to vector<1x16x16x32xf32>
    %12 = vector.shape_cast %11 : vector<1x16x16x32xf32> to vector<256x32xf32>
    %c0_12 = arith.constant 0 : index
    %c0_13 = arith.constant 0 : index
    %c0_14 = arith.constant 0 : index
    %13 = vector.load %arg3[%c0_12, %c0_13, %c0_14] : memref<9x32x96xf32, #tpu.memory_space<vmem>>, vector<1x32x96xf32>
    %14 = vector.shape_cast %13 : vector<1x32x96xf32> to vector<32x96xf32>
    %cst_15 = arith.constant dense<0.000000e+00> : vector<256x96xf32>
    %15 = tpu.matmul %12, %14, %cst_15 {dimension_numbers = #tpu.dot_dimension_numbers<[1], [0], [0], [1], [0, 0, 1, 1], [], []>} : vector<256x32xf32>, vector<32x96xf32>, vector<256x96xf32> -> vector<256x96xf32>
    %16 = vector.broadcast %10 : vector<1x96xf32> to vector<256x96xf32>
    %17 = arith.addf %15, %16 : vector<256x96xf32>
    %18 = vector.extract_strided_slice %9 {offsets = [0, 0, 1, 0], sizes = [1, 16, 16, 32], strides = [1, 1, 1, 1]} : vector<1x18x18x32xf32> to vector<1x16x16x32xf32>
    %19 = vector.shape_cast %18 : vector<1x16x16x32xf32> to vector<256x32xf32>
    %c1 = arith.constant 1 : index
    %c0_16 = arith.constant 0 : index
    %c0_17 = arith.constant 0 : index
    %20 = vector.load %arg3[%c1, %c0_16, %c0_17] : memref<9x32x96xf32, #tpu.memory_space<vmem>>, vector<1x32x96xf32>
    %21 = vector.shape_cast %20 : vector<1x32x96xf32> to vector<32x96xf32>
    %cst_18 = arith.constant dense<0.000000e+00> : vector<256x96xf32>
    %22 = tpu.matmul %19, %21, %cst_18 {dimension_numbers = #tpu.dot_dimension_numbers<[1], [0], [0], [1], [0, 0, 1, 1], [], []>} : vector<256x32xf32>, vector<32x96xf32>, vector<256x96xf32> -> vector<256x96xf32>
    %23 = arith.addf %17, %22 : vector<256x96xf32>
    %24 = vector.extract_strided_slice %9 {offsets = [0, 0, 2, 0], sizes = [1, 16, 16, 32], strides = [1, 1, 1, 1]} : vector<1x18x18x32xf32> to vector<1x16x16x32xf32>
    %25 = vector.shape_cast %24 : vector<1x16x16x32xf32> to vector<256x32xf32>
    %c2 = arith.constant 2 : index
    %c0_19 = arith.constant 0 : index
    %c0_20 = arith.constant 0 : index
    %26 = vector.load %arg3[%c2, %c0_19, %c0_20] : memref<9x32x96xf32, #tpu.memory_space<vmem>>, vector<1x32x96xf32>
    %27 = vector.shape_cast %26 : vector<1x32x96xf32> to vector<32x96xf32>
    %cst_21 = arith.constant dense<0.000000e+00> : vector<256x96xf32>
    %28 = tpu.matmul %25, %27, %cst_21 {dimension_numbers = #tpu.dot_dimension_numbers<[1], [0], [0], [1], [0, 0, 1, 1], [], []>} : vector<256x32xf32>, vector<32x96xf32>, vector<256x96xf32> -> vector<256x96xf32>
    %29 = arith.addf %23, %28 : vector<256x96xf32>
    %30 = vector.extract_strided_slice %9 {offsets = [0, 1, 0, 0], sizes = [1, 16, 16, 32], strides = [1, 1, 1, 1]} : vector<1x18x18x32xf32> to vector<1x16x16x32xf32>
    %31 = vector.shape_cast %30 : vector<1x16x16x32xf32> to vector<256x32xf32>
    %c3 = arith.constant 3 : index
    %c0_22 = arith.constant 0 : index
    %c0_23 = arith.constant 0 : index
    %32 = vector.load %arg3[%c3, %c0_22, %c0_23] : memref<9x32x96xf32, #tpu.memory_space<vmem>>, vector<1x32x96xf32>
    %33 = vector.shape_cast %32 : vector<1x32x96xf32> to vector<32x96xf32>
    %cst_24 = arith.constant dense<0.000000e+00> : vector<256x96xf32>
    %34 = tpu.matmul %31, %33, %cst_24 {dimension_numbers = #tpu.dot_dimension_numbers<[1], [0], [0], [1], [0, 0, 1, 1], [], []>} : vector<256x32xf32>, vector<32x96xf32>, vector<256x96xf32> -> vector<256x96xf32>
    %35 = arith.addf %29, %34 : vector<256x96xf32>
    %36 = vector.extract_strided_slice %9 {offsets = [0, 1, 1, 0], sizes = [1, 16, 16, 32], strides = [1, 1, 1, 1]} : vector<1x18x18x32xf32> to vector<1x16x16x32xf32>
    %37 = vector.shape_cast %36 : vector<1x16x16x32xf32> to vector<256x32xf32>
    %c4 = arith.constant 4 : index
    %c0_25 = arith.constant 0 : index
    %c0_26 = arith.constant 0 : index
    %38 = vector.load %arg3[%c4, %c0_25, %c0_26] : memref<9x32x96xf32, #tpu.memory_space<vmem>>, vector<1x32x96xf32>
    %39 = vector.shape_cast %38 : vector<1x32x96xf32> to vector<32x96xf32>
    %cst_27 = arith.constant dense<0.000000e+00> : vector<256x96xf32>
    %40 = tpu.matmul %37, %39, %cst_27 {dimension_numbers = #tpu.dot_dimension_numbers<[1], [0], [0], [1], [0, 0, 1, 1], [], []>} : vector<256x32xf32>, vector<32x96xf32>, vector<256x96xf32> -> vector<256x96xf32>
    %41 = arith.addf %35, %40 : vector<256x96xf32>
    %42 = vector.extract_strided_slice %9 {offsets = [0, 1, 2, 0], sizes = [1, 16, 16, 32], strides = [1, 1, 1, 1]} : vector<1x18x18x32xf32> to vector<1x16x16x32xf32>
    %43 = vector.shape_cast %42 : vector<1x16x16x32xf32> to vector<256x32xf32>
    %c5 = arith.constant 5 : index
    %c0_28 = arith.constant 0 : index
    %c0_29 = arith.constant 0 : index
    %44 = vector.load %arg3[%c5, %c0_28, %c0_29] : memref<9x32x96xf32, #tpu.memory_space<vmem>>, vector<1x32x96xf32>
    %45 = vector.shape_cast %44 : vector<1x32x96xf32> to vector<32x96xf32>
    %cst_30 = arith.constant dense<0.000000e+00> : vector<256x96xf32>
    %46 = tpu.matmul %43, %45, %cst_30 {dimension_numbers = #tpu.dot_dimension_numbers<[1], [0], [0], [1], [0, 0, 1, 1], [], []>} : vector<256x32xf32>, vector<32x96xf32>, vector<256x96xf32> -> vector<256x96xf32>
    %47 = arith.addf %41, %46 : vector<256x96xf32>
    %48 = vector.extract_strided_slice %9 {offsets = [0, 2, 0, 0], sizes = [1, 16, 16, 32], strides = [1, 1, 1, 1]} : vector<1x18x18x32xf32> to vector<1x16x16x32xf32>
    %49 = vector.shape_cast %48 : vector<1x16x16x32xf32> to vector<256x32xf32>
    %c6 = arith.constant 6 : index
    %c0_31 = arith.constant 0 : index
    %c0_32 = arith.constant 0 : index
    %50 = vector.load %arg3[%c6, %c0_31, %c0_32] : memref<9x32x96xf32, #tpu.memory_space<vmem>>, vector<1x32x96xf32>
    %51 = vector.shape_cast %50 : vector<1x32x96xf32> to vector<32x96xf32>
    %cst_33 = arith.constant dense<0.000000e+00> : vector<256x96xf32>
    %52 = tpu.matmul %49, %51, %cst_33 {dimension_numbers = #tpu.dot_dimension_numbers<[1], [0], [0], [1], [0, 0, 1, 1], [], []>} : vector<256x32xf32>, vector<32x96xf32>, vector<256x96xf32> -> vector<256x96xf32>
    %53 = arith.addf %47, %52 : vector<256x96xf32>
    %54 = vector.extract_strided_slice %9 {offsets = [0, 2, 1, 0], sizes = [1, 16, 16, 32], strides = [1, 1, 1, 1]} : vector<1x18x18x32xf32> to vector<1x16x16x32xf32>
    %55 = vector.shape_cast %54 : vector<1x16x16x32xf32> to vector<256x32xf32>
    %c7 = arith.constant 7 : index
    %c0_34 = arith.constant 0 : index
    %c0_35 = arith.constant 0 : index
    %56 = vector.load %arg3[%c7, %c0_34, %c0_35] : memref<9x32x96xf32, #tpu.memory_space<vmem>>, vector<1x32x96xf32>
    %57 = vector.shape_cast %56 : vector<1x32x96xf32> to vector<32x96xf32>
    %cst_36 = arith.constant dense<0.000000e+00> : vector<256x96xf32>
    %58 = tpu.matmul %55, %57, %cst_36 {dimension_numbers = #tpu.dot_dimension_numbers<[1], [0], [0], [1], [0, 0, 1, 1], [], []>} : vector<256x32xf32>, vector<32x96xf32>, vector<256x96xf32> -> vector<256x96xf32>
    %59 = arith.addf %53, %58 : vector<256x96xf32>
    %60 = vector.extract_strided_slice %9 {offsets = [0, 2, 2, 0], sizes = [1, 16, 16, 32], strides = [1, 1, 1, 1]} : vector<1x18x18x32xf32> to vector<1x16x16x32xf32>
    %61 = vector.shape_cast %60 : vector<1x16x16x32xf32> to vector<256x32xf32>
    %c8 = arith.constant 8 : index
    %c0_37 = arith.constant 0 : index
    %c0_38 = arith.constant 0 : index
    %62 = vector.load %arg3[%c8, %c0_37, %c0_38] : memref<9x32x96xf32, #tpu.memory_space<vmem>>, vector<1x32x96xf32>
    %63 = vector.shape_cast %62 : vector<1x32x96xf32> to vector<32x96xf32>
    %cst_39 = arith.constant dense<0.000000e+00> : vector<256x96xf32>
    %64 = tpu.matmul %61, %63, %cst_39 {dimension_numbers = #tpu.dot_dimension_numbers<[1], [0], [0], [1], [0, 0, 1, 1], [], []>} : vector<256x32xf32>, vector<32x96xf32>, vector<256x96xf32> -> vector<256x96xf32>
    %65 = arith.addf %59, %64 : vector<256x96xf32>
    %66 = vector.shape_cast %65 : vector<256x96xf32> to vector<1x16x16x96xf32>
    %67 = vector.extract_strided_slice %4 {offsets = [0, 0, 0, 0], sizes = [1, 16, 16, 64], strides = [1, 1, 1, 1]} : vector<1x16x16x96xf32> to vector<1x16x16x64xf32>
    %68 = vector.extract_strided_slice %66 {offsets = [0, 0, 0, 0], sizes = [1, 16, 16, 64], strides = [1, 1, 1, 1]} : vector<1x16x16x96xf32> to vector<1x16x16x64xf32>
    %69 = arith.addf %67, %68 : vector<1x16x16x64xf32>
    %70 = arith.negf %69 : vector<1x16x16x64xf32>
    %71 = math.exp %70 : vector<1x16x16x64xf32>
    %cst_40 = arith.constant 1.000000e+00 : f32
    %72 = vector.broadcast %cst_40 : f32 to vector<1x16x16x64xf32>
    %73 = arith.addf %72, %71 : vector<1x16x16x64xf32>
    %74 = arith.divf %72, %73 : vector<1x16x16x64xf32>
    %75 = vector.extract_strided_slice %74 {offsets = [0, 0, 0, 0], sizes = [1, 16, 16, 32], strides = [1, 1, 1, 1]} : vector<1x16x16x64xf32> to vector<1x16x16x32xf32>
    %76 = vector.extract_strided_slice %74 {offsets = [0, 0, 0, 32], sizes = [1, 16, 16, 32], strides = [1, 1, 1, 1]} : vector<1x16x16x64xf32> to vector<1x16x16x32xf32>
    %77 = vector.extract_strided_slice %4 {offsets = [0, 0, 0, 64], sizes = [1, 16, 16, 32], strides = [1, 1, 1, 1]} : vector<1x16x16x96xf32> to vector<1x16x16x32xf32>
    %78 = vector.extract_strided_slice %66 {offsets = [0, 0, 0, 64], sizes = [1, 16, 16, 32], strides = [1, 1, 1, 1]} : vector<1x16x16x96xf32> to vector<1x16x16x32xf32>
    %79 = arith.mulf %76, %78 : vector<1x16x16x32xf32>
    %80 = arith.addf %77, %79 : vector<1x16x16x32xf32>
    %81 = math.tanh %80 : vector<1x16x16x32xf32>
    %cst_41 = arith.constant 1.000000e+00 : f32
    %82 = vector.broadcast %cst_41 : f32 to vector<1x16x16x32xf32>
    %83 = arith.subf %82, %75 : vector<1x16x16x32xf32>
    %84 = arith.mulf %83, %81 : vector<1x16x16x32xf32>
    %85 = arith.mulf %75, %5 : vector<1x16x16x32xf32>
    %86 = arith.addf %84, %85 : vector<1x16x16x32xf32>
    %c0_42 = arith.constant 0 : index
    %c0_43 = arith.constant 0 : index
    %c0_44 = arith.constant 0 : index
    %c0_45 = arith.constant 0 : index
    %87 = vector.load %arg7[%c0_42, %c0_43, %c0_44, %c0_45] : memref<1x16x16x32xf32, #tpu.memory_space<vmem>>, vector<1x16x16x32xf32>
    tpu.vector_store %arg7[%c0_42, %c0_43, %c0_44, %c0_45], %86 {strides = array<i32>} : memref<1x16x16x32xf32, #tpu.memory_space<vmem>>, vector<1x16x16x32xf32>,
    %c0_46 = arith.constant 0 : index
    %c0_47 = arith.constant 0 : index
    %c0_48 = arith.constant 0 : index
    %c0_49 = arith.constant 0 : index
    %c0_50 = arith.constant 0 : index
    %88 = vector.load %arg5[%c0_46, %c0_47, %c0_48, %c0_49, %c0_50] : memref<1x1x16x16x32xf32, #tpu.memory_space<vmem>>, vector<1x1x16x16x32xf32>
    %89 = vector.shape_cast %88 : vector<1x1x16x16x32xf32> to vector<1x16x16x32xf32>
    %90 = vector.shape_cast %86 : vector<1x16x16x32xf32> to vector<1x1x16x16x32xf32>
    tpu.vector_store %arg5[%c0_46, %c0_47, %c0_48, %c0_49, %c0_50], %90 {strides = array<i32>} : memref<1x1x16x16x32xf32, #tpu.memory_space<vmem>>, vector<1x1x16x16x32xf32>,
    %c7_i32 = arith.constant 7 : i32
    %91 = arith.cmpi eq, %arg1, %c7_i32 : i32
    %92 = arith.extui %91 : i1 to i32
    %c0_i32_51 = arith.constant 0 : i32
    %93 = arith.cmpi ne, %92, %c0_i32_51 : i32
    scf.if %93 {
      %c0_52 = arith.constant 0 : index
      %c0_53 = arith.constant 0 : index
      %c0_54 = arith.constant 0 : index
      %c0_55 = arith.constant 0 : index
      %94 = vector.load %arg6[%c0_52, %c0_53, %c0_54, %c0_55] : memref<1x16x16x32xf32, #tpu.memory_space<vmem>>, vector<1x16x16x32xf32>
      tpu.vector_store %arg6[%c0_52, %c0_53, %c0_54, %c0_55], %86 {strides = array<i32>} : memref<1x16x16x32xf32, #tpu.memory_space<vmem>>, vector<1x16x16x32xf32>,
    } else {
    }
    return
  }
  func.func @transform_0(%arg0: i32, %arg1: i32) -> (i32, i32, i32, i32, i32) {
    %c0_i32 = arith.constant 0 : i32
    %c0_i32_0 = arith.constant 0 : i32
    %c0_i32_1 = arith.constant 0 : i32
    %c0_i32_2 = arith.constant 0 : i32
    return %arg1, %arg0, %c0_i32, %c0_i32_0, %c0_i32_1 : i32, i32, i32, i32, i32
  }
  func.func @transform_1(%arg0: i32, %arg1: i32) -> (i32, i32, i32) {
    %c0_i32 = arith.constant 0 : i32
    %c0_i32_0 = arith.constant 0 : i32
    %c0_i32_1 = arith.constant 0 : i32
    %c0_i32_2 = arith.constant 0 : i32
    return %c0_i32, %c0_i32_0, %c0_i32_1 : i32, i32, i32
  }
  func.func @transform_2(%arg0: i32, %arg1: i32) -> (i32, i32) {
    %c0_i32 = arith.constant 0 : i32
    %c0_i32_0 = arith.constant 0 : i32
    %c0_i32_1 = arith.constant 0 : i32
    return %c0_i32, %c0_i32_0 : i32, i32
  }
  func.func @transform_3(%arg0: i32, %arg1: i32) -> (i32, i32, i32, i32, i32) {
    %c0_i32 = arith.constant 0 : i32
    %c0_i32_0 = arith.constant 0 : i32
    %c0_i32_1 = arith.constant 0 : i32
    %c0_i32_2 = arith.constant 0 : i32
    return %arg1, %arg0, %c0_i32, %c0_i32_0, %c0_i32_1 : i32, i32, i32, i32, i32
  }
  func.func @transform_4(%arg0: i32, %arg1: i32) -> (i32, i32, i32, i32) {
    %c0_i32 = arith.constant 0 : i32
    %c0_i32_0 = arith.constant 0 : i32
    %c0_i32_1 = arith.constant 0 : i32
    %c0_i32_2 = arith.constant 0 : i32
    return %arg0, %c0_i32, %c0_i32_0, %c0_i32_1 : i32, i32, i32, i32
  }
}

</mosaic_0001>

<bundles_post_ra>
// kernel: tpu_custom_call.1
= control target key start
LH: loop header
LB: loop body
LE: loop exit
PB: predicated region body
PF: predicated region fallthrough
CT: control target
= control target key end

     0   :  { %s8957_s0 = inlined_call_operand.hbm [shape: f32[8,2,16,16,96], index: 0, kind: input, shape index: {}]   ;;  %s8958_s1 = inlined_call_operand.hbm [shape: f32[9,32,96], index: 1, kind: input, shape index: {}]   ;;  %s8959_s2 = inlined_call_operand.hbm [shape: f32[1,96], index: 2, kind: input, shape index: {}]   ;;  %s8960_s3 = inlined_call_operand.hbm [shape: f32[8,2,16,16,32], index: 3, kind: output, shape index: {0}]   ;;  %s8961_s4 = inlined_call_operand.hbm [shape: f32[2,16,16,32], index: 4, kind: output, shape index: {1}]  }
   0x1   :  { %9115 = sst [smem:[#allocation86_spill]] %s8958_s1 }
   0x2   :  { %9116 = sst [smem:[#allocation87_spill]] %s8959_s2 }
   0x3   :  { %9117 = sst [smem:[#allocation88_spill]] %s8960_s3 }
   0x4   :  { %9118 = sst [smem:[#allocation89_spill]] %s8961_s4 }
   0x5   :  { %10 = vsyncpa [#allocation4], 0 }
   0x6   :  { %12 = vsyncpa [#allocation4 + $0x1], 0 }
   0x7   :  { %13 = vsyncpa [#allocation7], 0 }
   0x8   :  { %14 = vsyncpa [#allocation5], 0 }
   0x9   :  { %16 = vsyncpa [#allocation5 + $0x1], 0 }
   0xa   :  { %17 = vsyncpa [#allocation11], 0 }
   0xb   :  { %19 = vsyncpa [#allocation11 + $0x1], 0  ;;  %s6198_s15 = smov 0   ;;  %s6200_s16 = smov 0  }
   0xc   :  { %s6202_s17 = smov 0   ;;  %s6204_s18 = smov 0  }
   0xd   :  { %s6206_s19 = smov 0   ;;  %s6208_s20 = smov 0  }
   0xe   :  { %s6210_s21 = smov 0   ;;  %s6212_s22 = smov 0  }
   0xf   :  { %s6214_s23 = smov 0   ;;  %s6216_s24 = smov 0  }
  0x10   :  { %s6218_s25 = smov 0  }
  0x11 LB: > { %9119 = sst [smem:[#allocation16_spill]] %s6117_s15  ;;  %s4377_s26 = sadd.s32 4294967295, %s6157_s25   ;;  %s6157_s25 = sphi %s6218_s25, %s25_s25   ;;  %s6153_s24 = sphi %s6216_s24, %s9397_s24   ;;  %s6149_s23 = sphi %s6214_s23, %s9396_s23   ;;  %s6145_s22 = sphi %s6212_s22, %s9395_s22   ;;  %s6141_s21 = sphi %s6210_s21, %s9394_s21   ;;  %s6137_s20 = sphi %s6208_s20, %s9393_s20   ;;  %s6133_s19 = sphi %s6206_s19, %s9392_s19   ;;  %s6129_s18 = sphi %s6204_s18, %s9391_s18   ;;  %s6125_s17 = sphi %s6202_s17, %s9390_s17   ;;  %s6121_s16 = sphi %s6200_s16, %s9389_s16   ;;  %s6117_s15 = sphi %s6198_s15, %s9388_s15  }
  0x12   : > { %9120 = sst [smem:[#allocation17_spill]] %s6129_s18  ;;  %s4378_s27 = sadd.s32 4294967294, %s6157_s25  }
  0x13   : > { %9121 = sst [smem:[#allocation18_spill]] %s6141_s21  ;;  %p59_p0 = scmp.ne.s32.totalorder %s6133_s19, %s6129_s18 }
  0x14   : > { %9122 = sst [smem:[#allocation19_spill]] %s6145_s22  ;;  %p6257_p1 = scmp.eq.s32.totalorder %s4377_s26, 0 }
  0x15   : > { %p6261_p2 = scmp.eq.s32.totalorder %s4377_s26, 15  ;;  %p133_p3 = scmp.eq.s32.totalorder %s4378_s27, 15 }
  0x16   : > { %p6267_p4 = por %p6257_p1, %p59_p0  ;;  %p152_p6 = scmp.ne.s32.totalorder %s6125_s17, %s6121_s16 }
  0x17   : > { %p6272_p5 = por %p133_p3, %p59_p0  ;;  %p158_p7 = scmp.ne.s32.totalorder %s6121_s16, %s6117_s15 }
  0x18   : > { %p4379_p8 = scmp.ge.s32.totalorder %s6157_s25, 1  ;;  %p6283_p9 = por %p152_p6, %p6261_p2 }
  0x19   : > { %s9126_s6 = scalar_select %p6272_p5, 1, 0 }
  0x1a   : > { %s9128_s7 = scalar_select %p6283_p9, 1, 0 }
  0x1b   : > { %9127 = sst [smem:[#allocation20_spill]] %s9126_s6  ;;  %p166_p10 = scmp.lt.s32.totalorder %s6157_s25, 17 }
  0x1c   : > { %9129 = sst [smem:[#allocation21_spill]] %s9128_s7  ;;  %p6288_p11 = por %p158_p7, %p133_p3 }
  0x1d   : > { %p6292_p12 = pnand %p4379_p8, %p166_p10  ;;  %s6159_s10 = smov [#allocation6]  }
  0x1e   : > { %s9130_s8 = scalar_select %p6288_p11, 1, 0 }
  0x1f   : > { %s178_s11 = sshll.u32 %s6159_s10, 4  ;;  %p5576_p13 = pneg %p6292_p12  ;;  %s179_s11 = int_to_ptr.vmem [resolvable:$true] %s178_s11 }
  0x20   : > { %9131 = sst [smem:[#allocation22_spill]] %s9130_s8  ;;  %s6160_s13 = smov [#allocation8]  }
  0x21   : > { %p6300_p0 = pnand %p5576_p13, %p6257_p1  ;;  %s192_s14 = sshll.u32 %s6160_s13, 4  ;;  %s193_s14 = int_to_ptr.vmem [resolvable:$true] %s192_s14 }
  0x22   : > { %s5934_s26 = scalar_lea.vmem %s179_s11, 4608  ;;  %p5942_p10 = scmp.lt.s32.totalorder %s179_s11, %s179_s11 }
  0x23   : > { %p5925_p3 = pneg %p6300_p0  ;;  %p5935_p6 = scmp.ne.s32.totalorder %s179_s11, %s5934_s26 }
  0x24   : > { %p5943_p11 = scmp.lt.s32.totalorder %s5934_s26, %s5934_s26 }
  0x25   : > { %p5937_p7 = pnand %p5935_p6, %p5925_p3 }
  0x26   : > { %p5944_p5 = por %p5943_p11, %p5942_p10 }
  0x27   : > { %p5938_p8 = pneg %p5937_p7 }
  0x29   : > { %p5945_p13 = pnand %p5944_p5, %p5938_p8 }
  0x2b   : > { %5948 = shalt.err (!%p5945_p13)
}
  0x2c   : > { %s8965_s27 = smov 128   ;;  %s8966_s10 = smov 8  }
  0x2d   : > { %s9134_s1 = sld [smem:[#allocation86_spill]]  ;;  %s5960_s8 = scalar_lea.vmem %s193_s14, 16 }
  0x2e   : > { %p5961_p6 = scmp.ne.s32.totalorder %s193_s14, %s5960_s8  ;;  %s5967_s26 = scalar_lea.vmem %s193_s14, 32 }
  0x2f   : > { %p5968_p5 = scmp.lt.s32.totalorder %s193_s14, %s193_s14  ;;  %p5969_p8 = scmp.lt.s32.totalorder %s5967_s26, %s5960_s8 }
  0x30   : > { %p5963_p7 = pnand %p5961_p6, %p5925_p3 }
  0x31   : > { %p5970_p10 = por %p5969_p8, %p5968_p5 }
  0x32   : > { %p5964_p11 = pneg %p5963_p7 }
  0x33   : > { %5579 = dma.hbm_to_vmem [thread:$0]  (!%p6300_p0), %s9134_s1, 4608, %s179_s11, [#allocation7], %s8965_s27, %s8965_s27, %s8966_s10  }
  0x34   : > { %p5971_p13 = pnand %p5970_p10, %p5964_p11 }
  0x36   : > { %5974 = shalt.err (!%p5971_p13)
}
  0x37   : > { %s9135_s2 = sld [smem:[#allocation87_spill]]  ;;  %s34_s5 = sadd.s32 1, %s6149_s23 }
  0x38   : > { %p35_p3 = scmp.ge.s32.totalorder %s34_s5, 8  ;;  %s37_s8 = sadd.s32 1, %s6153_s24 }
  0x39   : > { %s46_s11 = sadd.s32 1, %s6137_s20  ;;  %p53_p6 = scmp.ne.s32.totalorder %s6137_s20, %s6133_s19 }
  0x3a   : > { %s9399_s5 = smov (%p35_p3, %s34_s5), 0  ;;  %s9401_s8 = smov (!%p35_p3, %s37_s8), %s6153_s24 }
  0x3b   : > { %9136 = sst [smem:[#allocation23_spill]] %s9399_s5  ;;  %s41_s15 = ssub.s32 %s6149_s23, %s9399_s5 }
  0x3c   : > { %p54_p7 = scmp.eq.s32.totalorder %s6157_s25, 0  ;;  %p39_p11 = scmp.ge.s32.totalorder %s9401_s8, 2 }
  0x3d   : > { %5582 = dma.hbm_to_vmem [thread:$0]  (!%p6300_p0), %s9135_s2, 16, %s193_s14, [#allocation7]  }
  0x3e   : > { %p6338_p0 = por %p6261_p2, %p53_p6  ;;  %p6342_p5 = por %p54_p7, %p53_p6 }
  0x3f   : > { %p5596_p8 = scmp.lt.s32.totalorder %s6157_s25, 16  ;;  %s9403_s8 = smov (%p39_p11, %s9401_s8), 0 }
  0x40   : > { %s9137_s6 = scalar_select %p6338_p0, 1, 0 }
  0x41   : > { %s203_s14 = sand.u32 1, %s6137_s20   ;;  %s4384_s13 = sshll.u32 %s6153_s24, 5 }
  0x42   : > { %9138 = sst [smem:[#allocation24_spill]] %s9137_s6  ;;  %s42_s26 = ssub.s32 %s6153_s24, %s9403_s8 }
  0x43   : > { %s43_s27 = sor.u32 %s42_s26, %s41_s15  ;;  %p140_p10 = scmp.eq.s32.totalorder %s42_s26, 0 }
  0x44   : > { %p44_p13 = scmp.eq.s32.totalorder %s43_s27, 0  ;;  %s4383_s29 = sshll.u32 %s203_s14, 8 }
  0x45   : > { %s9140_s10 = sadd.s32 1, %s6125_s17  ;;  %s4385_s5 = sshll.u32 %s6149_s23, 6 }
  0x46   : > { %s6356_s1 = scalar_select %p140_p10, %s6125_s17, %s9140_s10  }
  0x47   : > { %s6359_s2 = scalar_select %p44_p13, %s6137_s20, %s46_s11  }
  0x48   : > { %s213_s18 = sadd.s32 %s4385_s5, %s4384_s13  ;;  %s207_s4 = scalar_lea.vmem [#allocation3], %s4383_s29 }
  0x49   : > { %s216_s7 = sshll.u32 %s207_s4, 4  ;;  %s4386_s3 = sshll.u32 %s213_s18, 7  ;;  %s217_s7 = int_to_ptr.vmem [resolvable:$true] %s216_s7 }
  0x4a   : > { %s215_s21 = scalar_lea.hbm %s8957_s0, %s4386_s3  ;;  %p6369_p2 = pnand %p5596_p8, %p6342_p5 }
  0x4b   : > { %s204_s10 = scalar_lea.sflag [#allocation4], %s203_s14  ;;  %s5988_s11 = scalar_lea.vmem %s217_s7, 4096 }
  0x4c   : > { %p5977_p3 = pneg %p6369_p2  ;;  %p5989_p6 = scmp.ne.s32.totalorder %s217_s7, %s5988_s11 }
  0x4d   : > { %s6163_s4 = smov [#allocation3]  }
  0x4e   : > { %p5991_p7 = pnand %p5989_p6, %p5977_p3  ;;  %s5993_s18 = sshll.u32 %s6163_s4, 4  ;;  %s5994_s18 = int_to_ptr.vmem [resolvable:$false] %s5993_s18 }
  0x4f   : > { %s5995_s5 = scalar_lea.vmem %s5994_s18, 8192  ;;  %p5996_p10 = scmp.lt.s32.totalorder %s217_s7, %s5994_s18 }
  0x50   : > { %p5992_p11 = pneg %p5991_p7  ;;  %p5997_p13 = scmp.lt.s32.totalorder %s5995_s5, %s5988_s11 }
  0x52   : > { %p5998_p9 = por %p5997_p13, %p5996_p10 }
  0x54   : > { %p5999_p0 = pnand %p5998_p9, %p5992_p11 }
  0x56   : > { %6002 = shalt.err (!%p5999_p0)
}
  0x57   : > { %s9142_s3 = smov 8   ;;  %s9143_s22 = smov 128  }
  0x58   : > { %5586 = dma.hbm_to_vmem [thread:$0]  (!%p6369_p2), %s215_s21, 4096, %s217_s7, %s204_s10, %s9143_s22, %s9143_s22, %s9142_s3  }
  0x59   : > { %228 = sbr.rel (%p6292_p12) target bundleno = 1064 (0x428), region = 32 }
  0x5e   : > { %s6383_s15 = sand.u32 1, %s6133_s19  }
  0x5f   : > { %s4388_s6 = sshll.u32 %s6383_s15, 8  ;;  %s231_s12 = scalar_lea.sflag [#allocation4], %s6383_s15 }
  0x60   : > { %s6387_s14 = scalar_lea.vmem [#allocation3], %s4388_s6 }
  0x61   : > { %6100 = dma.done.wait (%p6267_p4), %s231_s12, 4096  }
  0x62   : > { %6102 = vsyncadd (%p6267_p4), %s231_s12, 4294963200 }
  0x63   : > { %6104 = dma.done.wait (%p6257_p1), [#allocation7], 4624  }
  0x64   : > { %6106 = vsyncadd (%p6257_p1), [#allocation7], 4294962672  ;;  %s269_s21 = sand.u32 1, %s6121_s16   ;;  %s6400_s9 = scalar_lea.vmem [#allocation9], %s4388_s6 }
  0x65   : > { %s4392_s7 = sshll.u32 %s269_s21, 8  ;;  %s9144_s26 = sld [smem:[#allocation18_spill]] }
  0x66   : > { %s6402_s13 = scalar_lea.vmem [#allocation10], %s4392_s7 }
  0x6b   : > { %p4393_p9 = scmp.ne.s32.totalorder %s9144_s26, 0 }
  0x6d   : > { %275 = sbr.rel (%p4393_p9) target bundleno = 131 (0x83), region = 48 }
  0x72   : > { %vm276_vm0 = vcmask 261120   ;;  %v6164_v0 = vmov 0.0  }
  0x73   : > { %277 = vst.msk [vmem:[#allocation2] sm:$0xff] %vm276_vm0, %v6164_v0  ;;  %278 = vst.msk [vmem:[#allocation2 + $0x8] sm:$0xff] %vm276_vm0, %v6164_v0 }
  0x74   : > { %279 = vst.msk [vmem:[#allocation2 + $0x10] sm:$0xff] %vm276_vm0, %v6164_v0  ;;  %280 = vst.msk [vmem:[#allocation2 + $0x18] sm:$0xff] %vm276_vm0, %v6164_v0 }
  0x75   : > { %281 = vst.msk [vmem:[#allocation2 + $0x20] sm:$0xff] %vm276_vm0, %v6164_v0  ;;  %282 = vst.msk [vmem:[#allocation2 + $0x28] sm:$0xff] %vm276_vm0, %v6164_v0 }
  0x76   : > { %283 = vst.msk [vmem:[#allocation2 + $0x30] sm:$0xff] %vm276_vm0, %v6164_v0  ;;  %284 = vst.msk [vmem:[#allocation2 + $0x38] sm:$0xff] %vm276_vm0, %v6164_v0 }
  0x77   : > { %285 = vst.msk [vmem:[#allocation2 + $0x40] sm:$0xff] %vm276_vm0, %v6164_v0  ;;  %286 = vst.msk [vmem:[#allocation2 + $0x48] sm:$0xff] %vm276_vm0, %v6164_v0 }
  0x78   : > { %287 = vst.msk [vmem:[#allocation2 + $0x50] sm:$0xff] %vm276_vm0, %v6164_v0  ;;  %288 = vst.msk [vmem:[#allocation2 + $0x58] sm:$0xff] %vm276_vm0, %v6164_v0 }
  0x79   : > { %289 = vst.msk [vmem:[#allocation2 + $0x60] sm:$0xff] %vm276_vm0, %v6164_v0  ;;  %290 = vst.msk [vmem:[#allocation2 + $0x68] sm:$0xff] %vm276_vm0, %v6164_v0 }
  0x7a   : > { %291 = vst.msk [vmem:[#allocation2 + $0x70] sm:$0xff] %vm276_vm0, %v6164_v0  ;;  %292 = vst.msk [vmem:[#allocation2 + $0x78] sm:$0xff] %vm276_vm0, %v6164_v0 }
  0x7b   : > { %293 = vst.msk [vmem:[#allocation2 + $0x80] sm:$0xff] %vm276_vm0, %v6164_v0  ;;  %294 = vst.msk [vmem:[#allocation2 + $0x88] sm:$0xff] %vm276_vm0, %v6164_v0 }
  0x7c   : > { %295 = vst.msk [vmem:[#allocation2 + $0x90] sm:$0xff] %vm276_vm0, %v6164_v0  ;;  %296 = vst.msk [vmem:[#allocation2 + $0x98] sm:$0xff] %vm276_vm0, %v6164_v0 }
  0x7d   : > { %297 = vst.msk [vmem:[#allocation2 + $0xa0] sm:$0xff] %vm276_vm0, %v6164_v0  ;;  %298 = vst.msk [vmem:[#allocation2 + $0xa8] sm:$0xff] %vm276_vm0, %v6164_v0 }
  0x7e   : > { %299 = vst.msk [vmem:[#allocation2 + $0xb0] sm:$0xff] %vm276_vm0, %v6164_v0  ;;  %300 = vst.msk [vmem:[#allocation2 + $0xb8] sm:$0xff] %vm276_vm0, %v6164_v0 }
  0x7f   : > { %301 = vst.msk [vmem:[#allocation2 + $0xc0] sm:$0xff] %vm276_vm0, %v6164_v0  ;;  %302 = vst.msk [vmem:[#allocation2 + $0xc8] sm:$0xff] %vm276_vm0, %v6164_v0 }
  0x80   : > { %303 = vst.msk [vmem:[#allocation2 + $0xd0] sm:$0xff] %vm276_vm0, %v6164_v0  ;;  %304 = vst.msk [vmem:[#allocation2 + $0xd8] sm:$0xff] %vm276_vm0, %v6164_v0 }
  0x81   : > { %305 = vst.msk [vmem:[#allocation2 + $0xe0] sm:$0xff] %vm276_vm0, %v6164_v0  ;;  %306 = vst.msk [vmem:[#allocation2 + $0xe8] sm:$0xff] %vm276_vm0, %v6164_v0 }
  0x82   : > { %307 = vst.msk [vmem:[#allocation2 + $0xf0] sm:$0xff] %vm276_vm0, %v6164_v0  ;;  %308 = vst.msk [vmem:[#allocation2 + $0xf8] sm:$0xff] %vm276_vm0, %v6164_v0 }
  0x83 PF: > { %v528_v1 = vld [vmem:[#allocation6 + $0x18] sm:$0xff]  ;;  %v527_v2 = vld [vmem:[#allocation6 + $0x10] sm:$0xff]  ;;  %v526_v5 = vld [vmem:[#allocation6 + $0x8] sm:$0xff]  ;;  %vm406_vm1 = vcmask 1040384   ;;  %v6165_v7 = vmov 0.0   ;;  %vm535_vm2 = vcmask 261120  }
  0x84   : > { %5554 = vmatprep.subr.mxu1 %v528_v1  ;;  %5050 = vmatprep.subr.mxu0 %v528_v1  ;;  %v355_v3 = vld [vmem:[#allocation2 + $0x70] sm:$0xff]  ;;  %v6437_v4 = vld [vmem:[#allocation2 + $0x78] sm:$0xff]  ;;  %v6439_v8 = vrot.slane %v6165_v7, 7  ;;  %v357_v9 = vld [vmem:[#allocation2 + $0x80] sm:$0xff]  ;;  %vm857_vm3 = vcmask 1046528   ;;  %vm1264_vm4 = vcmask 1045504  }
  0x85   : > { %5558 = vmatpush3.msra.mxu1 %v528_v1  ;;  %5051 = vmatpush3.msra.mxu0 %v528_v1  ;;  %v430_v6 = vrot.slane %v355_v3, 7  ;;  %v8984_v10 = vrot.slane %v6437_v4, 7  ;;  %v341_v11 = vld [vmem:[#allocation2] sm:$0xff]  ;;  %v6442_v13 = vld [vmem:[#allocation2 + $0x88] sm:$0xff]  ;;  %v433_v15 = vrot.slane %v357_v9, 7  ;;  %v359_v17 = vld [vmem:[#allocation2 + $0x90] sm:$0xff] }
  0x86   : > { %9145 = vst [vmem:[#allocation25_spill] sm:$0xff] %v6439_v8  ;;  %5555 = vmatprep.subr.mxu1 %v527_v2  ;;  %5052 = vmatprep.subr.mxu0 %v527_v2  ;;  %v525_v12 = vld [vmem:[#allocation6] sm:$0xff]  ;;  %v6447_v16 = vld [vmem:[#allocation2 + $0x8] sm:$0xff]  ;;  %v6451_v18 = vsel %vm406_vm1, 0.0, %v6439_v8  ;;  %v409_v19 = vrot.slane %v341_v11, 7  ;;  %v343_v20 = vld [vmem:[#allocation2 + $0x10] sm:$0xff] }
  0x87   : > { %5559 = vmatpush3.msra.mxu1 %v527_v2  ;;  %5053 = vmatpush3.msra.mxu0 %v527_v2  ;;  %v6445_v14 = vsel %vm406_vm1, 0.0, %v430_v6  ;;  %9146 = vst [vmem:[#allocation26_spill] sm:$0xff] %v6451_v18  ;;  %v6456_v21 = vsel %vm406_vm1, %v430_v6, %v8984_v10  ;;  %v942_v22 = vld [vmem:[#allocation6 + $0x38] sm:$0xff]  ;;  %v8983_v23 = vrot.slane %v6442_v13, 7  ;;  %v410_v24 = vrot.slane %v6447_v16, 7  ;;  %v361_v31 = vld [vmem:[#allocation2 + $0xa0] sm:$0xff] }
  0x88   : > { %5556 = vmatprep.subr.mxu1 %v526_v5  ;;  %5054 = vmatprep.subr.mxu0 %v526_v5  ;;  %v436_v25 = vrot.slane %v359_v17, 7  ;;  %v6462_v26 = vld [vmem:[#allocation2 + $0x98] sm:$0xff]  ;;  %v6467_v28 = vsel %vm406_vm1, 0.0, %v433_v15  ;;  %v412_v29 = vrot.slane %v343_v20, 7  ;;  %v6474_v32 = vsel %vm406_vm1, 0.0, %v409_v19  ;;  %v345_v33 = vld [vmem:[#allocation2 + $0x20] sm:$0xff] }
  0x89   : > { %5560 = vmatpush3.msra.mxu1 %v526_v5  ;;  %5055 = vmatpush3.msra.mxu0 %v526_v5  ;;  %v1349_v27 = vld [vmem:[#allocation6 + $0x58] sm:$0xff]  ;;  %v6481_v34 = vsel %vm406_vm1, %v433_v15, %v8983_v23  ;;  %v8982_v35 = vrot.slane %v6462_v26, 7  ;;  %v941_v36 = vld [vmem:[#allocation6 + $0x30] sm:$0xff]  ;;  %v6489_v37 = vsel %vm406_vm1, %v409_v19, %v410_v24  ;;  %v439_v40 = vrot.slane %v361_v31, 7  ;;  %v6495_v41 = vld [vmem:[#allocation2 + $0xa8] sm:$0xff]  ;;  %s6166_s28 = smov 96  }
  0x8a   : > { %5557 = vmatprep.subr.mxu1 %v525_v12  ;;  %5056 = vmatprep.subr.mxu0 %v525_v12  ;;  %v6469_v30 = vld [vmem:[#allocation2 + $0x18] sm:$0xff]  ;;  %9147 = vst [vmem:[#allocation27_spill] sm:$0xff] %v6489_v37  ;;  %v6492_v38 = vsel %vm406_vm1, 0.0, %v436_v25  ;;  %v6500_v42 = vsel %vm406_vm1, 0.0, %v412_v29  ;;  %v415_v43 = vrot.slane %v345_v33, 7  ;;  %v6502_v44 = vld [vmem:[#allocation2 + $0x28] sm:$0xff] }
  0x8b   : > { %5561 = vmatpush3.msra.mxu1 %v525_v12  ;;  %5082 = vmatprep.mubr.msk.f32.mxu1 %vm535_vm2, %v6445_v14  ;;  %v8989_v39 = vrot.slane %v6469_v30, 7  ;;  %v363_v45 = vld [vmem:[#allocation2 + $0xb0] sm:$0xff]  ;;  %v940_v48 = vld [vmem:[#allocation6 + $0x28] sm:$0xff]  ;;  %v6513_v49 = vsel %vm406_vm1, %v436_v25, %v8982_v35  ;;  %v8981_v50 = vrot.slane %v6495_v41, 7  ;;  %v6524_v52 = vsel %vm406_vm1, 0.0, %v439_v40  ;;  %v6527_v55 = vld [vmem:[#allocation2 + $0xb8] sm:$0xff] }
  0x8c   : > { %5057 = vmatpush3.msra.mxu0 %v525_v12  ;;  %5058 = vmatprep.mubr.msk.f32.mxu0 %vm535_vm2, %v6451_v18  ;;  %v1348_v46 = vld [vmem:[#allocation6 + $0x50] sm:$0xff]  ;;  %v8988_v53 = vrot.slane %v6502_v44, 7  ;;  %v442_v54 = vrot.slane %v363_v45, 7  ;;  %v6530_v56 = vsel %vm406_vm1, 0.0, %v415_v43  ;;  %v6532_v58 = vld [vmem:[#allocation2 + $0x38] sm:$0xff]  ;;  %v365_v59 = vld [vmem:[#allocation2 + $0xc0] sm:$0xff] }
  0x8d   : > { %5083 = vmatmul.mubr.msk.f32.vlgmr.msra.gmra.mxu1 %vm535_vm2, %v6456_v21  ;;  %5106 = vmatprep.subr.mxu1 %v942_v22  ;;  %v347_v47 = vld [vmem:[#allocation2 + $0x30] sm:$0xff]  ;;  %v6521_v51 = vsel %vm406_vm1, %v412_v29, %v8989_v39  ;;  %9148 = vst [vmem:[#allocation28_spill] sm:$0xff] %v6530_v56  ;;  %v1347_v60 = vld [vmem:[#allocation6 + $0x48] sm:$0xff]  ;;  %v349_v61 = vld [vmem:[#allocation2 + $0x40] sm:$0xff]  ;;  %v6543_v63 = vsel %vm406_vm1, %v439_v40, %v8981_v50  ;;  %v8979_v0 = vrot.slane %v6527_v55, 7  ;;  %v8987_v3 = vrot.slane %v6532_v58, 7 }
  0x8e   : > { %5059 = vmatmul.mubr.msk.f32.vlgmr.msra.gmra.mxu0 %vm535_vm2, %v6439_v8  ;;  %5107 = vmatpush3.msra.mxu1 %v942_v22  ;;  %v418_v57 = vrot.slane %v347_v47, 7  ;;  %v939_v62 = vld [vmem:[#allocation6 + $0x20] sm:$0xff]  ;;  %9149 = vst [vmem:[#allocation29_spill] sm:$0xff] %v6543_v63  ;;  %v6551_v1 = vsel %vm406_vm1, %v415_v43, %v8988_v53  ;;  %v6554_v2 = vsel %vm406_vm1, 0.0, %v442_v54  ;;  %v445_v5 = vrot.slane %v365_v59, 7  ;;  %v6557_v6 = vld [vmem:[#allocation2 + $0xc8] sm:$0xff] }
  0x8f   : > { %5162 = vmatprep.subr.mxu0 %v1349_v27  ;;  %5085 = vmatprep.mubr.msk.f32.mxu1 %vm535_vm2, %v6467_v28  ;;  %9150 = vst [vmem:[#allocation30_spill] sm:$0xff] %v6551_v1  ;;  %v421_v9 = vrot.slane %v349_v61, 7  ;;  %v6562_v11 = vld [vmem:[#allocation2 + $0x48] sm:$0xff]  ;;  %v367_v12 = vld [vmem:[#allocation2 + $0xd0] sm:$0xff]  ;;  %v1346_v17 = vld [vmem:[#allocation6 + $0x40] sm:$0xff]  ;;  %v6575_v20 = vsel %vm406_vm1, %v442_v54, %v8979_v0  ;;  %v8978_v22 = vrot.slane %v6557_v6, 7 }
  0x90   : > { %5163 = vmatpush3.msra.mxu0 %v1349_v27  ;;  %5061 = vmatprep.mubr.msk.f32.mxu0 %vm535_vm2, %v6474_v32  ;;  %v6560_v7 = vsel %vm406_vm1, 0.0, %v418_v57  ;;  %v351_v15 = vld [vmem:[#allocation2 + $0x50] sm:$0xff]  ;;  %v6566_v19 = vld [vmem:[#allocation6 + $0x78] sm:$0xff]  ;;  %9151 = vst [vmem:[#allocation31_spill] sm:$0xff] %v6575_v20  ;;  %v6583_v25 = vsel %vm406_vm1, %v418_v57, %v8987_v3  ;;  %v6586_v27 = vsel %vm406_vm1, 0.0, %v445_v5  ;;  %v8986_v29 = vrot.slane %v6562_v11, 7 }
  0x91   : > { %5086 = vmatmul.mubr.msk.f32.gmra.mxu1 %vm535_vm2, %v6481_v34  ;;  %5108 = vmatprep.subr.mxu1 %v941_v36  ;;  %9152 = vst [vmem:[#allocation32_spill] sm:$0xff] %v6583_v25  ;;  %v448_v31 = vrot.slane %v367_v12, 7  ;;  %v6589_v33 = vld [vmem:[#allocation2 + $0xd8] sm:$0xff]  ;;  %v424_v40 = vrot.slane %v351_v15, 7  ;;  %v369_v45 = vld [vmem:[#allocation2 + $0xe0] sm:$0xff]  ;;  %v6628_v15 = vld [vmem:[#allocation2 + $0x68] sm:$0xff] }
  0x92   : > { %5062 = vmatmul.mubr.msk.f32.gmra.mxu0 %vm535_vm2, %v6489_v37  ;;  %5088 = vmatprep.mubr.msk.f32.mxu1 %vm535_vm2, %v6492_v38  ;;  %v6594_v43 = vld [vmem:[#allocation2 + $0x58] sm:$0xff]  ;;  %v353_v47 = vld [vmem:[#allocation2 + $0x60] sm:$0xff]  ;;  %v8980_v54 = vrot.slane %v6589_v33, 7  ;;  %v6616_v57 = vsel %vm406_vm1, %v421_v9, %v8986_v29  ;;  %v451_v61 = vrot.slane %v369_v45, 7  ;;  %v859_v45 = vrot.slane %v6439_v8, 1  ;;  %s6167_s30 = smov 32  }
  0x93   : > { %5064 = vmatprep.mubr.msk.f32.mxu0 %vm535_vm2, %v6500_v42  ;;  %5109 = vmatpush3.msra.mxu1 %v941_v36  ;;  %v6592_v36 = vsel %vm406_vm1, 0.0, %v421_v9  ;;  %v6619_v59 = vsel %vm406_vm1, 0.0, %v448_v31  ;;  %v427_v12 = vrot.slane %v353_v47, 7  ;;  %v507_v47 = vsel %vm406_vm1, %v6439_v8, 0.0  ;;  %s6168_s29 = smov 64   ;;  %s9371_s27 = sld [smem:[#allocation18_spill]] }
  0x94   : > { %5164 = vmatprep.subr.mxu0 %v1348_v46  ;;  %5110 = vmatprep.subr.mxu1 %v940_v48  ;;  %v6639_v9 = vsel %vm406_vm1, %v448_v31, %v8980_v54  ;;  %v6654_v31 = vsel %vm406_vm1, 0.0, %v451_v61  ;;  %v8992_v54 = vrot.slane %v6628_v15, 7  ;;  %v1265_v50 = vrot.slane %v6451_v18, 2 }
  0x95   : > { %5089 = vmatmul.mubr.msk.f32.gmra.mxu1 %vm535_vm2, %v6513_v49  ;;  %5165 = vmatpush3.msra.mxu0 %v1348_v46  ;;  %v6597_v46 = vld [vmem:[#allocation6 + $0x98] sm:$0xff]  ;;  %v6659_v35 = vsel %vm406_vm1, 0.0, %v427_v12  ;;  %v1266_v23 = vrot.slane %v6439_v8, 2  ;;  %v861_v10 = vrot.slane %v507_v47, 1  ;;  %v1268_v3 = vrot.slane %v507_v47, 2 }
  0x96   : > { %5065 = vmatmul.mubr.msk.f32.gmra.mxu0 %vm535_vm2, %v6521_v51  ;;  %5091 = vmatprep.mubr.msk.f32.mxu1 %vm535_vm2, %v6524_v52  ;;  %9156 = vst [vmem:[#allocation36_spill] sm:$0xff] %v6659_v35  ;;  %v508_v53 = vsel %vm406_vm1, %v410_v24, 0.0  ;;  %v863_v39 = vrot.slane %v6474_v32, 1  ;;  %v1270_v8 = vrot.slane %v6474_v32, 2  ;;  %v869_v47 = vrot.slane %v6521_v51, 1 }
  0x97   : > { %5067 = vmatprep.mubr.msk.f32.mxu0 %vm535_vm2, %v6530_v56  ;;  %5111 = vmatpush3.msra.mxu1 %v940_v48  ;;  %v6608_v48 = vsel %vm406_vm1, %v445_v5, %v8978_v22  ;;  %v6626_v5 = vsel %vm406_vm1, 0.0, %v424_v40  ;;  %v858_v22 = vrot.slane %v6451_v18, 1  ;;  %v866_v16 = vrot.slane %v508_v53, 1 }
  0x98   : > { %5166 = vmatprep.subr.mxu0 %v1347_v60  ;;  %5112 = vmatprep.subr.mxu1 %v939_v62  ;;  %9153 = vst [vmem:[#allocation33_spill] sm:$0xff] %v6608_v48  ;;  %9154 = vst [vmem:[#allocation34_spill] sm:$0xff] %v6626_v5  ;;  %v1273_v24 = vrot.slane %v508_v53, 2  ;;  %v1276_v53 = vrot.slane %v6521_v51, 2 }
  0x99   : > { %5092 = vmatmul.mubr.msk.f32.gmra.mxu1 %vm535_vm2, %v6543_v63  ;;  %5167 = vmatpush3.msra.mxu0 %v1347_v60  ;;  %v8985_v60 = vrot.slane %v6594_v43, 7  ;;  %v6681_v29 = vsel %vm857_vm3, %v858_v22, %v859_v45  ;;  %v6696_v22 = vsel %vm857_vm3, %v859_v45, %v861_v10  ;;  %v9162_v10 = vrot.slane %v6469_v30, 7  ;;  %p4715_p1 = scmp.ne.s32.totalorder %s9371_s27, 7 }
  0x9a   : > { %5068 = vmatmul.mubr.msk.f32.gmra.mxu0 %vm535_vm2, %v6551_v1  ;;  %5094 = vmatprep.mubr.msk.f32.mxu1 %vm535_vm2, %v6554_v2  ;;  %9158 = vst [vmem:[#allocation38_spill] sm:$0xff] %v6681_v29  ;;  %9160 = vst [vmem:[#allocation40_spill] sm:$0xff] %v6696_v22 }
  0x9b   : > { %5070 = vmatprep.mubr.msk.f32.mxu0 %vm535_vm2, %v6560_v7  ;;  %5113 = vmatpush3.msra.mxu1 %v939_v62  ;;  %v6622_v62 = vld [vmem:[#allocation2 + $0xe8] sm:$0xff]  ;;  %v6651_v0 = vsel %vm406_vm1, %v424_v40, %v8985_v60  ;;  %v6678_v60 = vsel %vm406_vm1, %v427_v12, %v8992_v54  ;;  %v1271_v12 = vrot.slane %v6489_v37, 2  ;;  %v6707_v54 = vsel %vm1264_vm4, %v1266_v23, %v1268_v3 }
  0x9c   : > { %5168 = vmatprep.subr.mxu0 %v1346_v17  ;;  %5218 = vmatprep.subr.mxu1 %v6566_v19  ;;  %9155 = vst [vmem:[#allocation35_spill] sm:$0xff] %v6651_v0  ;;  %9157 = vst [vmem:[#allocation37_spill] sm:$0xff] %v6678_v60  ;;  %v509_v45 = vsel %vm406_vm1, %v9162_v10, 0.0  ;;  %v1947_v10 = vld [vmem:[#allocation6 + $0x90] sm:$0xff] }
  0x9d   : > { %5095 = vmatmul.mubr.msk.f32.gmra.mxu1 %vm535_vm2, %v6575_v20  ;;  %5169 = vmatpush3.msra.mxu0 %v1346_v17  ;;  %v8990_v17 = vrot.slane %v6622_v62, 7  ;;  %9161 = vst [vmem:[#allocation41_spill] sm:$0xff] %v6707_v54  ;;  %v6729_v30 = vsel %vm1264_vm4, %v1271_v12, %v1273_v24  ;;  %v871_v3 = vrot.slane %v509_v45, 1  ;;  %v1280_v24 = vrot.slane %v6530_v56, 2 }
  0x9e   : > { %5071 = vmatmul.mubr.msk.f32.gmra.mxu0 %vm535_vm2, %v6583_v25  ;;  %5097 = vmatprep.mubr.msk.f32.mxu1 %vm535_vm2, %v6586_v27  ;;  %9164 = vst [vmem:[#allocation43_spill] sm:$0xff] %v6729_v30 }
  0x9f   : > { %5073 = vmatprep.mubr.msk.f32.mxu0 %vm535_vm2, %v6592_v36  ;;  %5274 = vmatprep.subr.mxu0 %v6597_v46  ;;  %v6671_v40 = vsel %vm406_vm1, %v451_v61, %v8990_v17  ;;  %v864_v61 = vrot.slane %v6489_v37, 1  ;;  %v6689_v17 = vsel %vm1264_vm4, %v1265_v50, %v1266_v23  ;;  %v868_v50 = vrot.slane %v6500_v42, 1 }
  0xa0   : > { %9159 = vst [vmem:[#allocation39_spill] sm:$0xff] %v6689_v17  ;;  %v6720_v37 = vsel %vm1264_vm4, %v1270_v8, %v1271_v12  ;;  %v1278_v8 = vrot.slane %v509_v45, 2 }
  0xa1   : > { %5098 = vmatmul.mubr.msk.f32.gmra.mxu1 %vm535_vm2, %v6608_v48  ;;  %v6713_v18 = vsel %vm857_vm3, %v863_v39, %v864_v61  ;;  %9163 = vst [vmem:[#allocation42_spill] sm:$0xff] %v6720_v37  ;;  %v6726_v23 = vsel %vm857_vm3, %v864_v61, %v866_v16  ;;  %v6732_v39 = vsel %vm857_vm3, %v868_v50, %v869_v47  ;;  %v9165_v61 = vrot.slane %v6502_v44, 7 }
  0xa2   : > { %5074 = vmatmul.mubr.msk.f32.gmra.mxu0 %vm535_vm2, %v6616_v57  ;;  %5100 = vmatprep.mubr.msk.f32.mxu1 %vm535_vm2, %v6619_v59  ;;  %v1281_v50 = vrot.slane %v6551_v1, 2  ;;  %v6756_v44 = vsel %vm857_vm3, %v869_v47, %v871_v3  ;;  %v879_v47 = vrot.slane %v6583_v25, 1 }
  0xa3   : > { %5076 = vmatprep.mubr.msk.f32.mxu0 %vm535_vm2, %v6626_v5  ;;  %v510_v12 = vsel %vm406_vm1, %v9165_v61, 0.0  ;;  %v9167_v61 = vrot.slane %v6532_v58, 7  ;;  %v1285_v58 = vrot.slane %v6560_v7, 2 }
  0xa4   : > { %v1283_v45 = vrot.slane %v510_v12, 2  ;;  %v6772_v3 = vsel %vm1264_vm4, %v1280_v24, %v1281_v50 }
  0xa5   : > { %5101 = vmatmul.mubr.msk.f32.gmra.mxu1 %vm535_vm2, %v6639_v9  ;;  %9169 = vst [vmem:[#allocation46_spill] sm:$0xff] %v6772_v3 }
  0xa6   : > { %5077 = vmatmul.mubr.msk.f32.gmra.mxu0 %vm535_vm2, %v6651_v0  ;;  %5103 = vmatprep.mubr.msk.f32.mxu1 %vm535_vm2, %v6654_v31  ;;  %v6786_v24 = vsel %vm1264_vm4, %v1281_v50, %v1283_v45  ;;  %v1290_v50 = vrot.slane %v6592_v36, 2  ;;  %v9173_v45 = vrot.slane %v6594_v43, 7 }
  0xa7   : > { %5079 = vmatprep.mubr.msk.f32.mxu0 %vm535_vm2, %v6659_v35  ;;  %9170 = vst [vmem:[#allocation47_spill] sm:$0xff] %v6786_v24 }
  0xa9   : > { %5104 = vmatmul.mubr.msk.f32.gmra.mxu1 %vm535_vm2, %v6671_v40 }
  0xaa   : > { %5080 = vmatmul.mubr.msk.f32.gmra.mxu0 %vm535_vm2, %v6678_v60  ;;  %5114 = vmatprep.mubr.msk.f32.mxu1 %vm535_vm2, %v6681_v29  ;;  %v1275_v29 = vrot.slane %v6500_v42, 2 }
  0xab   : > { %5170 = vmatprep.mubr.msk.f32.mxu0 %vm535_vm2, %v6689_v17  ;;  %v1674_v17 = vld [vmem:[#allocation6 + $0x70] sm:$0xff] }
  0xac   : > { %v6745_v16 = vsel %vm1264_vm4, %v1275_v29, %v1276_v53  ;;  %v876_v29 = vrot.slane %v510_v12, 1  ;;  %v1286_v12 = vrot.slane %v6583_v25, 2 }
  0xad   : > { %5115 = vmatmul.mubr.msk.f32.vlgmr.msra.gmra.mxu1 %vm535_vm2, %v6696_v22  ;;  %9166 = vst [vmem:[#allocation44_spill] sm:$0xff] %v6745_v16  ;;  %v511_v22 = vsel %vm406_vm1, %v9167_v61, 0.0  ;;  %v883_v61 = vrot.slane %v6592_v36, 1 }
  0xae   : > { %5171 = vmatmul.mubr.msk.f32.vlgmr.msra.gmra.mxu0 %vm535_vm2, %v6707_v54  ;;  %5219 = vmatpush3.msra.mxu1 %v6566_v19  ;;  %v873_v54 = vrot.slane %v6530_v56, 1  ;;  %v874_v19 = vrot.slane %v6551_v1, 1  ;;  %v6764_v1 = vsel %vm1264_vm4, %v1276_v53, %v1278_v8  ;;  %v878_v56 = vrot.slane %v6560_v7, 1  ;;  %v1672_v8 = vld [vmem:[#allocation6 + $0x60] sm:$0xff] }
  0xaf   : > { %5117 = vmatprep.mubr.msk.f32.mxu1 %vm535_vm2, %v6713_v18  ;;  %5275 = vmatpush3.msra.mxu0 %v6597_v46  ;;  %v1673_v46 = vld [vmem:[#allocation6 + $0x68] sm:$0xff]  ;;  %9168 = vst [vmem:[#allocation45_spill] sm:$0xff] %v6764_v1  ;;  %v881_v53 = vrot.slane %v511_v22, 1 }
  0xb0   : > { %5173 = vmatprep.mubr.msk.f32.mxu0 %vm535_vm2, %v6720_v37  ;;  %5220 = vmatprep.subr.mxu1 %v1674_v17  ;;  %v1946_v37 = vld [vmem:[#allocation6 + $0x88] sm:$0xff] }
  0xb1   : > { %5118 = vmatmul.mubr.msk.f32.gmra.mxu1 %vm535_vm2, %v6726_v23  ;;  %5276 = vmatprep.subr.mxu0 %v1947_v10 }
  0xb2   : > { %5174 = vmatmul.mubr.msk.f32.gmra.mxu0 %vm535_vm2, %v6729_v30  ;;  %5120 = vmatprep.mubr.msk.f32.mxu1 %vm535_vm2, %v6732_v39  ;;  %v6767_v30 = vsel %vm857_vm3, %v873_v54, %v874_v19  ;;  %v1288_v54 = vrot.slane %v511_v22, 2  ;;  %v6791_v22 = vsel %vm857_vm3, %v878_v56, %v879_v47  ;;  %v513_v56 = vsel %vm406_vm1, %v9173_v45, 0.0 }
  0xb3   : > { %5176 = vmatprep.mubr.msk.f32.mxu0 %vm535_vm2, %v6745_v16  ;;  %5221 = vmatpush3.msra.mxu1 %v1674_v17  ;;  %v6783_v17 = vsel %vm857_vm3, %v874_v19, %v876_v29  ;;  %v9171_v16 = vrot.slane %v6562_v11, 7  ;;  %v6799_v19 = vsel %vm1264_vm4, %v1285_v58, %v1286_v12  ;;  %v1291_v29 = vrot.slane %v6616_v57, 2 }
  0xb4   : > { %5277 = vmatpush3.msra.mxu0 %v1947_v10  ;;  %5222 = vmatprep.subr.mxu1 %v1673_v46  ;;  %v1945_v10 = vld [vmem:[#allocation6 + $0x80] sm:$0xff]  ;;  %9172 = vst [vmem:[#allocation48_spill] sm:$0xff] %v6799_v19  ;;  %v6809_v11 = vsel %vm857_vm3, %v879_v47, %v881_v53  ;;  %v888_v58 = vrot.slane %v6626_v5, 1  ;;  %v889_v45 = vrot.slane %v6651_v0, 1  ;;  %v6822_v47 = vld [vmem:[#allocation6 + $0xd8] sm:$0xff]  ;;  %v891_v53 = vrot.slane %v513_v56, 1 }
  0xb5   : > { %5121 = vmatmul.mubr.msk.f32.gmra.mxu1 %vm535_vm2, %v6756_v44  ;;  %5278 = vmatprep.subr.mxu0 %v1946_v37  ;;  %v512_v25 = vsel %vm406_vm1, %v9171_v16, 0.0  ;;  %v6812_v16 = vsel %vm1264_vm4, %v1286_v12, %v1288_v54  ;;  %v1295_v54 = vrot.slane %v6626_v5, 2 }
  0xb6   : > { %5177 = vmatmul.mubr.msk.f32.gmra.mxu0 %vm535_vm2, %v6764_v1  ;;  %5123 = vmatprep.mubr.msk.f32.mxu1 %vm535_vm2, %v6767_v30  ;;  %v884_v1 = vrot.slane %v6616_v57, 1  ;;  %9174 = vst [vmem:[#allocation49_spill] sm:$0xff] %v6812_v16  ;;  %v1293_v43 = vrot.slane %v512_v25, 2 }
  0xb7   : > { %5179 = vmatprep.mubr.msk.f32.mxu0 %vm535_vm2, %v6772_v3  ;;  %5223 = vmatpush3.msra.mxu1 %v1673_v46  ;;  %v6814_v46 = vld [vmem:[#allocation6 + $0xb8] sm:$0xff]  ;;  %v1298_v3 = vrot.slane %v513_v56, 2  ;;  %v9178_v56 = vrot.slane %v6628_v15, 7 }
  0xb8   : > { %5279 = vmatpush3.msra.mxu0 %v1946_v37  ;;  %5224 = vmatprep.subr.mxu1 %v1672_v8  ;;  %v886_v37 = vrot.slane %v512_v25, 1  ;;  %v6827_v12 = vsel %vm857_vm3, %v883_v61, %v884_v1  ;;  %v6832_v25 = vsel %vm1264_vm4, %v1290_v50, %v1291_v29  ;;  %v371_v61 = vld [vmem:[#allocation2 + $0xf0] sm:$0xff]  ;;  %v6849_v50 = vsel %vm857_vm3, %v888_v58, %v889_v45 }
  0xb9   : > { %5124 = vmatmul.mubr.msk.f32.gmra.mxu1 %vm535_vm2, %v6783_v17  ;;  %5280 = vmatprep.subr.mxu0 %v1945_v10  ;;  %9175 = vst [vmem:[#allocation50_spill] sm:$0xff] %v6832_v25  ;;  %9177 = vst [vmem:[#allocation52_spill] sm:$0xff] %v6849_v50  ;;  %v454_v15 = vrot.slane %v371_v61, 7 }
  0xba   : > { %5180 = vmatmul.mubr.msk.f32.gmra.mxu0 %vm535_vm2, %v6786_v24  ;;  %5126 = vmatprep.mubr.msk.f32.mxu1 %vm535_vm2, %v6791_v22  ;;  %v1296_v24 = vrot.slane %v6651_v0, 2  ;;  %v514_v0 = vsel %vm406_vm1, %v9178_v56, 0.0 }
  0xbb   : > { %5182 = vmatprep.mubr.msk.f32.mxu0 %vm535_vm2, %v6799_v19  ;;  %5225 = vmatpush3.msra.mxu1 %v1672_v8  ;;  %v372_v19 = vld [vmem:[#allocation2 + $0xf8] sm:$0xff]  ;;  %v6843_v8 = vsel %vm857_vm3, %v884_v1, %v886_v37  ;;  %v893_v1 = vrot.slane %v6659_v35, 1  ;;  %v1300_v37 = vrot.slane %v6659_v35, 2 }
  0xbc   : > { %5281 = vmatpush3.msra.mxu0 %v1945_v10  ;;  %5330 = vmatprep.subr.mxu1 %v6814_v46  ;;  %v6846_v10 = vsel %vm1264_vm4, %v1291_v29, %v1293_v43  ;;  %v6860_v5 = vsel %vm1264_vm4, %v1295_v54, %v1296_v24  ;;  %v894_v29 = vrot.slane %v6678_v60, 1  ;;  %v1301_v43 = vrot.slane %v6678_v60, 2 }
  0xbd   : > { %5127 = vmatmul.mubr.msk.f32.gmra.mxu1 %vm535_vm2, %v6809_v11  ;;  %5386 = vmatprep.subr.mxu0 %v6822_v47  ;;  %9176 = vst [vmem:[#allocation51_spill] sm:$0xff] %v6846_v10  ;;  %9179 = vst [vmem:[#allocation53_spill] sm:$0xff] %v6860_v5  ;;  %v455_v58 = vrot.slane %v372_v19, 7  ;;  %v6869_v56 = vsel %vm1264_vm4, %v1296_v24, %v1298_v3  ;;  %v898_v54 = vrot.slane %v6445_v14, 1  ;;  %v6878_v19 = vsel %vm406_vm1, 0.0, %v454_v15 }
  0xbe   : > { %5183 = vmatmul.mubr.msk.f32.gmra.mxu0 %vm535_vm2, %v6812_v16  ;;  %5129 = vmatprep.mubr.msk.f32.mxu1 %vm535_vm2, %v6827_v12  ;;  %v6857_v16 = vsel %vm857_vm3, %v889_v45, %v891_v53  ;;  %9180 = vst [vmem:[#allocation54_spill] sm:$0xff] %v6869_v56  ;;  %v896_v45 = vrot.slane %v514_v0, 1  ;;  %v1303_v53 = vrot.slane %v514_v0, 2  ;;  %9181 = vst [vmem:[#allocation55_spill] sm:$0xff] %v6878_v19  ;;  %v9184_v24 = vrot.slane %v6437_v4, 7 }
  0xbf   : > { %5185 = vmatprep.mubr.msk.f32.mxu0 %vm535_vm2, %v6832_v25  ;;  %v899_v25 = vrot.slane %v6456_v21, 1  ;;  %v6881_v61 = vsel %vm406_vm1, %v454_v15, %v455_v58  ;;  %v6884_v3 = vsel %vm406_vm1, %v455_v58, 0.0  ;;  %v6889_v0 = vsel %vm857_vm3, %v893_v1, %v894_v29 }
  0xc0   : > { %9182 = vst [vmem:[#allocation56_spill] sm:$0xff] %v6881_v61  ;;  %9183 = vst [vmem:[#allocation57_spill] sm:$0xff] %v6884_v3  ;;  %v1939_v60 = vrot.slane %v6878_v19, 1  ;;  %v1940_v35 = vrot.slane %v6881_v61, 1  ;;  %v6897_v15 = vsel %vm1264_vm4, %v1300_v37, %v1301_v43  ;;  %v1305_v58 = vrot.slane %v6445_v14, 2 }
  0xc1   : > { %5130 = vmatmul.mubr.msk.f32.gmra.mxu1 %vm535_vm2, %v6843_v8  ;;  %9185 = vst [vmem:[#allocation58_spill] sm:$0xff] %v6897_v15  ;;  %v6905_v4 = vsel %vm857_vm3, %v894_v29, %v896_v45  ;;  %v6915_v37 = vsel %vm1264_vm4, %v1301_v43, %v1303_v53  ;;  %v903_v29 = vrot.slane %v6467_v28, 1  ;;  %v904_v45 = vrot.slane %v6481_v34, 1 }
  0xc2   : > { %5186 = vmatmul.mubr.msk.f32.gmra.mxu0 %vm535_vm2, %v6846_v10  ;;  %5132 = vmatprep.mubr.msk.f32.mxu1 %vm535_vm2, %v6849_v50  ;;  %v515_v10 = vsel %vm406_vm1, %v9184_v24, 0.0  ;;  %v1306_v50 = vrot.slane %v6456_v21, 2  ;;  %v6908_v1 = vsel %vm857_vm3, %v1939_v60, %v1940_v35  ;;  %9187 = vst [vmem:[#allocation60_spill] sm:$0xff] %v6915_v37  ;;  %v6918_v24 = vsel %vm857_vm3, %v898_v54, %v899_v25 }
  0xc3   : > { %5188 = vmatprep.mubr.msk.f32.mxu0 %vm535_vm2, %v6860_v5  ;;  %v1942_v5 = vrot.slane %v6884_v3, 1  ;;  %9186 = vst [vmem:[#allocation59_spill] sm:$0xff] %v6908_v1  ;;  %v901_v3 = vrot.slane %v515_v10, 1  ;;  %v1308_v60 = vrot.slane %v515_v10, 2  ;;  %v1310_v54 = vrot.slane %v6467_v28, 2 }
  0xc4   : > { %v6931_v53 = vsel %vm1264_vm4, %v1305_v58, %v1306_v50  ;;  %v913_v1 = vrot.slane %v6524_v52, 1  ;;  %v914_v19 = vrot.slane %v6543_v63, 1 }
  0xc5   : > { %5133 = vmatmul.mubr.msk.f32.gmra.mxu1 %vm535_vm2, %v6857_v16  ;;  %v6921_v61 = vsel %vm857_vm3, %v1940_v35, %v1942_v5  ;;  %9190 = vst [vmem:[#allocation62_spill] sm:$0xff] %v6931_v53  ;;  %v1311_v35 = vrot.slane %v6481_v34, 2 }
  0xc6   : > { %5189 = vmatmul.mubr.msk.f32.gmra.mxu0 %vm535_vm2, %v6869_v56  ;;  %5135 = vmatprep.mubr.msk.f32.mxu1 %vm535_vm2, %v6889_v0  ;;  %9188 = vst [vmem:[#allocation61_spill] sm:$0xff] %v6921_v61  ;;  %v9189_v56 = vrot.slane %v6442_v13, 7  ;;  %v6942_v13 = vsel %vm857_vm3, %v899_v25, %v901_v3  ;;  %v908_v61 = vrot.slane %v6492_v38, 1  ;;  %v909_v25 = vrot.slane %v6513_v49, 1 }
  0xc7   : > { %5191 = vmatprep.mubr.msk.f32.mxu0 %vm535_vm2, %v6897_v15  ;;  %v6950_v15 = vsel %vm1264_vm4, %v1306_v50, %v1308_v60  ;;  %v6958_v3 = vsel %vm1264_vm4, %v1310_v54, %v1311_v35 }
  0xc8   : > { %v516_v43 = vsel %vm406_vm1, %v9189_v56, 0.0  ;;  %v9191_v56 = vrot.slane %v6462_v26, 7  ;;  %9192 = vst [vmem:[#allocation63_spill] sm:$0xff] %v6950_v15  ;;  %9193 = vst [vmem:[#allocation64_spill] sm:$0xff] %v6958_v3  ;;  %v1315_v26 = vrot.slane %v6492_v38, 2 }
  0xc9   : > { %5136 = vmatmul.mubr.msk.f32.gmra.mxu1 %vm535_vm2, %v6905_v4  ;;  %v906_v5 = vrot.slane %v516_v43, 1  ;;  %v1313_v10 = vrot.slane %v516_v43, 2  ;;  %v1316_v43 = vrot.slane %v6513_v49, 2 }
  0xca   : > { %5192 = vmatmul.mubr.msk.f32.gmra.mxu0 %vm535_vm2, %v6915_v37  ;;  %5138 = vmatprep.mubr.msk.f32.mxu1 %vm535_vm2, %v6918_v24  ;;  %v517_v58 = vsel %vm406_vm1, %v9191_v56, 0.0  ;;  %v6953_v37 = vsel %vm857_vm3, %v903_v29, %v904_v45  ;;  %v9195_v29 = vrot.slane %v6495_v41, 7  ;;  %v1321_v41 = vrot.slane %v6543_v63, 2 }
  0xcb   : > { %5194 = vmatprep.mubr.msk.f32.mxu0 %vm535_vm2, %v6931_v53  ;;  %v911_v56 = vrot.slane %v517_v58, 1  ;;  %v6969_v50 = vsel %vm857_vm3, %v904_v45, %v906_v5  ;;  %v6972_v60 = vsel %vm1264_vm4, %v1311_v35, %v1313_v10  ;;  %v6980_v53 = vsel %vm857_vm3, %v908_v61, %v909_v25 }
  0xcc   : > { %9194 = vst [vmem:[#allocation65_spill] sm:$0xff] %v6972_v60  ;;  %v518_v54 = vsel %vm406_vm1, %v9195_v29, 0.0  ;;  %v6985_v45 = vsel %vm1264_vm4, %v1315_v26, %v1316_v43  ;;  %v1320_v35 = vrot.slane %v6524_v52, 2  ;;  %v919_v26 = vrot.slane %v6575_v20, 1 }
  0xcd   : > { %5139 = vmatmul.mubr.msk.f32.gmra.mxu1 %vm535_vm2, %v6942_v13  ;;  %9196 = vst [vmem:[#allocation66_spill] sm:$0xff] %v6985_v45  ;;  %v6992_v5 = vsel %vm857_vm3, %v909_v25, %v911_v56  ;;  %v916_v61 = vrot.slane %v518_v54, 1  ;;  %v1323_v10 = vrot.slane %v518_v54, 2  ;;  %v9197_v29 = vrot.slane %v6527_v55, 7 }
  0xce   : > { %5195 = vmatmul.mubr.msk.f32.gmra.mxu0 %vm535_vm2, %v6950_v15  ;;  %5141 = vmatprep.mubr.msk.f32.mxu1 %vm535_vm2, %v6953_v37  ;;  %v1318_v15 = vrot.slane %v517_v58, 2  ;;  %v918_v58 = vrot.slane %v6554_v2, 1  ;;  %v7009_v56 = vsel %vm857_vm3, %v913_v1, %v914_v19  ;;  %v1325_v54 = vrot.slane %v6554_v2, 2 }
  0xcf   : > { %5197 = vmatprep.mubr.msk.f32.mxu0 %vm535_vm2, %v6958_v3  ;;  %v519_v3 = vsel %vm406_vm1, %v9197_v29, 0.0  ;;  %v1326_v63 = vrot.slane %v6575_v20, 2  ;;  %v7026_v1 = vsel %vm1264_vm4, %v1321_v41, %v1323_v10  ;;  %v923_v29 = vrot.slane %v6586_v27, 1 }
  0xd0   : > { %v7006_v25 = vsel %vm1264_vm4, %v1316_v43, %v1318_v15  ;;  %v921_v55 = vrot.slane %v519_v3, 1  ;;  %v7023_v15 = vsel %vm857_vm3, %v914_v19, %v916_v61  ;;  %9201 = vst [vmem:[#allocation70_spill] sm:$0xff] %v7026_v1  ;;  %v7029_v43 = vsel %vm857_vm3, %v918_v58, %v919_v26 }
  0xd1   : > { %5142 = vmatmul.mubr.msk.f32.gmra.mxu1 %vm535_vm2, %v6969_v50  ;;  %9198 = vst [vmem:[#allocation67_spill] sm:$0xff] %v7006_v25  ;;  %9200 = vst [vmem:[#allocation69_spill] sm:$0xff] %v7023_v15  ;;  %v7039_v19 = vsel %vm1264_vm4, %v1325_v54, %v1326_v63  ;;  %v1331_v61 = vrot.slane %v6608_v48, 2  ;;  %v928_v10 = vrot.slane %v6619_v59, 1  ;;  %v929_v58 = vrot.slane %v6639_v9, 1 }
  0xd2   : > { %5198 = vmatmul.mubr.msk.f32.gmra.mxu0 %vm535_vm2, %v6972_v60  ;;  %5144 = vmatprep.mubr.msk.f32.mxu1 %vm535_vm2, %v6980_v53  ;;  %v7012_v60 = vsel %vm1264_vm4, %v1320_v35, %v1321_v41  ;;  %9202 = vst [vmem:[#allocation71_spill] sm:$0xff] %v7029_v43  ;;  %v1328_v35 = vrot.slane %v519_v3, 2  ;;  %9204 = vst [vmem:[#allocation72_spill] sm:$0xff] %v7039_v19  ;;  %v1330_v41 = vrot.slane %v6586_v27, 2 }
  0xd3   : > { %5200 = vmatprep.mubr.msk.f32.mxu0 %vm535_vm2, %v6985_v45  ;;  %9199 = vst [vmem:[#allocation68_spill] sm:$0xff] %v7012_v60  ;;  %v9203_v45 = vrot.slane %v6557_v6, 7  ;;  %v7046_v3 = vsel %vm857_vm3, %v919_v26, %v921_v55  ;;  %v9208_v55 = vrot.slane %v6589_v33, 7 }
  0xd4   : > { %9205 = vst [vmem:[#allocation73_spill] sm:$0xff] %v7046_v3  ;;  %v7057_v54 = vsel %vm1264_vm4, %v1326_v63, %v1328_v35  ;;  %v7083_v35 = vsel %vm857_vm3, %v928_v10, %v929_v58 }
  0xd5   : > { %5145 = vmatmul.mubr.msk.f32.gmra.mxu1 %vm535_vm2, %v6992_v5  ;;  %v520_v20 = vsel %vm406_vm1, %v9203_v45, 0.0  ;;  %9206 = vst [vmem:[#allocation74_spill] sm:$0xff] %v7057_v54  ;;  %9212 = vst [vmem:[#allocation79_spill] sm:$0xff] %v7083_v35 }
  0xd6   : > { %5201 = vmatmul.mubr.msk.f32.gmra.mxu0 %vm535_vm2, %v7006_v25  ;;  %5147 = vmatprep.mubr.msk.f32.mxu1 %vm535_vm2, %v7009_v56  ;;  %v924_v25 = vrot.slane %v6608_v48, 1  ;;  %v926_v6 = vrot.slane %v520_v20, 1  ;;  %v1333_v45 = vrot.slane %v520_v20, 2  ;;  %v1335_v20 = vrot.slane %v6619_v59, 2 }
  0xd7   : > { %5203 = vmatprep.mubr.msk.f32.mxu0 %vm535_vm2, %v7012_v60  ;;  %v7066_v60 = vsel %vm1264_vm4, %v1330_v41, %v1331_v61  ;;  %v1336_v48 = vrot.slane %v6639_v9, 2 }
  0xd8   : > { %v7060_v26 = vsel %vm857_vm3, %v923_v29, %v924_v25  ;;  %9209 = vst [vmem:[#allocation76_spill] sm:$0xff] %v7066_v60  ;;  %v7077_v63 = vsel %vm857_vm3, %v924_v25, %v926_v6  ;;  %v7080_v33 = vsel %vm1264_vm4, %v1331_v61, %v1333_v45  ;;  %v1340_v61 = vrot.slane %v6654_v31, 2 }
  0xd9   : > { %5148 = vmatmul.mubr.msk.f32.gmra.mxu1 %vm535_vm2, %v7023_v15  ;;  %9207 = vst [vmem:[#allocation75_spill] sm:$0xff] %v7060_v26  ;;  %9210 = vst [vmem:[#allocation77_spill] sm:$0xff] %v7077_v63  ;;  %v7093_v6 = vsel %vm1264_vm4, %v1335_v20, %v1336_v48  ;;  %v1341_v45 = vrot.slane %v6671_v40, 2 }
  0xda   : > { %5204 = vmatmul.mubr.msk.f32.gmra.mxu0 %vm535_vm2, %v7026_v1  ;;  %5150 = vmatprep.mubr.msk.f32.mxu1 %vm535_vm2, %v7029_v43  ;;  %v521_v1 = vsel %vm406_vm1, %v9208_v55, 0.0  ;;  %9211 = vst [vmem:[#allocation78_spill] sm:$0xff] %v7080_v33  ;;  %v933_v55 = vrot.slane %v6654_v31, 1  ;;  %9214 = vst [vmem:[#allocation80_spill] sm:$0xff] %v7093_v6 }
  0xdb   : > { %5206 = vmatprep.mubr.msk.f32.mxu0 %vm535_vm2, %v7039_v19  ;;  %v931_v29 = vrot.slane %v521_v1, 1  ;;  %v1338_v41 = vrot.slane %v521_v1, 2  ;;  %v9213_v19 = vrot.slane %v6622_v62, 7 }
  0xdd   : > { %5151 = vmatmul.mubr.msk.f32.gmra.mxu1 %vm535_vm2, %v7046_v3  ;;  %v522_v25 = vsel %vm406_vm1, %v9213_v19, 0.0  ;;  %v7104_v62 = vsel %vm857_vm3, %v929_v58, %v931_v29  ;;  %v7109_v19 = vsel %vm1264_vm4, %v1336_v48, %v1338_v41  ;;  %v2218_v29 = vld [vmem:[#allocation6 + $0xb0] sm:$0xff] }
  0xde   : > { %5207 = vmatmul.mubr.msk.f32.gmra.mxu0 %vm535_vm2, %v7057_v54  ;;  %5153 = vmatprep.mubr.msk.f32.mxu1 %vm535_vm2, %v7060_v26  ;;  %v934_v54 = vrot.slane %v6671_v40, 1  ;;  %9215 = vst [vmem:[#allocation81_spill] sm:$0xff] %v7104_v62  ;;  %v936_v1 = vrot.slane %v522_v25, 1  ;;  %9216 = vst [vmem:[#allocation82_spill] sm:$0xff] %v7109_v19  ;;  %v1343_v20 = vrot.slane %v522_v25, 2  ;;  %v2484_v41 = vld [vmem:[#allocation6 + $0xd0] sm:$0xff] }
  0xdf   : > { %5209 = vmatprep.mubr.msk.f32.mxu0 %vm535_vm2, %v7066_v60  ;;  %v7115_v60 = vsel %vm1264_vm4, %v1340_v61, %v1341_v45  ;;  %v9223_v25 = vld [vmem:[#allocation32_spill] sm:$0xff] }
  0xe0   : > { %v7112_v10 = vsel %vm857_vm3, %v933_v55, %v934_v54  ;;  %v7124_v58 = vsel %vm857_vm3, %v934_v54, %v936_v1  ;;  %v7129_v48 = vsel %vm1264_vm4, %v1341_v45, %v1343_v20  ;;  %v9220_v54 = vld [vmem:[#allocation27_spill] sm:$0xff]  ;;  %v2482_v55 = vld [vmem:[#allocation6 + $0xc0] sm:$0xff]  ;;  %v9224_v1 = vld [vmem:[#allocation34_spill] sm:$0xff] }
  0xe1   : > { %5154 = vmatmul.mubr.msk.f32.gmra.mxu1 %vm535_vm2, %v7077_v63  ;;  %9217 = vst [vmem:[#allocation83_spill] sm:$0xff] %v7112_v10  ;;  %9218 = vst [vmem:[#allocation84_spill] sm:$0xff] %v7124_v58  ;;  %v2747_v61 = vld [vmem:[#allocation6 + $0xf8] sm:$0xff] }
  0xe2   : > { %5210 = vmatmul.mubr.msk.f32.gmra.mxu0 %vm535_vm2, %v7080_v33  ;;  %5156 = vmatprep.mubr.msk.f32.mxu1 %vm535_vm2, %v7083_v35  ;;  %9219 = vst [vmem:[#allocation85_spill] sm:$0xff] %v7129_v48  ;;  %v3009_v45 = vld [vmem:[#allocation6 + $0x118] sm:$0xff] }
  0xe3   : > { %5212 = vmatprep.mubr.msk.f32.mxu0 %vm535_vm2, %v7093_v6  ;;  %v9225_v20 = vld [vmem:[#allocation52_spill] sm:$0xff] }
  0xe5   : > { %5157 = vmatmul.mubr.msk.f32.gmra.mxu1 %vm535_vm2, %v7104_v62 }
  0xe6   : > { %5213 = vmatmul.mubr.msk.f32.gmra.mxu0 %vm535_vm2, %v7109_v19  ;;  %5159 = vmatprep.mubr.msk.f32.mxu1 %vm535_vm2, %v7112_v10 }
  0xe7   : > { %5215 = vmatprep.mubr.msk.f32.mxu0 %vm535_vm2, %v7115_v60 }
  0xe9   : > { %5160 = vmatmul.mubr.msk.f32.gmra.mxu1 %vm535_vm2, %v7124_v58 }
  0xea   : > { %5216 = vmatmul.mubr.msk.f32.gmra.mxu0 %vm535_vm2, %v7129_v48  ;;  %5226 = vmatprep.mubr.msk.f32.mxu1 %vm535_vm2, %v6474_v32  ;;  %v9221_v32 = vld [vmem:[#allocation28_spill] sm:$0xff] }
  0xeb   : > { %5282 = vmatprep.mubr.msk.f32.mxu0 %vm535_vm2, %v6713_v18  ;;  %v2217_v18 = vld [vmem:[#allocation6 + $0xa8] sm:$0xff] }
  0xed   : > { %5227 = vmatmul.mubr.msk.f32.vlgmr.msra.gmra.mxu1 %vm535_vm2, %v9220_v54  ;;  %v9226_v54 = vld [vmem:[#allocation35_spill] sm:$0xff] }
  0xee   : > { %5283 = vmatmul.mubr.msk.f32.vlgmr.msra.gmra.mxu0 %vm535_vm2, %v6726_v23  ;;  %5331 = vmatpush3.msra.mxu1 %v6814_v46  ;;  %v2483_v23 = vld [vmem:[#allocation6 + $0xc8] sm:$0xff] }
  0xef   : > { %5229 = vmatprep.mubr.msk.f32.mxu1 %vm535_vm2, %v6500_v42  ;;  %5387 = vmatpush3.msra.mxu0 %v6822_v47  ;;  %v9222_v46 = vld [vmem:[#allocation30_spill] sm:$0xff]  ;;  %v2216_v47 = vld [vmem:[#allocation6 + $0xa0] sm:$0xff] }
  0xf0   : > { %5285 = vmatprep.mubr.msk.f32.mxu0 %vm535_vm2, %v6732_v39  ;;  %5332 = vmatprep.subr.mxu1 %v2218_v29 }
  0xf1   : > { %5230 = vmatmul.mubr.msk.f32.gmra.mxu1 %vm535_vm2, %v6521_v51  ;;  %5388 = vmatprep.subr.mxu0 %v2484_v41 }
  0xf2   : > { %5286 = vmatmul.mubr.msk.f32.gmra.mxu0 %vm535_vm2, %v6756_v44  ;;  %5232 = vmatprep.mubr.msk.f32.mxu1 %vm535_vm2, %v9221_v32 }
  0xf3   : > { %5288 = vmatprep.mubr.msk.f32.mxu0 %vm535_vm2, %v6767_v30  ;;  %5333 = vmatpush3.msra.mxu1 %v2218_v29  ;;  %v9227_v29 = vld [vmem:[#allocation36_spill] sm:$0xff] }
  0xf4   : > { %5389 = vmatpush3.msra.mxu0 %v2484_v41  ;;  %5334 = vmatprep.subr.mxu1 %v2217_v18  ;;  %v9228_v41 = vld [vmem:[#allocation37_spill] sm:$0xff] }
  0xf5   : > { %5233 = vmatmul.mubr.msk.f32.gmra.mxu1 %vm535_vm2, %v9222_v46  ;;  %5390 = vmatprep.subr.mxu0 %v2483_v23 }
  0xf6   : > { %5289 = vmatmul.mubr.msk.f32.gmra.mxu0 %vm535_vm2, %v6783_v17  ;;  %5235 = vmatprep.mubr.msk.f32.mxu1 %vm535_vm2, %v6560_v7 }
  0xf7   : > { %5291 = vmatprep.mubr.msk.f32.mxu0 %vm535_vm2, %v6791_v22  ;;  %5335 = vmatpush3.msra.mxu1 %v2217_v18  ;;  %v9229_v18 = vld [vmem:[#allocation29_spill] sm:$0xff] }
  0xf8   : > { %5391 = vmatpush3.msra.mxu0 %v2483_v23  ;;  %5336 = vmatprep.subr.mxu1 %v2216_v47  ;;  %v9230_v23 = vld [vmem:[#allocation31_spill] sm:$0xff] }
  0xf9   : > { %5236 = vmatmul.mubr.msk.f32.gmra.mxu1 %vm535_vm2, %v9223_v25  ;;  %5392 = vmatprep.subr.mxu0 %v2482_v55 }
  0xfa   : > { %5292 = vmatmul.mubr.msk.f32.gmra.mxu0 %vm535_vm2, %v6809_v11  ;;  %5238 = vmatprep.mubr.msk.f32.mxu1 %vm535_vm2, %v6592_v36 }
  0xfb   : > { %5294 = vmatprep.mubr.msk.f32.mxu0 %vm535_vm2, %v6827_v12  ;;  %5337 = vmatpush3.msra.mxu1 %v2216_v47  ;;  %v9231_v47 = vld [vmem:[#allocation33_spill] sm:$0xff] }
  0xfc   : > { %5393 = vmatpush3.msra.mxu0 %v2482_v55  ;;  %5442 = vmatprep.subr.mxu1 %v2747_v61  ;;  %v9232_v55 = vld [vmem:[#allocation55_spill] sm:$0xff] }
  0xfd   : > { %5239 = vmatmul.mubr.msk.f32.gmra.mxu1 %vm535_vm2, %v6616_v57  ;;  %5498 = vmatprep.subr.mxu0 %v3009_v45 }
  0xfe   : > { %5295 = vmatmul.mubr.msk.f32.gmra.mxu0 %vm535_vm2, %v6843_v8  ;;  %5241 = vmatprep.mubr.msk.f32.mxu1 %vm535_vm2, %v9224_v1 }
  0xff   : > { %5297 = vmatprep.mubr.msk.f32.mxu0 %vm535_vm2, %v9225_v20 }
 0x101   : > { %5242 = vmatmul.mubr.msk.f32.gmra.mxu1 %vm535_vm2, %v9226_v54 }
 0x102   : > { %5298 = vmatmul.mubr.msk.f32.gmra.mxu0 %vm535_vm2, %v6857_v16  ;;  %5244 = vmatprep.mubr.msk.f32.mxu1 %vm535_vm2, %v9227_v29 }
 0x103   : > { %5300 = vmatprep.mubr.msk.f32.mxu0 %vm535_vm2, %v6889_v0 }
 0x105   : > { %5245 = vmatmul.mubr.msk.f32.gmra.mxu1 %vm535_vm2, %v9228_v41 }
 0x106   : > { %5301 = vmatmul.mubr.msk.f32.gmra.mxu0 %vm535_vm2, %v6905_v4  ;;  %5247 = vmatprep.mubr.msk.f32.mxu1 %vm535_vm2, %v6445_v14 }
 0x107   : > { %5303 = vmatprep.mubr.msk.f32.mxu0 %vm535_vm2, %v6918_v24 }
 0x109   : > { %5248 = vmatmul.mubr.msk.f32.gmra.mxu1 %vm535_vm2, %v6456_v21 }
 0x10a   : > { %5304 = vmatmul.mubr.msk.f32.gmra.mxu0 %vm535_vm2, %v6942_v13  ;;  %5250 = vmatprep.mubr.msk.f32.mxu1 %vm535_vm2, %v6467_v28 }
 0x10b   : > { %5306 = vmatprep.mubr.msk.f32.mxu0 %vm535_vm2, %v6953_v37 }
 0x10d   : > { %5251 = vmatmul.mubr.msk.f32.gmra.mxu1 %vm535_vm2, %v6481_v34 }
 0x10e   : > { %5307 = vmatmul.mubr.msk.f32.gmra.mxu0 %vm535_vm2, %v6969_v50  ;;  %5253 = vmatprep.mubr.msk.f32.mxu1 %vm535_vm2, %v6492_v38 }
 0x10f   : > { %5309 = vmatprep.mubr.msk.f32.mxu0 %vm535_vm2, %v6980_v53 }
 0x111   : > { %5254 = vmatmul.mubr.msk.f32.gmra.mxu1 %vm535_vm2, %v6513_v49 }
 0x112   : > { %5310 = vmatmul.mubr.msk.f32.gmra.mxu0 %vm535_vm2, %v6992_v5  ;;  %5256 = vmatprep.mubr.msk.f32.mxu1 %vm535_vm2, %v6524_v52 }
 0x113   : > { %5312 = vmatprep.mubr.msk.f32.mxu0 %vm535_vm2, %v7009_v56 }
 0x115   : > { %5257 = vmatmul.mubr.msk.f32.gmra.mxu1 %vm535_vm2, %v9229_v18 }
 0x116   : > { %5313 = vmatmul.mubr.msk.f32.gmra.mxu0 %vm535_vm2, %v7023_v15  ;;  %5259 = vmatprep.mubr.msk.f32.mxu1 %vm535_vm2, %v6554_v2  ;;  %v9260_v15 = vld [vmem:[#allocation70_spill] sm:$0xff] }
 0x117   : > { %5315 = vmatprep.mubr.msk.f32.mxu0 %vm535_vm2, %v7029_v43 }
 0x119   : > { %5260 = vmatmul.mubr.msk.f32.gmra.mxu1 %vm535_vm2, %v9230_v23 }
 0x11a   : > { %5316 = vmatmul.mubr.msk.f32.gmra.mxu0 %vm535_vm2, %v7046_v3  ;;  %5262 = vmatprep.mubr.msk.f32.mxu1 %vm535_vm2, %v6586_v27  ;;  %v9238_v3 = vld [vmem:[#allocation44_spill] sm:$0xff] }
 0x11b   : > { %5318 = vmatprep.mubr.msk.f32.mxu0 %vm535_vm2, %v7060_v26  ;;  %v9236_v26 = vld [vmem:[#allocation42_spill] sm:$0xff] }
 0x11d   : > { %5263 = vmatmul.mubr.msk.f32.gmra.mxu1 %vm535_vm2, %v9231_v47 }
 0x11e   : > { %5319 = vmatmul.mubr.msk.f32.gmra.mxu0 %vm535_vm2, %v7077_v63  ;;  %5265 = vmatprep.mubr.msk.f32.mxu1 %vm535_vm2, %v6619_v59  ;;  %v9234_v63 = vld [vmem:[#allocation56_spill] sm:$0xff] }
 0x11f   : > { %5321 = vmatprep.mubr.msk.f32.mxu0 %vm535_vm2, %v7083_v35  ;;  %v9233_v35 = vld [vmem:[#allocation59_spill] sm:$0xff] }
 0x121   : > { %5266 = vmatmul.mubr.msk.f32.gmra.mxu1 %vm535_vm2, %v6639_v9 }
 0x122   : > { %5322 = vmatmul.mubr.msk.f32.gmra.mxu0 %vm535_vm2, %v7104_v62  ;;  %5268 = vmatprep.mubr.msk.f32.mxu1 %vm535_vm2, %v6654_v31  ;;  %v9235_v62 = vld [vmem:[#allocation61_spill] sm:$0xff] }
 0x123   : > { %5324 = vmatprep.mubr.msk.f32.mxu0 %vm535_vm2, %v7112_v10  ;;  %v9237_v10 = vld [vmem:[#allocation43_spill] sm:$0xff] }
 0x125   : > { %5269 = vmatmul.mubr.msk.f32.gmra.mxu1 %vm535_vm2, %v6671_v40 }
 0x126   : > { %5325 = vmatmul.mubr.msk.f32.gmra.mxu0 %vm535_vm2, %v7124_v58  ;;  %5271 = vmatprep.mubr.msk.f32.mxu1 %vm535_vm2, %v9232_v55  ;;  %v2746_v58 = vld [vmem:[#allocation6 + $0xf0] sm:$0xff] }
 0x127   : > { %5327 = vmatprep.mubr.msk.f32.mxu0 %vm535_vm2, %v9233_v35  ;;  %v3008_v35 = vld [vmem:[#allocation6 + $0x110] sm:$0xff] }
 0x129   : > { %5272 = vmatmul.mubr.msk.f32.gmra.mxu1 %vm535_vm2, %v9234_v63 }
 0x12a   : > { %5328 = vmatmul.mubr.msk.f32.gmra.mxu0 %vm535_vm2, %v9235_v62  ;;  %5338 = vmatprep.mubr.msk.f32.mxu1 %vm535_vm2, %v9236_v26  ;;  %v9239_v26 = vld [vmem:[#allocation45_spill] sm:$0xff] }
 0x12b   : > { %5394 = vmatprep.mubr.msk.f32.mxu0 %vm535_vm2, %v6500_v42  ;;  %v2745_v42 = vld [vmem:[#allocation6 + $0xe8] sm:$0xff] }
 0x12d   : > { %5339 = vmatmul.mubr.msk.f32.vlgmr.msra.gmra.mxu1 %vm535_vm2, %v9237_v10  ;;  %v9240_v10 = vld [vmem:[#allocation46_spill] sm:$0xff] }
 0x12e   : > { %5395 = vmatmul.mubr.msk.f32.vlgmr.msra.gmra.mxu0 %vm535_vm2, %v6521_v51  ;;  %5443 = vmatpush3.msra.mxu1 %v2747_v61  ;;  %v3007_v51 = vld [vmem:[#allocation6 + $0x108] sm:$0xff]  ;;  %v2744_v61 = vld [vmem:[#allocation6 + $0xe0] sm:$0xff] }
 0x12f   : > { %5341 = vmatprep.mubr.msk.f32.mxu1 %vm535_vm2, %v9238_v3  ;;  %5499 = vmatpush3.msra.mxu0 %v3009_v45  ;;  %v9242_v45 = vld [vmem:[#allocation48_spill] sm:$0xff] }
 0x130   : > { %5397 = vmatprep.mubr.msk.f32.mxu0 %vm535_vm2, %v9221_v32  ;;  %5444 = vmatprep.subr.mxu1 %v2746_v58  ;;  %v9241_v32 = vld [vmem:[#allocation47_spill] sm:$0xff] }
 0x131   : > { %5342 = vmatmul.mubr.msk.f32.gmra.mxu1 %vm535_vm2, %v9239_v26  ;;  %5500 = vmatprep.subr.mxu0 %v3008_v35 }
 0x132   : > { %5398 = vmatmul.mubr.msk.f32.gmra.mxu0 %vm535_vm2, %v9222_v46  ;;  %5344 = vmatprep.mubr.msk.f32.mxu1 %vm535_vm2, %v9240_v10  ;;  %v3006_v46 = vld [vmem:[#allocation6 + $0x100] sm:$0xff] }
 0x133   : > { %5400 = vmatprep.mubr.msk.f32.mxu0 %vm535_vm2, %v6560_v7  ;;  %5445 = vmatpush3.msra.mxu1 %v2746_v58  ;;  %v9243_v7 = vld [vmem:[#allocation49_spill] sm:$0xff]  ;;  %v9245_v58 = vld [vmem:[#allocation51_spill] sm:$0xff] }
 0x134   : > { %5501 = vmatpush3.msra.mxu0 %v3008_v35  ;;  %5446 = vmatprep.subr.mxu1 %v2745_v42  ;;  %v9244_v35 = vld [vmem:[#allocation50_spill] sm:$0xff] }
 0x135   : > { %5345 = vmatmul.mubr.msk.f32.gmra.mxu1 %vm535_vm2, %v9241_v32  ;;  %5502 = vmatprep.subr.mxu0 %v3007_v51 }
 0x136   : > { %5401 = vmatmul.mubr.msk.f32.gmra.mxu0 %vm535_vm2, %v9223_v25  ;;  %5347 = vmatprep.mubr.msk.f32.mxu1 %vm535_vm2, %v9242_v45  ;;  %v9248_v25 = vld [vmem:[#allocation58_spill] sm:$0xff] }
 0x137   : > { %5403 = vmatprep.mubr.msk.f32.mxu0 %vm535_vm2, %v6592_v36  ;;  %5447 = vmatpush3.msra.mxu1 %v2745_v42  ;;  %v9246_v36 = vld [vmem:[#allocation53_spill] sm:$0xff] }
 0x138   : > { %5503 = vmatpush3.msra.mxu0 %v3007_v51  ;;  %5448 = vmatprep.subr.mxu1 %v2744_v61 }
 0x139   : > { %5348 = vmatmul.mubr.msk.f32.gmra.mxu1 %vm535_vm2, %v9243_v7  ;;  %5504 = vmatprep.subr.mxu0 %v3006_v46 }
 0x13a   : > { %5404 = vmatmul.mubr.msk.f32.gmra.mxu0 %vm535_vm2, %v6616_v57  ;;  %5350 = vmatprep.mubr.msk.f32.mxu1 %vm535_vm2, %v9244_v35  ;;  %v9247_v57 = vld [vmem:[#allocation54_spill] sm:$0xff] }
 0x13b   : > { %5406 = vmatprep.mubr.msk.f32.mxu0 %vm535_vm2, %v9224_v1  ;;  %5449 = vmatpush3.msra.mxu1 %v2744_v61  ;;  %v9249_v1 = vld [vmem:[#allocation60_spill] sm:$0xff]  ;;  %v9256_v61 = vld [vmem:[#allocation67_spill] sm:$0xff] }
 0x13c   : > { %5505 = vmatpush3.msra.mxu0 %v3006_v46 }
 0x13d   : > { %5351 = vmatmul.mubr.msk.f32.gmra.mxu1 %vm535_vm2, %v9245_v58 }
 0x13e   : > { %5407 = vmatmul.mubr.msk.f32.gmra.mxu0 %vm535_vm2, %v9226_v54  ;;  %5353 = vmatprep.mubr.msk.f32.mxu1 %vm535_vm2, %v9246_v36  ;;  %v9250_v54 = vld [vmem:[#allocation62_spill] sm:$0xff] }
 0x13f   : > { %5409 = vmatprep.mubr.msk.f32.mxu0 %vm535_vm2, %v9227_v29  ;;  %v9251_v29 = vld [vmem:[#allocation63_spill] sm:$0xff] }
 0x141   : > { %5354 = vmatmul.mubr.msk.f32.gmra.mxu1 %vm535_vm2, %v9247_v57 }
 0x142   : > { %5410 = vmatmul.mubr.msk.f32.gmra.mxu0 %vm535_vm2, %v9228_v41  ;;  %5356 = vmatprep.mubr.msk.f32.mxu1 %vm535_vm2, %v9248_v25  ;;  %v9252_v41 = vld [vmem:[#allocation64_spill] sm:$0xff] }
 0x143   : > { %5412 = vmatprep.mubr.msk.f32.mxu0 %vm535_vm2, %v6445_v14 }
 0x145   : > { %5357 = vmatmul.mubr.msk.f32.gmra.mxu1 %vm535_vm2, %v9249_v1 }
 0x146   : > { %5413 = vmatmul.mubr.msk.f32.gmra.mxu0 %vm535_vm2, %v6456_v21  ;;  %5359 = vmatprep.mubr.msk.f32.mxu1 %vm535_vm2, %v9250_v54  ;;  %v9253_v21 = vld [vmem:[#allocation65_spill] sm:$0xff] }
 0x147   : > { %5415 = vmatprep.mubr.msk.f32.mxu0 %vm535_vm2, %v6467_v28  ;;  %v9254_v28 = vld [vmem:[#allocation66_spill] sm:$0xff] }
 0x149   : > { %5360 = vmatmul.mubr.msk.f32.gmra.mxu1 %vm535_vm2, %v9251_v29 }
 0x14a   : > { %5416 = vmatmul.mubr.msk.f32.gmra.mxu0 %vm535_vm2, %v6481_v34  ;;  %5362 = vmatprep.mubr.msk.f32.mxu1 %vm535_vm2, %v9252_v41 }
 0x14b   : > { %5418 = vmatprep.mubr.msk.f32.mxu0 %vm535_vm2, %v6492_v38 }
 0x14d   : > { %v7333_v14 = vpop.f32.mrf.mxu1  ;;  %5363 = vmatmul.mubr.msk.f32.gmra.mxu1 %vm535_vm2, %v9253_v21 }
 0x14e   : > { %v7337_v42 = vpop.f32.mrf.mxu0  ;;  %5419 = vmatmul.mubr.msk.f32.gmra.mxu0 %vm535_vm2, %v6513_v49  ;;  %5365 = vmatprep.mubr.msk.f32.mxu1 %vm535_vm2, %v9254_v28  ;;  %v9257_v49 = vld [vmem:[#allocation68_spill] sm:$0xff] }
 0x14f   : > { %v7343_v34 = vpop.f32.mrf.mxu1  ;;  %5421 = vmatprep.mubr.msk.f32.mxu0 %vm535_vm2, %v6524_v52 }
 0x150   : > { %v7347_v51 = vpop.f32.mrf.mxu0 }
 0x151   : > { %v7349_v38 = vpop.f32.mrf.mxu1  ;;  %5366 = vmatmul.mubr.msk.f32.gmra.mxu1 %vm535_vm2, %v9256_v61 }
 0x152   : > { %9255 = vst [vmem:[#allocation27_spill] sm:$0xff] %v7349_v38  ;;  %v7353_v46 = vpop.f32.mrf.mxu0  ;;  %5422 = vmatmul.mubr.msk.f32.gmra.mxu0 %vm535_vm2, %v9229_v18  ;;  %5368 = vmatprep.mubr.msk.f32.mxu1 %vm535_vm2, %v9257_v49  ;;  %v9261_v18 = vld [vmem:[#allocation72_spill] sm:$0xff] }
 0x153   : > { %v7359_v62 = vpop.f32.mrf.mxu1  ;;  %5424 = vmatprep.mubr.msk.f32.mxu0 %vm535_vm2, %v6554_v2 }
 0x154   : > { %9258 = vst [vmem:[#allocation28_spill] sm:$0xff] %v7359_v62  ;;  %v7363_v52 = vpop.f32.mrf.mxu0 }
 0x155   : > { %v7365_v43 = vpop.f32.mrf.mxu1  ;;  %5369 = vmatmul.mubr.msk.f32.gmra.mxu1 %vm535_vm2, %v9260_v15 }
 0x156   : > { %9259 = vst [vmem:[#allocation30_spill] sm:$0xff] %v7365_v43  ;;  %v7369_v38 = vpop.f32.mrf.mxu0  ;;  %5425 = vmatmul.mubr.msk.f32.gmra.mxu0 %vm535_vm2, %v9230_v23  ;;  %5371 = vmatprep.mubr.msk.f32.mxu1 %vm535_vm2, %v9261_v18  ;;  %v9264_v43 = vld [vmem:[#allocation74_spill] sm:$0xff]  ;;  %v9265_v23 = vld [vmem:[#allocation76_spill] sm:$0xff] }
 0x157   : > { %v7375_v49 = vpop.f32.mrf.mxu1  ;;  %5427 = vmatprep.mubr.msk.f32.mxu0 %vm535_vm2, %v6586_v27 }
 0x158   : > { %9262 = vst [vmem:[#allocation32_spill] sm:$0xff] %v7375_v49  ;;  %v7379_v2 = vpop.f32.mrf.mxu0 }
 0x159   : > { %v7381_v62 = vpop.f32.mrf.mxu1  ;;  %5372 = vmatmul.mubr.msk.f32.gmra.mxu1 %vm535_vm2, %v9264_v43 }
 0x15a   : > { %9263 = vst [vmem:[#allocation34_spill] sm:$0xff] %v7381_v62  ;;  %v7385_v15 = vpop.f32.mrf.mxu0  ;;  %5428 = vmatmul.mubr.msk.f32.gmra.mxu0 %vm535_vm2, %v9231_v47  ;;  %5374 = vmatprep.mubr.msk.f32.mxu1 %vm535_vm2, %v9265_v23  ;;  %v2210_v47 = vrot.slane %v9232_v55, 2 }
 0x15b   : > { %v7391_v18 = vpop.f32.mrf.mxu1  ;;  %5430 = vmatprep.mubr.msk.f32.mxu0 %vm535_vm2, %v6619_v59 }
 0x15c   : > { %9266 = vst [vmem:[#allocation52_spill] sm:$0xff] %v7391_v18  ;;  %v7395_v27 = vpop.f32.mrf.mxu0  ;;  %v2211_v18 = vrot.slane %v9234_v63, 2 }
 0x15d   : > { %v7397_v49 = vpop.f32.mrf.mxu1  ;;  %5375 = vmatmul.mubr.msk.f32.gmra.mxu1 %vm535_vm2, %v7080_v33 }
 0x15e   : > { %9267 = vst [vmem:[#allocation35_spill] sm:$0xff] %v7397_v49  ;;  %v7401_v62 = vpop.f32.mrf.mxu0  ;;  %5431 = vmatmul.mubr.msk.f32.gmra.mxu0 %vm535_vm2, %v6639_v9  ;;  %5377 = vmatprep.mubr.msk.f32.mxu1 %vm535_vm2, %v7093_v6  ;;  %v9270_v6 = vld [vmem:[#allocation57_spill] sm:$0xff] }
 0x15f   : > { %v7409_v59 = vpop.f32.mrf.mxu1  ;;  %5433 = vmatprep.mubr.msk.f32.mxu0 %vm535_vm2, %v6654_v31  ;;  %v7431_v31 = vsel %vm1264_vm4, %v2210_v47, %v2211_v18  ;;  %v9276_v47 = vld [vmem:[#allocation26_spill] sm:$0xff] }
 0x160   : > { %9268 = vst [vmem:[#allocation36_spill] sm:$0xff] %v7409_v59  ;;  %v7413_v49 = vpop.f32.mrf.mxu0  ;;  %v2213_v59 = vrot.slane %v9270_v6, 2  ;;  %9272 = vst [vmem:[#allocation31_spill] sm:$0xff] %v7431_v31 }
 0x161   : > { %v7415_v33 = vpop.f32.mrf.mxu1  ;;  %5378 = vmatmul.mubr.msk.f32.gmra.mxu1 %vm535_vm2, %v7109_v19 }
 0x162   : > { %9269 = vst [vmem:[#allocation37_spill] sm:$0xff] %v7415_v33  ;;  %v7419_v9 = vpop.f32.mrf.mxu0  ;;  %5434 = vmatmul.mubr.msk.f32.gmra.mxu0 %vm535_vm2, %v6671_v40  ;;  %5380 = vmatprep.mubr.msk.f32.mxu1 %vm535_vm2, %v7115_v60  ;;  %v7446_v6 = vsel %vm1264_vm4, %v2211_v18, %v2213_v59  ;;  %v9278_v18 = vld [vmem:[#allocation25_spill] sm:$0xff] }
 0x163   : > { %v7426_v23 = vpop.f32.mrf.mxu1  ;;  %5436 = vmatprep.mubr.msk.f32.mxu0 %vm535_vm2, %v9232_v55  ;;  %9274 = vst [vmem:[#allocation55_spill] sm:$0xff] %v7446_v6 }
 0x164   : > { %9271 = vst [vmem:[#allocation29_spill] sm:$0xff] %v7426_v23  ;;  %v7433_v33 = vpop.f32.mrf.mxu0  ;;  %v7454_v23 = vld [vmem:[#allocation8] ss:$0 sm:$0xff] }
 0x165   : > { %v7435_v19 = vpop.f32.mrf.mxu1  ;;  %5381 = vmatmul.mubr.msk.f32.gmra.mxu1 %vm535_vm2, %v7129_v48 }
 0x166   : > { %9273 = vst [vmem:[#allocation33_spill] sm:$0xff] %v7435_v19  ;;  %v7439_v40 = vpop.f32.mrf.mxu0  ;;  %5437 = vmatmul.mubr.msk.f32.gmra.mxu0 %vm535_vm2, %v9234_v63  ;;  %5383 = vmatprep.mubr.msk.f32.mxu1 %vm535_vm2, %v7431_v31 }
 0x167   : > { %v7448_v55 = vpop.f32.mrf.mxu1  ;;  %5439 = vmatprep.mubr.msk.f32.mxu0 %vm535_vm2, %v9276_v47  ;;  %v688_v47 = vadd.f32 %v7337_v42, %v7454_v23 }
 0x168   : > { %9275 = vst [vmem:[#allocation56_spill] sm:$0xff] %v7448_v55  ;;  %v7452_v19 = vpop.f32.mrf.mxu0 }
 0x169   : > { %v5105_v48 = vpop.f32.mrf.mxu1  ;;  %5384 = vmatmul.mubr.msk.f32.gmra.mxu1 %vm535_vm2, %v7446_v6 }
 0x16a   : > { %v7459_v63 = vadd.f32 %v5105_v48, %v7454_v23  ;;  %v7461_v31 = vpop.f32.mrf.mxu0  ;;  %5440 = vmatmul.mubr.msk.f32.gmra.mxu0 %vm535_vm2, %v9278_v18  ;;  %5450 = vmatprep.mubr.msk.f32.mxu1 %vm535_vm2, %v6732_v39  ;;  %v683_v18 = vadd.f32 %v7454_v23, %v7347_v51 }
 0x16b   : > { %v7467_v59 = vpop.f32.mrf.mxu1  ;;  %5506 = vmatprep.mubr.msk.f32.mxu0 %vm535_vm2, %v9238_v3  ;;  %v698_v3 = vadd.f32 %v7353_v46, %v7454_v23 }
 0x16c   : > { %9277 = vst [vmem:[#allocation42_spill] sm:$0xff] %v7459_v63  ;;  %9279 = vst [vmem:[#allocation43_spill] sm:$0xff] %v7467_v59  ;;  %v7473_v6 = vpop.f32.mrf.mxu0 }
 0x16d   : > { %v5116_v48 = vpop.f32.mrf.mxu1  ;;  %5451 = vmatmul.mubr.msk.f32.vlgmr.msra.gmra.mxu1 %vm535_vm2, %v6756_v44 }
 0x16e   : > { %v1233_v63 = vadd.f32 %v5116_v48, %v688_v47  ;;  %v5172_v55 = vpop.f32.mrf.mxu0  ;;  %5507 = vmatmul.mubr.msk.f32.vlgmr.msra.gmra.mxu0 %vm535_vm2, %v9239_v26  ;;  %5453 = vmatprep.mubr.msk.f32.mxu1 %vm535_vm2, %v6767_v30  ;;  %v693_v26 = vadd.f32 %v7454_v23, %v7363_v52 }
 0x16f   : > { %v1073_v39 = vpop.f32.mrf.mxu1  ;;  %5509 = vmatprep.mubr.msk.f32.mxu0 %vm535_vm2, %v9240_v10 }
 0x170   : > { %v7487_v42 = vadd.f32 %v5172_v55, %v1233_v63  ;;  %v1232_v44 = vadd.f32 %v1073_v39, %v683_v18  ;;  %v1480_v59 = vpop.f32.mrf.mxu0 }
 0x171   : > { %v5119_v51 = vpop.f32.mrf.mxu1  ;;  %5454 = vmatmul.mubr.msk.f32.gmra.mxu1 %vm535_vm2, %v6783_v17  ;;  %v708_v17 = vadd.f32 %v7369_v38, %v7454_v23 }
 0x172   : > { %v7493_v47 = vadd.f32 %v1480_v59, %v1232_v44  ;;  %v1235_v30 = vadd.f32 %v5119_v51, %v698_v3  ;;  %v5175_v48 = vpop.f32.mrf.mxu0  ;;  %5510 = vmatmul.mubr.msk.f32.gmra.mxu0 %vm535_vm2, %v9241_v32  ;;  %5456 = vmatprep.mubr.msk.f32.mxu1 %vm535_vm2, %v6791_v22  ;;  %v703_v32 = vadd.f32 %v7454_v23, %v7379_v2 }
 0x173   : > { %v1083_v10 = vpop.f32.mrf.mxu1  ;;  %5512 = vmatprep.mubr.msk.f32.mxu0 %vm535_vm2, %v9242_v45 }
 0x174   : > { %v7503_v46 = vadd.f32 %v5175_v48, %v1235_v30  ;;  %v1234_v52 = vadd.f32 %v1083_v10, %v693_v26  ;;  %v1490_v55 = vpop.f32.mrf.mxu0 }
 0x175   : > { %v5122_v63 = vpop.f32.mrf.mxu1  ;;  %5457 = vmatmul.mubr.msk.f32.gmra.mxu1 %vm535_vm2, %v6809_v11  ;;  %v718_v11 = vadd.f32 %v7385_v15, %v7454_v23 }
 0x176   : > { %v7509_v59 = vadd.f32 %v1490_v55, %v1234_v52  ;;  %v1237_v22 = vadd.f32 %v5122_v63, %v708_v17  ;;  %v5178_v18 = vpop.f32.mrf.mxu0  ;;  %5513 = vmatmul.mubr.msk.f32.gmra.mxu0 %vm535_vm2, %v9243_v7  ;;  %5459 = vmatprep.mubr.msk.f32.mxu1 %vm535_vm2, %v6827_v12  ;;  %v713_v7 = vadd.f32 %v7454_v23, %v7395_v27 }
 0x177   : > { %v1093_v45 = vpop.f32.mrf.mxu1  ;;  %5515 = vmatprep.mubr.msk.f32.mxu0 %vm535_vm2, %v9244_v35 }
 0x178   : > { %v7519_v38 = vadd.f32 %v5178_v18, %v1237_v22  ;;  %v1236_v2 = vadd.f32 %v1093_v45, %v703_v32  ;;  %v1500_v39 = vpop.f32.mrf.mxu0 }
 0x179   : > { %v5125_v3 = vpop.f32.mrf.mxu1  ;;  %5460 = vmatmul.mubr.msk.f32.gmra.mxu1 %vm535_vm2, %v6843_v8  ;;  %v728_v8 = vadd.f32 %v7401_v62, %v7454_v23 }
 0x17a   : > { %v7525_v44 = vadd.f32 %v1500_v39, %v1236_v2  ;;  %v1239_v12 = vadd.f32 %v5125_v3, %v718_v11  ;;  %v5181_v51 = vpop.f32.mrf.mxu0  ;;  %5516 = vmatmul.mubr.msk.f32.gmra.mxu0 %vm535_vm2, %v9245_v58  ;;  %5462 = vmatprep.mubr.msk.f32.mxu1 %vm535_vm2, %v9225_v20  ;;  %v723_v58 = vadd.f32 %v7454_v23, %v7413_v49 }
 0x17b   : > { %v1103_v15 = vpop.f32.mrf.mxu1  ;;  %5518 = vmatprep.mubr.msk.f32.mxu0 %vm535_vm2, %v9246_v36 }
 0x17c   : > { %v7535_v35 = vadd.f32 %v5181_v51, %v1239_v12  ;;  %v1238_v27 = vadd.f32 %v1103_v15, %v713_v7  ;;  %v1510_v26 = vpop.f32.mrf.mxu0 }
 0x17d   : > { %v5128_v30 = vpop.f32.mrf.mxu1  ;;  %5463 = vmatmul.mubr.msk.f32.gmra.mxu1 %vm535_vm2, %v6857_v16  ;;  %v738_v16 = vadd.f32 %v7419_v9, %v7454_v23 }
 0x17e   : > { %v7541_v48 = vadd.f32 %v1510_v26, %v1238_v27  ;;  %v1241_v20 = vadd.f32 %v5128_v30, %v728_v8  ;;  %v5184_v10 = vpop.f32.mrf.mxu0  ;;  %5519 = vmatmul.mubr.msk.f32.gmra.mxu0 %vm535_vm2, %v9247_v57  ;;  %5465 = vmatprep.mubr.msk.f32.mxu1 %vm535_vm2, %v6889_v0  ;;  %v733_v57 = vadd.f32 %v7454_v23, %v7433_v33  ;;  %v9281_v8 = vld [vmem:[#allocation27_spill] sm:$0xff] }
 0x17f   : > { %v1113_v62 = vpop.f32.mrf.mxu1  ;;  %5521 = vmatprep.mubr.msk.f32.mxu0 %vm535_vm2, %v9248_v25 }
 0x180   : > { %v7551_v36 = vadd.f32 %v5184_v10, %v1241_v20  ;;  %v1240_v49 = vadd.f32 %v1113_v62, %v723_v58  ;;  %v1520_v17 = vpop.f32.mrf.mxu0  ;;  %v9282_v58 = vld [vmem:[#allocation69_spill] sm:$0xff]  ;;  %v9283_v20 = vld [vmem:[#allocation28_spill] sm:$0xff] }
 0x181   : > { %v5131_v52 = vpop.f32.mrf.mxu1  ;;  %5466 = vmatmul.mubr.msk.f32.gmra.mxu1 %vm535_vm2, %v6905_v4  ;;  %v748_v4 = vadd.f32 %v7439_v40, %v7454_v23 }
 0x182   : > { %v7557_v55 = vadd.f32 %v1520_v17, %v1240_v49  ;;  %v1243_v0 = vadd.f32 %v5131_v52, %v738_v16  ;;  %v5187_v63 = vpop.f32.mrf.mxu0  ;;  %5522 = vmatmul.mubr.msk.f32.gmra.mxu0 %vm535_vm2, %v9249_v1  ;;  %5468 = vmatprep.mubr.msk.f32.mxu1 %vm535_vm2, %v6918_v24  ;;  %v743_v1 = vadd.f32 %v7454_v23, %v7452_v19  ;;  %v9284_v16 = vld [vmem:[#allocation70_spill] sm:$0xff]  ;;  %v9285_v49 = vld [vmem:[#allocation71_spill] sm:$0xff]  ;;  %v9286_v52 = vld [vmem:[#allocation72_spill] sm:$0xff] }
 0x183   : > { %v1123_v25 = vpop.f32.mrf.mxu1  ;;  %5524 = vmatprep.mubr.msk.f32.mxu0 %vm535_vm2, %v9250_v54 }
 0x184   : > { %v7567_v9 = vadd.f32 %v5187_v63, %v1243_v0  ;;  %v1242_v33 = vadd.f32 %v1123_v25, %v733_v57  ;;  %v1530_v32 = vpop.f32.mrf.mxu0  ;;  %v9287_v57 = vld [vmem:[#allocation30_spill] sm:$0xff] }
 0x185   : > { %v5134_v22 = vpop.f32.mrf.mxu1  ;;  %5469 = vmatmul.mubr.msk.f32.gmra.mxu1 %vm535_vm2, %v6942_v13  ;;  %v758_v13 = vadd.f32 %v7461_v31, %v7454_v23  ;;  %v788_v0 = vadd.f32 %v9287_v57, %v7454_v23  ;;  %v9302_v57 = vld [vmem:[#allocation83_spill] sm:$0xff] }
 0x186   : > { %v7573_v18 = vadd.f32 %v1530_v32, %v1242_v33  ;;  %v1245_v24 = vadd.f32 %v5134_v22, %v748_v4  ;;  %v5190_v45 = vpop.f32.mrf.mxu0  ;;  %5525 = vmatmul.mubr.msk.f32.gmra.mxu0 %vm535_vm2, %v9251_v29  ;;  %5471 = vmatprep.mubr.msk.f32.mxu1 %vm535_vm2, %v6953_v37  ;;  %v753_v29 = vadd.f32 %v7454_v23, %v7473_v6  ;;  %v9288_v32 = vld [vmem:[#allocation73_spill] sm:$0xff]  ;;  %v9289_v22 = vld [vmem:[#allocation32_spill] sm:$0xff] }
 0x187   : > { %v1133_v54 = vpop.f32.mrf.mxu1  ;;  %5527 = vmatprep.mubr.msk.f32.mxu0 %vm535_vm2, %v9252_v41 }
 0x188   : > { %v7583_v40 = vadd.f32 %v5190_v45, %v1245_v24  ;;  %v1244_v19 = vadd.f32 %v1133_v54, %v743_v1  ;;  %v1540_v11 = vpop.f32.mrf.mxu0  ;;  %v783_v1 = vadd.f32 %v7454_v23, %v9289_v22 }
 0x189   : > { %v5137_v2 = vpop.f32.mrf.mxu1  ;;  %5472 = vmatmul.mubr.msk.f32.gmra.mxu1 %vm535_vm2, %v6969_v50  ;;  %v768_v50 = vadd.f32 %v7333_v14, %v7454_v23 }
 0x18a   : > { %v7589_v39 = vadd.f32 %v1540_v11, %v1244_v19  ;;  %v1247_v37 = vadd.f32 %v5137_v2, %v758_v13  ;;  %v5193_v3 = vpop.f32.mrf.mxu0  ;;  %5528 = vmatmul.mubr.msk.f32.gmra.mxu0 %vm535_vm2, %v9253_v21  ;;  %5474 = vmatprep.mubr.msk.f32.mxu1 %vm535_vm2, %v6980_v53  ;;  %v763_v21 = vadd.f32 %v7454_v23, %v7343_v34  ;;  %v9290_v13 = vld [vmem:[#allocation75_spill] sm:$0xff]  ;;  %v9291_v11 = vld [vmem:[#allocation76_spill] sm:$0xff]  ;;  %v9292_v2 = vld [vmem:[#allocation34_spill] sm:$0xff] }
 0x18b   : > { %v1143_v41 = vpop.f32.mrf.mxu1  ;;  %5530 = vmatprep.mubr.msk.f32.mxu0 %vm535_vm2, %v9254_v28  ;;  %v9280_v28 = vld [vmem:[#allocation68_spill] sm:$0xff] }
 0x18c   : > { %v7599_v31 = vadd.f32 %v5193_v3, %v1247_v37  ;;  %v1246_v6 = vadd.f32 %v1143_v41, %v753_v29  ;;  %v1550_v7 = vpop.f32.mrf.mxu0  ;;  %v798_v29 = vadd.f32 %v9292_v2, %v7454_v23 }
 0x18d   : > { %v5140_v12 = vpop.f32.mrf.mxu1  ;;  %5475 = vmatmul.mubr.msk.f32.gmra.mxu1 %vm535_vm2, %v6992_v5  ;;  %v778_v5 = vadd.f32 %v9281_v8, %v7454_v23  ;;  %v9297_v8 = vld [vmem:[#allocation80_spill] sm:$0xff] }
 0x18e   : > { %v7605_v51 = vadd.f32 %v1550_v7, %v1246_v6  ;;  %v1249_v53 = vadd.f32 %v5140_v12, %v768_v50  ;;  %v5196_v15 = vpop.f32.mrf.mxu0  ;;  %5531 = vmatmul.mubr.msk.f32.gmra.mxu0 %vm535_vm2, %v9256_v61  ;;  %5477 = vmatprep.mubr.msk.f32.mxu1 %vm535_vm2, %v7009_v56  ;;  %v773_v61 = vadd.f32 %v7454_v23, %v9283_v20  ;;  %v9293_v6 = vld [vmem:[#allocation77_spill] sm:$0xff]  ;;  %v9294_v7 = vld [vmem:[#allocation52_spill] sm:$0xff] }
 0x18f   : > { %v1153_v14 = vpop.f32.mrf.mxu1  ;;  %5533 = vmatprep.mubr.msk.f32.mxu0 %vm535_vm2, %v9280_v28 }
 0x190   : > { %v7615_v27 = vadd.f32 %v5196_v15, %v1249_v53  ;;  %v1248_v34 = vadd.f32 %v1153_v14, %v763_v21  ;;  %v1560_v26 = vpop.f32.mrf.mxu0  ;;  %v9295_v15 = vld [vmem:[#allocation78_spill] sm:$0xff]  ;;  %v9296_v14 = vld [vmem:[#allocation79_spill] sm:$0xff] }
 0x191   : > { %v5143_v30 = vpop.f32.mrf.mxu1  ;;  %5478 = vmatmul.mubr.msk.f32.gmra.mxu1 %vm535_vm2, %v9282_v58 }
 0x192   : > { %v7621_v10 = vadd.f32 %v1560_v26, %v1248_v34  ;;  %v1251_v56 = vadd.f32 %v5143_v30, %v778_v5  ;;  %v5199_v62 = vpop.f32.mrf.mxu0  ;;  %5534 = vmatmul.mubr.msk.f32.gmra.mxu0 %vm535_vm2, %v9284_v16  ;;  %5480 = vmatprep.mubr.msk.f32.mxu1 %vm535_vm2, %v9285_v49  ;;  %v9298_v5 = vld [vmem:[#allocation35_spill] sm:$0xff] }
 0x193   : > { %v1163_v17 = vpop.f32.mrf.mxu1  ;;  %5536 = vmatprep.mubr.msk.f32.mxu0 %vm535_vm2, %v9286_v52  ;;  %v808_v34 = vadd.f32 %v9298_v5, %v7454_v23  ;;  %v9301_v52 = vld [vmem:[#allocation82_spill] sm:$0xff] }
 0x194   : > { %v7631_v63 = vadd.f32 %v5199_v62, %v1251_v56  ;;  %v1250_v25 = vadd.f32 %v1163_v17, %v773_v61  ;;  %v1570_v4 = vpop.f32.mrf.mxu0  ;;  %v9299_v61 = vld [vmem:[#allocation81_spill] sm:$0xff]  ;;  %v9300_v56 = vld [vmem:[#allocation36_spill] sm:$0xff] }
 0x195   : > { %v5146_v33 = vpop.f32.mrf.mxu1  ;;  %5481 = vmatmul.mubr.msk.f32.gmra.mxu1 %vm535_vm2, %v9288_v32  ;;  %v803_v62 = vadd.f32 %v7454_v23, %v9300_v56 }
 0x196   : > { %v7637_v24 = vadd.f32 %v1570_v4, %v1250_v25  ;;  %v1253_v45 = vadd.f32 %v5146_v33, %v788_v0  ;;  %v5202_v54 = vpop.f32.mrf.mxu0  ;;  %5537 = vmatmul.mubr.msk.f32.gmra.mxu0 %vm535_vm2, %v9264_v43  ;;  %5483 = vmatprep.mubr.msk.f32.mxu1 %vm535_vm2, %v9290_v13  ;;  %v793_v43 = vadd.f32 %v7454_v23, %v9294_v7  ;;  %v9303_v25 = vld [vmem:[#allocation37_spill] sm:$0xff] }
 0x197   : > { %v1173_v19 = vpop.f32.mrf.mxu1  ;;  %5539 = vmatprep.mubr.msk.f32.mxu0 %vm535_vm2, %v9291_v11  ;;  %v818_v4 = vadd.f32 %v9303_v25, %v7454_v23 }
 0x198   : > { %v7647_v37 = vadd.f32 %v5202_v54, %v1253_v45  ;;  %v1252_v3 = vadd.f32 %v1173_v19, %v783_v1  ;;  %v1580_v41 = vpop.f32.mrf.mxu0  ;;  %v9304_v45 = vld [vmem:[#allocation84_spill] sm:$0xff]  ;;  %v9305_v54 = vld [vmem:[#allocation29_spill] sm:$0xff] }
 0x199   : > { %v5149_v50 = vpop.f32.mrf.mxu1  ;;  %5484 = vmatmul.mubr.msk.f32.gmra.mxu1 %vm535_vm2, %v9293_v6  ;;  %v813_v13 = vadd.f32 %v7454_v23, %v9305_v54 }
 0x19a   : > { %v7653_v12 = vadd.f32 %v1580_v41, %v1252_v3  ;;  %v1255_v21 = vadd.f32 %v5149_v50, %v798_v29  ;;  %v5205_v53 = vpop.f32.mrf.mxu0  ;;  %5540 = vmatmul.mubr.msk.f32.gmra.mxu0 %vm535_vm2, %v9295_v15  ;;  %5486 = vmatprep.mubr.msk.f32.mxu1 %vm535_vm2, %v9296_v14  ;;  %v9306_v29 = vld [vmem:[#allocation85_spill] sm:$0xff]  ;;  %v9308_v41 = vld [vmem:[#allocation31_spill] sm:$0xff]  ;;  %v9311_v14 = vld [vmem:[#allocation56_spill] sm:$0xff] }
 0x19b   : > { %v1183_v28 = vpop.f32.mrf.mxu1  ;;  %5542 = vmatprep.mubr.msk.f32.mxu0 %vm535_vm2, %v9297_v8  ;;  %v9309_v50 = vld [vmem:[#allocation33_spill] sm:$0xff] }
 0x19c   : > { %v7663_v26 = vadd.f32 %v5205_v53, %v1255_v21  ;;  %v1254_v30 = vadd.f32 %v1183_v28, %v793_v43  ;;  %v1590_v58 = vpop.f32.mrf.mxu0  ;;  %v828_v6 = vadd.f32 %v9309_v50, %v7454_v23  ;;  %v9310_v15 = vld [vmem:[#allocation61_spill] sm:$0xff]  ;;  %v823_v28 = vadd.f32 %v7454_v23, %v9311_v14 }
 0x19d   : > { %v5152_v20 = vpop.f32.mrf.mxu1  ;;  %5487 = vmatmul.mubr.msk.f32.gmra.mxu1 %vm535_vm2, %v9299_v61  ;;  %v9314_v61 = vld [vmem:[#allocation39_spill] sm:$0xff] }
 0x19e   : > { %v7669_v16 = vadd.f32 %v1590_v58, %v1254_v30  ;;  %v1257_v49 = vadd.f32 %v5152_v20, %v808_v34  ;;  %v5208_v17 = vpop.f32.mrf.mxu0  ;;  %5543 = vmatmul.mubr.msk.f32.gmra.mxu0 %vm535_vm2, %v9301_v52  ;;  %5489 = vmatprep.mubr.msk.f32.mxu1 %vm535_vm2, %v9302_v57  ;;  %v9312_v30 = vld [vmem:[#allocation55_spill] sm:$0xff]  ;;  %v9313_v58 = vld [vmem:[#allocation38_spill] sm:$0xff]  ;;  %v9315_v52 = vld [vmem:[#allocation40_spill] sm:$0xff] }
 0x19f   : > { %v1193_v0 = vpop.f32.mrf.mxu1  ;;  %5545 = vmatprep.mubr.msk.f32.mxu0 %vm535_vm2, %v7115_v60  ;;  %v9307_v60 = vld [vmem:[#allocation59_spill] sm:$0xff] }
 0x1a0   : > { %v7679_v33 = vadd.f32 %v5208_v17, %v1257_v49  ;;  %v1256_v32 = vadd.f32 %v1193_v0, %v803_v62  ;;  %v1600_v22 = vpop.f32.mrf.mxu0  ;;  %v9316_v57 = vld [vmem:[#allocation43_spill] sm:$0xff] }
 0x1a1   : > { %v5155_v1 = vpop.f32.mrf.mxu1  ;;  %5490 = vmatmul.mubr.msk.f32.gmra.mxu1 %vm535_vm2, %v9304_v45  ;;  %v833_v0 = vadd.f32 %v7454_v23, %v9316_v57 }
 0x1a2   : > { %v7685_v19 = vadd.f32 %v1600_v22, %v1256_v32  ;;  %v1259_v11 = vadd.f32 %v5155_v1, %v818_v4  ;;  %v5211_v2 = vpop.f32.mrf.mxu0  ;;  %5546 = vmatmul.mubr.msk.f32.gmra.mxu0 %vm535_vm2, %v9306_v29  ;;  %5492 = vmatprep.mubr.msk.f32.mxu1 %vm535_vm2, %v9307_v60  ;;  %v9317_v4 = vld [vmem:[#allocation42_spill] sm:$0xff]  ;;  %v9318_v1 = vld [vmem:[#allocation41_spill] sm:$0xff] }
 0x1a3   : > { %v1203_v3 = vpop.f32.mrf.mxu1  ;;  %5548 = vmatprep.mubr.msk.f32.mxu0 %vm535_vm2, %v9308_v41 }
 0x1a4   : > { %v7695_v7 = vadd.f32 %v5211_v2, %v1259_v11  ;;  %v1258_v43 = vadd.f32 %v1203_v3, %v813_v13  ;;  %v1610_v21 = vpop.f32.mrf.mxu0 }
 0x1a5   : > { %v5158_v53 = vpop.f32.mrf.mxu1  ;;  %5493 = vmatmul.mubr.msk.f32.gmra.mxu1 %vm535_vm2, %v9310_v15 }
 0x1a6   : > { %v7701_v8 = vadd.f32 %v1610_v21, %v1258_v43  ;;  %v1261_v5 = vadd.f32 %v5158_v53, %v828_v6  ;;  %v5214_v34 = vpop.f32.mrf.mxu0  ;;  %5549 = vmatmul.mubr.msk.f32.gmra.mxu0 %vm535_vm2, %v9312_v30  ;;  %5495 = vmatprep.mubr.msk.f32.mxu1 %vm535_vm2, %v9313_v58 }
 0x1a7   : > { %v1213_v20 = vpop.f32.mrf.mxu1  ;;  %5551 = vmatprep.mubr.msk.f32.mxu0 %vm535_vm2, %v9314_v61 }
 0x1a8   : > { %v7709_v56 = vadd.f32 %v5214_v34, %v1261_v5  ;;  %v1260_v62 = vadd.f32 %v1213_v20, %v823_v28  ;;  %v1620_v49 = vpop.f32.mrf.mxu0 }
 0x1a9   : > { %v5161_v17 = vpop.f32.mrf.mxu1  ;;  %5496 = vmatmul.mubr.msk.f32.gmra.mxu1 %vm535_vm2, %v9315_v52 }
 0x1aa   : > { %v7715_v25 = vadd.f32 %v1620_v49, %v1260_v62  ;;  %v1263_v32 = vadd.f32 %v5161_v17, %v9317_v4  ;;  %v5217_v22 = vpop.f32.mrf.mxu0  ;;  %5552 = vmatmul.mubr.msk.f32.gmra.mxu0 %vm535_vm2, %v9318_v1 }
 0x1ab   : > { %v1223_v45 = vpop.f32.mrf.mxu1 }
 0x1ac   : > { %v7720_v54 = vadd.f32 %v5217_v22, %v1263_v32  ;;  %v1262_v13 = vadd.f32 %v1223_v45, %v833_v0  ;;  %v1630_v11 = vpop.f32.mrf.mxu0 }
 0x1ad   : > { %v5228_v2 = vpop.f32.mrf.mxu1 }
 0x1ae   : > { %v7722_v29 = vadd.f32 %v1630_v11, %v1262_v13  ;;  %v1907_v60 = vadd.f32 %v5228_v2, %v7487_v42  ;;  %v5284_v3 = vpop.f32.mrf.mxu0 }
 0x1af   : > { %v1747_v23 = vpop.f32.mrf.mxu1 }
 0x1b0   : > { %v7725_v41 = vadd.f32 %v5284_v3, %v1907_v60  ;;  %v1906_v50 = vadd.f32 %v1747_v23, %v7493_v47  ;;  %v2019_v6 = vpop.f32.mrf.mxu0 }
 0x1b1   : > { %v5231_v43 = vpop.f32.mrf.mxu1 }
 0x1b2   : > { %v7728_v21 = vadd.f32 %v2019_v6, %v1906_v50  ;;  %v1909_v53 = vadd.f32 %v5231_v43, %v7503_v46  ;;  %v5287_v15 = vpop.f32.mrf.mxu0 }
 0x1b3   : > { %v1757_v14 = vpop.f32.mrf.mxu1 }
 0x1b4   : > { %v7731_v28 = vadd.f32 %v5287_v15, %v1909_v53  ;;  %v1908_v5 = vadd.f32 %v1757_v14, %v7509_v59  ;;  %v2029_v34 = vpop.f32.mrf.mxu0 }
 0x1b5   : > { %v5234_v42 = vpop.f32.mrf.mxu1 }
 0x1b6   : > { %v7734_v30 = vadd.f32 %v2029_v34, %v1908_v5  ;;  %v1911_v58 = vadd.f32 %v5234_v42, %v7519_v38  ;;  %v5290_v20 = vpop.f32.mrf.mxu0 }
 0x1b7   : > { %v1767_v47 = vpop.f32.mrf.mxu1 }
 0x1b8   : > { %v7737_v61 = vadd.f32 %v5290_v20, %v1911_v58  ;;  %v1910_v62 = vadd.f32 %v1767_v47, %v7525_v44  ;;  %v2039_v49 = vpop.f32.mrf.mxu0 }
 0x1b9   : > { %v5237_v46 = vpop.f32.mrf.mxu1 }
 0x1ba   : > { %v7740_v17 = vadd.f32 %v2039_v49, %v1910_v62  ;;  %v1913_v52 = vadd.f32 %v5237_v46, %v7535_v35  ;;  %v5293_v57 = vpop.f32.mrf.mxu0 }
 0x1bb   : > { %v1777_v59 = vpop.f32.mrf.mxu1 }
 0x1bc   : > { %v7743_v0 = vadd.f32 %v5293_v57, %v1913_v52  ;;  %v1912_v4 = vadd.f32 %v1777_v59, %v7541_v48  ;;  %v2049_v32 = vpop.f32.mrf.mxu0 }
 0x1bd   : > { %v5240_v38 = vpop.f32.mrf.mxu1 }
 0x1be   : > { %v7746_v22 = vadd.f32 %v2049_v32, %v1912_v4  ;;  %v1915_v1 = vadd.f32 %v5240_v38, %v7551_v36  ;;  %v5296_v45 = vpop.f32.mrf.mxu0 }
 0x1bf   : > { %v1787_v44 = vpop.f32.mrf.mxu1 }
 0x1c0   : > { %v7749_v13 = vadd.f32 %v5296_v45, %v1915_v1  ;;  %v1914_v11 = vadd.f32 %v1787_v44, %v7557_v55  ;;  %v2059_v2 = vpop.f32.mrf.mxu0 }
 0x1c1   : > { %v5243_v35 = vpop.f32.mrf.mxu1 }
 0x1c2   : > { %v7752_v60 = vadd.f32 %v2059_v2, %v1914_v11  ;;  %v1917_v3 = vadd.f32 %v5243_v35, %v7567_v9  ;;  %v5299_v23 = vpop.f32.mrf.mxu0 }
 0x1c3   : > { %v1797_v48 = vpop.f32.mrf.mxu1 }
 0x1c4   : > { %v7755_v50 = vadd.f32 %v5299_v23, %v1917_v3  ;;  %v1916_v6 = vadd.f32 %v1797_v48, %v7573_v18  ;;  %v2069_v43 = vpop.f32.mrf.mxu0 }
 0x1c5   : > { %v5246_v36 = vpop.f32.mrf.mxu1 }
 0x1c6   : > { %v7758_v53 = vadd.f32 %v2069_v43, %v1916_v6  ;;  %v1919_v15 = vadd.f32 %v5246_v36, %v7583_v40  ;;  %v5302_v14 = vpop.f32.mrf.mxu0 }
 0x1c7   : > { %v1807_v55 = vpop.f32.mrf.mxu1 }
 0x1c8   : > { %v7761_v5 = vadd.f32 %v5302_v14, %v1919_v15  ;;  %v1918_v34 = vadd.f32 %v1807_v55, %v7589_v39  ;;  %v2079_v42 = vpop.f32.mrf.mxu0 }
 0x1c9   : > { %v5249_v9 = vpop.f32.mrf.mxu1 }
 0x1ca   : > { %v7764_v58 = vadd.f32 %v2079_v42, %v1918_v34  ;;  %v1921_v20 = vadd.f32 %v5249_v9, %v7599_v31  ;;  %v5305_v47 = vpop.f32.mrf.mxu0 }
 0x1cb   : > { %v1817_v18 = vpop.f32.mrf.mxu1 }
 0x1cc   : > { %v7767_v62 = vadd.f32 %v5305_v47, %v1921_v20  ;;  %v1920_v49 = vadd.f32 %v1817_v18, %v7605_v51  ;;  %v2089_v46 = vpop.f32.mrf.mxu0 }
 0x1cd   : > { %v5252_v40 = vpop.f32.mrf.mxu1 }
 0x1ce   : > { %v7770_v52 = vadd.f32 %v2089_v46, %v1920_v49  ;;  %v1923_v57 = vadd.f32 %v5252_v40, %v7615_v27  ;;  %v5308_v59 = vpop.f32.mrf.mxu0 }
 0x1cf   : > { %v1827_v39 = vpop.f32.mrf.mxu1 }
 0x1d0   : > { %v7773_v4 = vadd.f32 %v5308_v59, %v1923_v57  ;;  %v1922_v32 = vadd.f32 %v1827_v39, %v7621_v10  ;;  %v2099_v38 = vpop.f32.mrf.mxu0 }
 0x1d1   : > { %v5255_v31 = vpop.f32.mrf.mxu1 }
 0x1d2   : > { %v7776_v1 = vadd.f32 %v2099_v38, %v1922_v32  ;;  %v1925_v45 = vadd.f32 %v5255_v31, %v7631_v63  ;;  %v5311_v44 = vpop.f32.mrf.mxu0 }
 0x1d3   : > { %v1837_v51 = vpop.f32.mrf.mxu1 }
 0x1d4   : > { %v7779_v11 = vadd.f32 %v5311_v44, %v1925_v45  ;;  %v1924_v2 = vadd.f32 %v1837_v51, %v7637_v24  ;;  %v2109_v35 = vpop.f32.mrf.mxu0 }
 0x1d5   : > { %v5258_v27 = vpop.f32.mrf.mxu1 }
 0x1d6   : > { %v7782_v3 = vadd.f32 %v2109_v35, %v1924_v2  ;;  %v1927_v23 = vadd.f32 %v5258_v27, %v7647_v37  ;;  %v5314_v48 = vpop.f32.mrf.mxu0 }
 0x1d7   : > { %v1847_v10 = vpop.f32.mrf.mxu1 }
 0x1d8   : > { %v7785_v6 = vadd.f32 %v5314_v48, %v1927_v23  ;;  %v1926_v43 = vadd.f32 %v1847_v10, %v7653_v12  ;;  %v2119_v36 = vpop.f32.mrf.mxu0 }
 0x1d9   : > { %v5261_v63 = vpop.f32.mrf.mxu1 }
 0x1da   : > { %v7788_v15 = vadd.f32 %v2119_v36, %v1926_v43  ;;  %v1929_v14 = vadd.f32 %v5261_v63, %v7663_v26  ;;  %v5317_v55 = vpop.f32.mrf.mxu0 }
 0x1db   : > { %v1857_v24 = vpop.f32.mrf.mxu1 }
 0x1dc   : > { %v7791_v34 = vadd.f32 %v5317_v55, %v1929_v14  ;;  %v1928_v42 = vadd.f32 %v1857_v24, %v7669_v16  ;;  %v2129_v9 = vpop.f32.mrf.mxu0 }
 0x1dd   : > { %v5264_v37 = vpop.f32.mrf.mxu1 }
 0x1de   : > { %v7794_v20 = vadd.f32 %v2129_v9, %v1928_v42  ;;  %v1931_v47 = vadd.f32 %v5264_v37, %v7679_v33  ;;  %v5320_v18 = vpop.f32.mrf.mxu0 }
 0x1df   : > { %v1867_v12 = vpop.f32.mrf.mxu1 }
 0x1e0   : > { %9319 = vst [vmem:[#allocation44_spill] sm:$0xff] %v7794_v20  ;;  %v7797_v49 = vadd.f32 %v5320_v18, %v1931_v47  ;;  %v1930_v46 = vadd.f32 %v1867_v12, %v7685_v19  ;;  %v2139_v40 = vpop.f32.mrf.mxu0 }
 0x1e1   : > { %v5267_v26 = vpop.f32.mrf.mxu1 }
 0x1e2   : > { %v7800_v57 = vadd.f32 %v2139_v40, %v1930_v46  ;;  %v1933_v59 = vadd.f32 %v5267_v26, %v7695_v7  ;;  %v5323_v39 = vpop.f32.mrf.mxu0 }
 0x1e3   : > { %v1877_v16 = vpop.f32.mrf.mxu1 }
 0x1e4   : > { %9320 = vst [vmem:[#allocation45_spill] sm:$0xff] %v7800_v57  ;;  %v7803_v32 = vadd.f32 %v5323_v39, %v1933_v59  ;;  %v1932_v38 = vadd.f32 %v1877_v16, %v7701_v8  ;;  %v2149_v31 = vpop.f32.mrf.mxu0 }
 0x1e5   : > { %v5270_v33 = vpop.f32.mrf.mxu1 }
 0x1e6   : > { %v7806_v45 = vadd.f32 %v2149_v31, %v1932_v38  ;;  %v1935_v44 = vadd.f32 %v5270_v33, %v7709_v56  ;;  %v5326_v51 = vpop.f32.mrf.mxu0 }
 0x1e7   : > { %v1887_v19 = vpop.f32.mrf.mxu1 }
 0x1e8   : > { %9321 = vst [vmem:[#allocation46_spill] sm:$0xff] %v7806_v45  ;;  %v7809_v2 = vadd.f32 %v5326_v51, %v1935_v44  ;;  %v1934_v35 = vadd.f32 %v1887_v19, %v7715_v25  ;;  %v2159_v27 = vpop.f32.mrf.mxu0 }
 0x1e9   : > { %v5273_v7 = vpop.f32.mrf.mxu1 }
 0x1ea   : > { %v7812_v23 = vadd.f32 %v2159_v27, %v1934_v35  ;;  %v1937_v48 = vadd.f32 %v5273_v7, %v7720_v54  ;;  %v5329_v10 = vpop.f32.mrf.mxu0 }
 0x1eb   : > { %v1897_v8 = vpop.f32.mrf.mxu1 }
 0x1ec   : > { %9322 = vst [vmem:[#allocation47_spill] sm:$0xff] %v7812_v23  ;;  %v7815_v43 = vadd.f32 %v5329_v10, %v1937_v48  ;;  %v1936_v36 = vadd.f32 %v1897_v8, %v7722_v29  ;;  %v2169_v63 = vpop.f32.mrf.mxu0 }
 0x1ed   : > { %v7818_v56 = vpop.f32.mrf.mxu1 }
 0x1ee   : > { %v7820_v14 = vadd.f32 %v2169_v63, %v1936_v36  ;;  %v7822_v55 = vpop.f32.mrf.mxu0 }
 0x1ef   : > { %v7824_v25 = vpop.f32.mrf.mxu1 }
 0x1f0   : > { %9323 = vst [vmem:[#allocation48_spill] sm:$0xff] %v7820_v14  ;;  %v7826_v24 = vpop.f32.mrf.mxu0 }
 0x1f1   : > { %v7828_v42 = vpop.f32.mrf.mxu1 }
 0x1f2   : > { %v7830_v54 = vpop.f32.mrf.mxu0 }
 0x1f3   : > { %v7832_v9 = vpop.f32.mrf.mxu1 }
 0x1f4   : > { %v7834_v37 = vpop.f32.mrf.mxu0 }
 0x1f5   : > { %v5346_v29 = vpop.f32.mrf.mxu1 }
 0x1f6   : > { %v2454_v47 = vadd.f32 %v5346_v29, %v7737_v61  ;;  %v5402_v18 = vpop.f32.mrf.mxu0 }
 0x1f7   : > { %v7837_v12 = vpop.f32.mrf.mxu1 }
 0x1f8   : > { %v7839_v46 = vadd.f32 %v5402_v18, %v2454_v47  ;;  %v7841_v40 = vpop.f32.mrf.mxu0 }
 0x1f9   : > { %v5349_v26 = vpop.f32.mrf.mxu1 }
 0x1fa   : > { %v2456_v59 = vadd.f32 %v5349_v26, %v7743_v0  ;;  %v5405_v39 = vpop.f32.mrf.mxu0 }
 0x1fb   : > { %v7844_v16 = vpop.f32.mrf.mxu1 }
 0x1fc   : > { %v7846_v38 = vadd.f32 %v5405_v39, %v2456_v59  ;;  %v7848_v31 = vpop.f32.mrf.mxu0 }
 0x1fd   : > { %v5352_v33 = vpop.f32.mrf.mxu1 }
 0x1fe   : > { %v2458_v61 = vadd.f32 %v5352_v33, %v7749_v13  ;;  %v5408_v44 = vpop.f32.mrf.mxu0 }
 0x1ff   : > { %v7851_v51 = vpop.f32.mrf.mxu1 }
 0x200   : > { %v7853_v19 = vadd.f32 %v5408_v44, %v2458_v61  ;;  %v7855_v35 = vpop.f32.mrf.mxu0 }
 0x201   : > { %v5355_v27 = vpop.f32.mrf.mxu1 }
 0x202   : > { %v2460_v0 = vadd.f32 %v5355_v27, %v7755_v50  ;;  %v5411_v7 = vpop.f32.mrf.mxu0 }
 0x203   : > { %v7858_v48 = vpop.f32.mrf.mxu1 }
 0x204   : > { %v7860_v10 = vadd.f32 %v5411_v7, %v2460_v0  ;;  %v7862_v8 = vpop.f32.mrf.mxu0 }
 0x205   : > { %v5358_v36 = vpop.f32.mrf.mxu1 }
 0x206   : > { %v2462_v13 = vadd.f32 %v5358_v36, %v7761_v5  ;;  %v5414_v63 = vpop.f32.mrf.mxu0 }
 0x207   : > { %v7865_v29 = vpop.f32.mrf.mxu1 }
 0x208   : > { %v7867_v47 = vadd.f32 %v5414_v63, %v2462_v13  ;;  %v7869_v18 = vpop.f32.mrf.mxu0 }
 0x209   : > { %v5361_v26 = vpop.f32.mrf.mxu1 }
 0x20a   : > { %v2464_v50 = vadd.f32 %v5361_v26, %v7767_v62  ;;  %v5417_v59 = vpop.f32.mrf.mxu0 }
 0x20b   : > { %v7872_v39 = vpop.f32.mrf.mxu1 }
 0x20c   : > { %v7874_v33 = vadd.f32 %v5417_v59, %v2464_v50  ;;  %v7876_v61 = vpop.f32.mrf.mxu0 }
 0x20d   : > { %v5364_v44 = vpop.f32.mrf.mxu1 }
 0x20e   : > { %v2466_v5 = vadd.f32 %v5364_v44, %v7773_v4  ;;  %v5420_v27 = vpop.f32.mrf.mxu0 }
 0x20f   : > { %v7879_v0 = vpop.f32.mrf.mxu1 }
 0x210   : > { %v7881_v7 = vadd.f32 %v5420_v27, %v2466_v5  ;;  %v7883_v36 = vpop.f32.mrf.mxu0 }
 0x211   : > { %v5367_v13 = vpop.f32.mrf.mxu1 }
 0x212   : > { %v2468_v62 = vadd.f32 %v5367_v13, %v7779_v11  ;;  %v5423_v63 = vpop.f32.mrf.mxu0 }
 0x213   : > { %v7886_v26 = vpop.f32.mrf.mxu1 }
 0x214   : > { %v7888_v50 = vadd.f32 %v5423_v63, %v2468_v62  ;;  %v7890_v59 = vpop.f32.mrf.mxu0 }
 0x215   : > { %v5370_v14 = vpop.f32.mrf.mxu1 }
 0x216   : > { %9324 = vst [vmem:[#allocation49_spill] sm:$0xff] %v7888_v50  ;;  %v2470_v4 = vadd.f32 %v5370_v14, %v7785_v6  ;;  %v5426_v44 = vpop.f32.mrf.mxu0 }
 0x217   : > { %v7893_v23 = vpop.f32.mrf.mxu1 }
 0x218   : > { %v7895_v5 = vadd.f32 %v5426_v44, %v2470_v4  ;;  %v7897_v27 = vpop.f32.mrf.mxu0 }
 0x219   : > { %9326 = vst [vmem:[#allocation51_spill] sm:$0xff] %v7897_v27  ;;  %v5373_v45 = vpop.f32.mrf.mxu1 }
 0x21a   : > { %9325 = vst [vmem:[#allocation50_spill] sm:$0xff] %v7895_v5  ;;  %v2472_v11 = vadd.f32 %v5373_v45, %v7791_v34  ;;  %v5429_v13 = vpop.f32.mrf.mxu0 }
 0x21b   : > { %v7900_v57 = vpop.f32.mrf.mxu1 }
 0x21c   : > { %v7902_v62 = vadd.f32 %v5429_v13, %v2472_v11  ;;  %v7904_v63 = vpop.f32.mrf.mxu0 }
 0x21d   : > { %9328 = vst [vmem:[#allocation54_spill] sm:$0xff] %v7904_v63  ;;  %v5376_v20 = vpop.f32.mrf.mxu1 }
 0x21e   : > { %9327 = vst [vmem:[#allocation53_spill] sm:$0xff] %v7902_v62  ;;  %v2474_v6 = vadd.f32 %v5376_v20, %v7797_v49  ;;  %v5432_v14 = vpop.f32.mrf.mxu0 }
 0x21f   : > { %v7907_v50 = vpop.f32.mrf.mxu1 }
 0x220   : > { %v7909_v4 = vadd.f32 %v5432_v14, %v2474_v6  ;;  %v7911_v44 = vpop.f32.mrf.mxu0  ;;  %v2450_v6 = vadd.f32 %v7818_v56, %v7725_v41 }
 0x221   : > { %v5379_v5 = vpop.f32.mrf.mxu1 }
 0x222   : > { %9329 = vst [vmem:[#allocation58_spill] sm:$0xff] %v7909_v4  ;;  %v2476_v34 = vadd.f32 %v5379_v5, %v7803_v32  ;;  %v5435_v45 = vpop.f32.mrf.mxu0  ;;  %v2449_v5 = vadd.f32 %v7824_v25, %v7728_v21  ;;  %v2451_v21 = vadd.f32 %v7832_v9, %v7734_v30 }
 0x223   : > { %v7914_v27 = vpop.f32.mrf.mxu1 }
 0x224   : > { %v7916_v11 = vadd.f32 %v5435_v45, %v2476_v34  ;;  %v7918_v13 = vpop.f32.mrf.mxu0 }
 0x225   : > { %v5382_v62 = vpop.f32.mrf.mxu1 }
 0x226   : > { %9330 = vst [vmem:[#allocation60_spill] sm:$0xff] %v7916_v11  ;;  %v2478_v20 = vadd.f32 %v5382_v62, %v7809_v2  ;;  %v5438_v49 = vpop.f32.mrf.mxu0  ;;  %v2712_v2 = vadd.f32 %v7822_v55, %v2450_v6  ;;  %v2452_v62 = vadd.f32 %v7828_v42, %v7731_v28  ;;  %v2713_v42 = vadd.f32 %v7834_v37, %v2451_v21 }
 0x227   : > { %v7921_v63 = vpop.f32.mrf.mxu1  ;;  %v2455_v37 = vadd.f32 %v7844_v16, %v7746_v22  ;;  %v2457_v22 = vadd.f32 %v7851_v51, %v7752_v60  ;;  %v2459_v60 = vadd.f32 %v7858_v48, %v7758_v53  ;;  %v2461_v53 = vadd.f32 %v7865_v29, %v7764_v58 }
 0x228   : > { %9331 = vst [vmem:[#allocation62_spill] sm:$0xff] %v7921_v63  ;;  %v7925_v14 = vadd.f32 %v5438_v49, %v2478_v20  ;;  %v7927_v4 = vpop.f32.mrf.mxu0  ;;  %v2711_v20 = vadd.f32 %v7826_v24, %v2449_v5  ;;  %v2463_v58 = vadd.f32 %v7872_v39, %v7770_v52  ;;  %v2465_v52 = vadd.f32 %v7879_v0, %v7776_v1 }
 0x229   : > { %v5385_v32 = vpop.f32.mrf.mxu1  ;;  %v2467_v1 = vadd.f32 %v7886_v26, %v7782_v3  ;;  %v2469_v3 = vadd.f32 %v7893_v23, %v7788_v15  ;;  %v9335_v15 = vld [vmem:[#allocation44_spill] sm:$0xff] }
 0x22a   : > { %9332 = vst [vmem:[#allocation63_spill] sm:$0xff] %v7925_v14  ;;  %v2480_v34 = vadd.f32 %v5385_v32, %v7815_v43  ;;  %v5441_v45 = vpop.f32.mrf.mxu0  ;;  %v2714_v32 = vadd.f32 %v7830_v54, %v2452_v62  ;;  %v2471_v23 = vadd.f32 %v7900_v57, %v9335_v15  ;;  %v9338_v57 = vld [vmem:[#allocation45_spill] sm:$0xff] }
 0x22b   : > { %v7932_v11 = vpop.f32.mrf.mxu1 }
 0x22c   : > { %v7937_v63 = vadd.f32 %v5441_v45, %v2480_v34  ;;  %v7939_v41 = vpop.f32.mrf.mxu0  ;;  %v2453_v34 = vadd.f32 %v7837_v12, %v7740_v17 }
 0x22d   : > { %v5452_v56 = vpop.f32.mrf.mxu1 }
 0x22e   : > { %v2974_v25 = vadd.f32 %v5452_v56, %v2712_v2  ;;  %v5508_v43 = vpop.f32.mrf.mxu0  ;;  %v2715_v56 = vadd.f32 %v7841_v40, %v2453_v34  ;;  %v2717_v40 = vadd.f32 %v7848_v31, %v2455_v37  ;;  %v2719_v34 = vadd.f32 %v7855_v35, %v2457_v22 }
 0x22f   : > { %v2814_v49 = vpop.f32.mrf.mxu1 }
 0x230   : > { %v7945_v14 = vadd.f32 %v5508_v43, %v2974_v25  ;;  %v2973_v55 = vadd.f32 %v2814_v49, %v2711_v20  ;;  %v3076_v6 = vpop.f32.mrf.mxu0 }
 0x231   : > { %v5455_v28 = vpop.f32.mrf.mxu1 }
 0x232   : > { %v2976_v45 = vadd.f32 %v5455_v28, %v2714_v32  ;;  %3525 = vrot.lane.b32.xlu0 %v7945_v14, %s6166_s28  ;;  %v5511_v30 = vpop.f32.mrf.mxu0  ;;  %v7952_v9 = vadd.f32 %v3076_v6, %v2973_v55 }
 0x233   : > { %v2824_v24 = vpop.f32.mrf.mxu1 }
 0x234   : > { %v7954_v54 = vadd.f32 %v5511_v30, %v2976_v45  ;;  %v2975_v5 = vadd.f32 %v2824_v24, %v2713_v42  ;;  %v3086_v2 = vpop.f32.mrf.mxu0 }
 0x235   : > { %v5458_v62 = vpop.f32.mrf.mxu1 }
 0x236   : > { %3523 = vrot.lane.b32.xlu0 %v7952_v9, %s6166_s28  ;;  %3529 = vrot.lane.b32.xlu1 %v7954_v54, %s6166_s28  ;;  %v5514_v17 = vpop.f32.mrf.mxu0  ;;  %v7963_v20 = vadd.f32 %v3086_v2, %v2975_v5  ;;  %v2978_v21 = vadd.f32 %v5458_v62, %v7839_v46  ;;  %v2721_v62 = vadd.f32 %v7862_v8, %v2459_v60 }
 0x237   : > { %v2834_v12 = vpop.f32.mrf.mxu1  ;;  %v2727_v60 = vadd.f32 %v7883_v36, %v2465_v52  ;;  %v9337_v52 = vld [vmem:[#allocation54_spill] sm:$0xff] }
 0x238   : > { %v2977_v25 = vadd.f32 %v2834_v12, %v2715_v56  ;;  %v3096_v43 = vpop.f32.mrf.mxu0  ;;  %v7973_v6 = vadd.f32 %v5514_v17, %v2978_v21 }
 0x239   : > { %v5461_v49 = vpop.f32.mrf.mxu1 }
 0x23a   : > { %v7969_v16 = vadd.f32 %v3096_v43, %v2977_v25  ;;  %3527 = vrot.lane.b32.xlu1 %v7963_v20, %s6166_s28  ;;  %v5517_v32 = vpop.f32.mrf.mxu0  ;;  %v2980_v28 = vadd.f32 %v5461_v49, %v7846_v38  ;;  %v2723_v25 = vadd.f32 %v7869_v18, %v2461_v53 }
 0x23b   : > { %v2844_v55 = vpop.f32.mrf.mxu1 }
 0x23c   : > { %v2979_v46 = vadd.f32 %v2844_v55, %v2717_v40  ;;  %3531 = vrot.lane.b32.xlu0 %v7969_v16, %s6166_s28  ;;  %v3106_v42 = vpop.f32.mrf.mxu0  ;;  %v7985_v24 = vadd.f32 %v5517_v32, %v2980_v28  ;;  %v2725_v55 = vadd.f32 %v7876_v61, %v2463_v58 }
 0x23d   : > { %v5464_v31 = vpop.f32.mrf.mxu1 }
 0x23e   : > { %v7981_v51 = vadd.f32 %v3106_v42, %v2979_v46  ;;  %3533 = vrot.lane.b32.xlu1 %v7973_v6, %s6166_s28  ;;  %v5520_v45 = vpop.f32.mrf.mxu0  ;;  %v2982_v38 = vadd.f32 %v5464_v31, %v7853_v19 }
 0x23f   : > { %v2854_v30 = vpop.f32.mrf.mxu1 }
 0x240   : > { %v2981_v5 = vadd.f32 %v2854_v30, %v2719_v34  ;;  %3535 = vrot.lane.b32.xlu0 %v7981_v51, %s6166_s28  ;;  %v3116_v2 = vpop.f32.mrf.mxu0  ;;  %v7997_v17 = vadd.f32 %v5520_v45, %v2982_v38 }
 0x241   : > { %v5467_v35 = vpop.f32.mrf.mxu1 }
 0x242   : > { %v7993_v48 = vadd.f32 %v3116_v2, %v2981_v5  ;;  %3537 = vrot.lane.b32.xlu1 %v7985_v24, %s6166_s28  ;;  %v5523_v56 = vpop.f32.mrf.mxu0  ;;  %v2984_v19 = vadd.f32 %v5467_v35, %v7860_v10  ;;  %v2729_v35 = vadd.f32 %v7890_v59, %v2467_v1 }
 0x243   : > { %v2864_v37 = vpop.f32.mrf.mxu1 }
 0x244   : > { %v2983_v12 = vadd.f32 %v2864_v37, %v2721_v62  ;;  %3539 = vrot.lane.b32.xlu0 %v7993_v48, %s6166_s28  ;;  %v3126_v21 = vpop.f32.mrf.mxu0  ;;  %v8009_v40 = vadd.f32 %v5523_v56, %v2984_v19 }
 0x245   : > { %v5470_v8 = vpop.f32.mrf.mxu1 }
 0x246   : > { %3541 = vrot.lane.b32.xlu1 %v7997_v17, %s6166_s28  ;;  %v5526_v29 = vpop.f32.mrf.mxu0  ;;  %v8007_v43 = vadd.f32 %v3126_v21, %v2983_v12  ;;  %v2986_v10 = vadd.f32 %v5470_v8, %v7867_v47  ;;  %v9334_v21 = vld [vmem:[#allocation51_spill] sm:$0xff] }
 0x247   : > { %v2874_v49 = vpop.f32.mrf.mxu1  ;;  %v2731_v8 = vadd.f32 %v9334_v21, %v2469_v3 }
 0x248   : > { %v2985_v22 = vadd.f32 %v2874_v49, %v2723_v25  ;;  %v3136_v32 = vpop.f32.mrf.mxu0  ;;  %3543 = vrot.lane.b32.xlu0 %v8007_v43, %s6166_s28  ;;  %v8021_v42 = vadd.f32 %v5526_v29, %v2986_v10  ;;  %v9336_v10 = vld [vmem:[#allocation50_spill] sm:$0xff] }
 0x249   : > { %v5473_v18 = vpop.f32.mrf.mxu1 }
 0x24a   : > { %3545 = vrot.lane.b32.xlu1 %v8009_v40, %s6166_s28  ;;  %v5529_v39 = vpop.f32.mrf.mxu0  ;;  %v8019_v28 = vadd.f32 %v3136_v32, %v2985_v22  ;;  %v2988_v47 = vadd.f32 %v5473_v18, %v7874_v33 }
 0x24b   : > { %v2884_v46 = vpop.f32.mrf.mxu1 }
 0x24c   : > { %v2987_v31 = vadd.f32 %v2884_v46, %v2725_v55  ;;  %v3146_v34 = vpop.f32.mrf.mxu0  ;;  %3547 = vrot.lane.b32.xlu0 %v8019_v28, %s6166_s28  ;;  %v8033_v38 = vadd.f32 %v5529_v39, %v2988_v47  ;;  %v2733_v39 = vadd.f32 %v9337_v52, %v2471_v23  ;;  %v2473_v46 = vadd.f32 %v7907_v50, %v9338_v57  ;;  %v9340_v50 = vld [vmem:[#allocation46_spill] sm:$0xff] }
 0x24d   : > { %v5476_v61 = vpop.f32.mrf.mxu1 }
 0x24e   : > { %3549 = vrot.lane.b32.xlu1 %v8021_v42, %s6166_s28  ;;  %v5532_v0 = vpop.f32.mrf.mxu0  ;;  %v8031_v45 = vadd.f32 %v3146_v34, %v2987_v31  ;;  %v2990_v33 = vadd.f32 %v5476_v61, %v7881_v7  ;;  %v9333_v7 = vld [vmem:[#allocation49_spill] sm:$0xff] }
 0x24f   : > { %v2894_v30 = vpop.f32.mrf.mxu1 }
 0x250   : > { %v2989_v5 = vadd.f32 %v2894_v30, %v2727_v60  ;;  %v3156_v2 = vpop.f32.mrf.mxu0  ;;  %3551 = vrot.lane.b32.xlu0 %v8031_v45, %s6166_s28  ;;  %v8045_v56 = vadd.f32 %v5532_v0, %v2990_v33  ;;  %v9339_v60 = vld [vmem:[#allocation53_spill] sm:$0xff] }
 0x251   : > { %v5479_v36 = vpop.f32.mrf.mxu1 }
 0x252   : > { %v8041_v26 = vadd.f32 %v3156_v2, %v2989_v5  ;;  %3553 = vrot.lane.b32.xlu1 %v8033_v38, %s6166_s28  ;;  %v5535_v62 = vpop.f32.mrf.mxu0  ;;  %v2992_v37 = vadd.f32 %v5479_v36, %v9333_v7  ;;  %v2735_v5 = vadd.f32 %v7911_v44, %v2473_v46  ;;  %v2475_v2 = vadd.f32 %v7914_v27, %v9340_v50  ;;  %v9342_v27 = vld [vmem:[#allocation47_spill] sm:$0xff] }
 0x253   : > { %v2904_v53 = vpop.f32.mrf.mxu1 }
 0x254   : > { %v2991_v19 = vadd.f32 %v2904_v53, %v2729_v35  ;;  %v3166_v12 = vpop.f32.mrf.mxu0  ;;  %3555 = vrot.lane.b32.xlu0 %v8041_v26, %s6166_s28  ;;  %v8057_v49 = vadd.f32 %v5535_v62, %v2992_v37  ;;  %v9341_v53 = vld [vmem:[#allocation58_spill] sm:$0xff] }
 0x255   : > { %v5482_v59 = vpop.f32.mrf.mxu1 }
 0x256   : > { %v8053_v25 = vadd.f32 %v3166_v12, %v2991_v19  ;;  %3557 = vrot.lane.b32.xlu1 %v8045_v56, %s6166_s28  ;;  %v5538_v58 = vpop.f32.mrf.mxu0  ;;  %v2994_v22 = vadd.f32 %v5482_v59, %v9336_v10  ;;  %v2737_v12 = vadd.f32 %v7918_v13, %v2475_v2  ;;  %v9343_v59 = vld [vmem:[#allocation62_spill] sm:$0xff] }
 0x257   : > { %v2914_v29 = vpop.f32.mrf.mxu1  ;;  %v2477_v21 = vadd.f32 %v9343_v59, %v9342_v27 }
 0x258   : > { %v2993_v32 = vadd.f32 %v2914_v29, %v2731_v8  ;;  %v3176_v18 = vpop.f32.mrf.mxu0  ;;  %3559 = vrot.lane.b32.xlu0 %v8053_v25, %s6166_s28  ;;  %v8069_v61 = vadd.f32 %v5538_v58, %v2994_v22  ;;  %v9344_v29 = vld [vmem:[#allocation60_spill] sm:$0xff] }
 0x259   : > { %v5485_v55 = vpop.f32.mrf.mxu1 }
 0x25a   : > { %v8065_v47 = vadd.f32 %v3176_v18, %v2993_v32  ;;  %3561 = vrot.lane.b32.xlu1 %v8057_v49, %s6166_s28  ;;  %v5541_v31 = vpop.f32.mrf.mxu0  ;;  %v2996_v1 = vadd.f32 %v5485_v55, %v9339_v60  ;;  %v2739_v18 = vadd.f32 %v7927_v4, %v2477_v21  ;;  %v9345_v55 = vld [vmem:[#allocation48_spill] sm:$0xff]  ;;  %v8146_v21 = vld [vmem:[%s6387_s14 + $0x10] sm:$0xff] }
 0x25b   : > { %v2924_v34 = vpop.f32.mrf.mxu1  ;;  %v2479_v52 = vadd.f32 %v7932_v11, %v9345_v55  ;;  %v8171_v55 = vld [vmem:[%s6387_s14 + $0x48] sm:$0xff] }
 0x25c   : > { %v2995_v0 = vadd.f32 %v2924_v34, %v2733_v39  ;;  %v3186_v30 = vpop.f32.mrf.mxu0  ;;  %3563 = vrot.lane.b32.xlu0 %v8065_v47, %s6166_s28  ;;  %v8081_v62 = vadd.f32 %v5541_v31, %v2996_v1  ;;  %v9346_v34 = vld [vmem:[#allocation63_spill] sm:$0xff] }
 0x25d   : > { %v5488_v33 = vpop.f32.mrf.mxu1  ;;  %v2741_v11 = vadd.f32 %v7939_v41, %v2479_v52  ;;  %v8174_v52 = vld [vmem:[%s6387_s14 + $0x40] sm:$0xff] }
 0x25e   : > { %v8077_v36 = vadd.f32 %v3186_v30, %v2995_v0  ;;  %3565 = vrot.lane.b32.xlu1 %v8069_v61, %s6166_s28  ;;  %v5544_v35 = vpop.f32.mrf.mxu0  ;;  %v2998_v7 = vadd.f32 %v5488_v33, %v9341_v53 }
 0x25f   : > { %v2934_v3 = vpop.f32.mrf.mxu1 }
 0x260   : > { %v2997_v37 = vadd.f32 %v2934_v3, %v2735_v5  ;;  %v3196_v19 = vpop.f32.mrf.mxu0  ;;  %3567 = vrot.lane.b32.xlu0 %v8077_v36, %s6166_s28  ;;  %v8093_v58 = vadd.f32 %v5544_v35, %v2998_v7 }
 0x261   : > { %v5491_v44 = vpop.f32.mrf.mxu1 }
 0x262   : > { %3569 = vrot.lane.b32.xlu1 %v8081_v62, %s6166_s28  ;;  %v5547_v8 = vpop.f32.mrf.mxu0  ;;  %v8091_v15 = vadd.f32 %v3196_v19, %v2997_v37  ;;  %v3000_v10 = vadd.f32 %v5491_v44, %v9344_v29  ;;  %v8136_v37 = vld [vmem:[%s6387_s14] sm:$0xff]  ;;  %v8139_v19 = vld [vmem:[%s6387_s14 + $0x18] sm:$0xff] }
 0x263   : > { %v2944_v23 = vpop.f32.mrf.mxu1  ;;  %v3267_v44 = vadd.f32 %v7952_v9, %v8136_v37  ;;  %v3270_v27 = vadd.f32 %v7954_v54, %v8139_v19  ;;  %v8154_v29 = vld [vmem:[%s6387_s14 + $0x20] sm:$0xff] }
 0x264   : > { %v2999_v22 = vadd.f32 %v2944_v23, %v2737_v12  ;;  %v3206_v32 = vpop.f32.mrf.mxu0  ;;  %3571 = vrot.lane.b32.xlu0 %v8091_v15, %s6166_s28  ;;  %v8105_v31 = vadd.f32 %v5547_v8, %v3000_v10  ;;  %v8151_v23 = vld [vmem:[%s6387_s14 + $0x28] sm:$0xff]  ;;  %v3271_v10 = vadd.f32 %v7969_v16, %v8154_v29 }
 0x265   : > { %v5494_v13 = vpop.f32.mrf.mxu1  ;;  %v4683_v59 = vmul.f32 -1.442695, %v3267_v44  ;;  %v4686_v8 = vmul.f32 -1.442695, %v3270_v27  ;;  %v3272_v9 = vadd.f32 %v7973_v6, %v8151_v23  ;;  %v8204_v27 = vld [vmem:[%s6387_s14 + $0x70] sm:$0xff] }
 0x266   : > { %3573 = vrot.lane.b32.xlu1 %v8093_v58, %s6166_s28  ;;  %v5550_v39 = vpop.f32.mrf.mxu0  ;;  %v8103_v57 = vadd.f32 %v3206_v32, %v2999_v22  ;;  %v3002_v60 = vadd.f32 %v5494_v13, %v9346_v34  ;;  %v8161_v22 = vld [vmem:[%s6387_s14 + $0x38] sm:$0xff]  ;;  %v8164_v32 = vld [vmem:[%s6387_s14 + $0x30] sm:$0xff] }
 0x267   : > { %v2954_v46 = vpop.f32.mrf.mxu1  ;;  %v3274_v13 = vadd.f32 %v7985_v24, %v8161_v22  ;;  %v3273_v6 = vadd.f32 %v7981_v51, %v8164_v32  ;;  %v3275_v24 = vadd.f32 %v7993_v48, %v8174_v52 }
 0x268   : > { %v3001_v1 = vadd.f32 %v2954_v46, %v2739_v18  ;;  %v3216_v0 = vpop.f32.mrf.mxu0  ;;  %3575 = vrot.lane.b32.xlu0 %v8103_v57, %s6166_s28  ;;  %v8115_v50 = vadd.f32 %v5550_v39, %v3002_v60  ;;  %v4687_v18 = vmul.f32 -1.442695, %v3271_v10  ;;  %v3276_v46 = vadd.f32 %v7997_v17, %v8171_v55  ;;  %v8181_v60 = vld [vmem:[%s6387_s14 + $0x58] sm:$0xff] }
 0x269   : > { %v5497_v4 = vpop.f32.mrf.mxu1  ;;  %v4690_v39 = vmul.f32 -1.442695, %v3274_v13  ;;  %v4689_v34 = vmul.f32 -1.442695, %v3273_v6  ;;  %v3278_v17 = vadd.f32 %v8009_v40, %v8181_v60  ;;  %v4691_v48 = vmul.f32 -1.442695, %v3275_v24 }
 0x26a   : > { %v8111_v30 = vadd.f32 %v3216_v0, %v3001_v1  ;;  %3577 = vrot.lane.b32.xlu1 %v8105_v31, %s6166_s28  ;;  %v5553_v33 = vpop.f32.mrf.mxu0  ;;  %v3004_v2 = vadd.f32 %v5497_v4, %v7937_v63  ;;  %v8131_v63 = vld [vmem:[%s6387_s14 + $0x8] sm:$0xff]  ;;  %v8184_v1 = vld [vmem:[%s6387_s14 + $0x50] sm:$0xff] }
 0x26b   : > { %v2964_v5 = vpop.f32.mrf.mxu1  ;;  %v3268_v7 = vadd.f32 %v7945_v14, %v8131_v63  ;;  %v3269_v14 = vadd.f32 %v7963_v20, %v8146_v21  ;;  %v4688_v20 = vmul.f32 -1.442695, %v3272_v9  ;;  %v8187_v4 = vld [vmem:[%s6387_s14 + $0x68] sm:$0xff]  ;;  %v4694_v40 = vmul.f32 -1.442695, %v3278_v17 }
 0x26c   : > { %v3003_v35 = vadd.f32 %v2964_v5, %v2741_v11  ;;  %v3226_v3 = vpop.f32.mrf.mxu0  ;;  %3579 = vrot.lane.b32.xlu0 %v8111_v30, %s6166_s28  ;;  %v8124_v53 = vadd.f32 %v5553_v33, %v3004_v2  ;;  %v4692_v33 = vmul.f32 -1.442695, %v3276_v46  ;;  %v8192_v5 = vld [vmem:[%s6387_s14 + $0x60] sm:$0xff]  ;;  %v3277_v2 = vadd.f32 %v8007_v43, %v8184_v1  ;;  %v8211_v9 = vld [vmem:[%s6387_s14 + $0x88] sm:$0xff]  ;;  %v8224_v46 = vld [vmem:[%s6387_s14 + $0x90] sm:$0xff] }
 0x26d   : > { %v4684_v12 = vmul.f32 -1.442695, %v3268_v7  ;;  %v4685_v54 = vmul.f32 -1.442695, %v3269_v14  ;;  %v3279_v44 = vadd.f32 %v8019_v28, %v8192_v5  ;;  %v3281_v28 = vadd.f32 %v8031_v45, %v8204_v27 }
 0x26e   : > { %v8120_v41 = vadd.f32 %v3226_v3, %v3003_v35  ;;  %3581 = vrot.lane.b32.xlu1 %v8115_v50, %s6166_s28  ;;  %v3280_v3 = vadd.f32 %v8021_v42, %v8187_v4 }
 0x26f   : > { %5699 = vpow2.f32 %v4684_v12  ;;  %v8201_v12 = vld [vmem:[%s6387_s14 + $0x78] sm:$0xff]  ;;  %v4695_v14 = vmul.f32 -1.442695, %v3279_v44  ;;  %v4697_v6 = vmul.f32 -1.442695, %v3281_v28 }
 0x270   : > { %3583 = vrot.lane.b32.xlu0 %v8120_v41, %s6166_s28  ;;  %5701 = vpow2.f32 %v4683_v59  ;;  %v4693_v59 = vmul.f32 -1.442695, %v3277_v2  ;;  %v3282_v42 = vadd.f32 %v8033_v38, %v8201_v12  ;;  %v3284_v38 = vadd.f32 %v8045_v56, %v8211_v9  ;;  %v8236_v2 = vld [vmem:[%s6387_s14 + $0xa0] sm:$0xff] }
 0x271   : > { %5703 = vpow2.f32 %v4686_v8  ;;  %v4696_v8 = vmul.f32 -1.442695, %v3280_v3 }
 0x272   : > { %3585 = vrot.lane.b32.xlu1 %v8124_v53, %s6166_s28  ;;  %5705 = vpow2.f32 %v4685_v54  ;;  %v8214_v54 = vld [vmem:[%s6387_s14 + $0x80] sm:$0xff] }
 0x273   : > { %5707 = vpow2.f32 %v4688_v20  ;;  %v3283_v45 = vadd.f32 %v8041_v26, %v8214_v54  ;;  %v3285_v26 = vadd.f32 %v8053_v25, %v8224_v46 }
 0x274   : > { %5709 = vpow2.f32 %v4687_v18  ;;  %v4698_v18 = vmul.f32 -1.442695, %v3282_v42 }
 0x275   : > { %5711 = vpow2.f32 %v4690_v39 }
 0x276   : > { %5713 = vpow2.f32 %v4689_v34 }
 0x27c   : > { %v5700_v16 = vpop.eup %5699 }
 0x27d   : > { %v5702_v51 = vpop.eup %5701  ;;  %v3396_v0 = vadd.f32 1.0, %v5700_v16  ;;  %v8221_v16 = vld [vmem:[%s6387_s14 + $0x98] sm:$0xff] }
 0x27e   : > { %v5704_v11 = vpop.eup %5703  ;;  %v3395_v35 = vadd.f32 1.0, %v5702_v51  ;;  %v3286_v56 = vadd.f32 %v8057_v49, %v8221_v16 }
 0x27f   : > { %5715 = vrcp.f32 %v3396_v0  ;;  %v3398_v7 = vadd.f32 1.0, %v5704_v11  ;;  %v5706_v43 = vpop.eup %5705  ;;  %v4700_v0 = vmul.f32 -1.442695, %v3284_v38  ;;  %v4699_v11 = vmul.f32 -1.442695, %v3283_v45 }
 0x280   : > { %5717 = vpow2.f32 %v4692_v33  ;;  %v5708_v10 = vpop.eup %5707  ;;  %v3397_v20 = vadd.f32 1.0, %v5706_v43  ;;  %v8231_v33 = vld [vmem:[%s6387_s14 + $0xa8] sm:$0xff]  ;;  %v4702_v49 = vmul.f32 -1.442695, %v3286_v56  ;;  %v3287_v43 = vadd.f32 %v8065_v47, %v8236_v2 }
 0x281   : > { %5719 = vpow2.f32 %v4691_v48  ;;  %v5710_v13 = vpop.eup %5709  ;;  %v3400_v39 = vadd.f32 1.0, %v5708_v10  ;;  %v3288_v44 = vadd.f32 %v8069_v61, %v8231_v33 }
 0x282   : > { %5721 = vrcp.f32 %v3395_v35  ;;  %v5712_v34 = vpop.eup %5711  ;;  %v3399_v24 = vadd.f32 1.0, %v5710_v13  ;;  %v4703_v45 = vmul.f32 -1.442695, %v3287_v43 }
 0x283   : > { %5723 = vrcp.f32 %v3398_v7  ;;  %v5714_v51 = vpop.eup %5713  ;;  %v3402_v48 = vadd.f32 1.0, %v5712_v34  ;;  %v4704_v13 = vmul.f32 -1.442695, %v3288_v44 }
 0x284   : > { %5725 = vpow2.f32 %v4694_v40  ;;  %v3401_v3 = vadd.f32 1.0, %v5714_v51 }
 0x285   : > { %5727 = vpow2.f32 %v4693_v59  ;;  %v4701_v59 = vmul.f32 -1.442695, %v3285_v26  ;;  %v8261_v26 = vld [vmem:[%s6387_s14 + $0xc8] sm:$0xff] }
 0x286   : > { %5729 = vpow2.f32 %v4696_v8 }
 0x287   : > { %5731 = vpow2.f32 %v4695_v14 }
 0x288   : > { %5733 = vrcp.f32 %v3397_v20  ;;  %v8248_v20 = vld [vmem:[%s6387_s14 + $0xb8] sm:$0xff] }
 0x289   : > { %5735 = vpow2.f32 %v4698_v18  ;;  %v8252_v18 = vld [vmem:[%s6387_s14 + $0xb0] sm:$0xff] }
 0x28a   : > { %5737 = vpow2.f32 %v4697_v6 }
 0x28b   : > { %5739 = vrcp.f32 %v3400_v39 }
 0x28c   : > { %v8233_v17 = vpop.eup %5715  ;;  %5741 = vrcp.f32 %v3399_v24 }
 0x28d   : > { %v5718_v35 = vpop.eup %5717  ;;  %5743 = vpow2.f32 %v4700_v0  ;;  %v3290_v0 = vadd.f32 %v8081_v62, %v8248_v20 }
 0x28e   : > { %v5720_v7 = vpop.eup %5719  ;;  %5745 = vpow2.f32 %v4699_v11  ;;  %v3404_v14 = vadd.f32 1.0, %v5718_v35  ;;  %v3289_v11 = vadd.f32 %v8077_v36, %v8252_v18 }
 0x28f   : > { %v8240_v25 = vpop.eup %5721  ;;  %5747 = vrcp.f32 %v3402_v48  ;;  %v3403_v10 = vadd.f32 1.0, %v5720_v7 }
 0x290   : > { %v8245_v42 = vpop.eup %5723  ;;  %5749 = vrcp.f32 %v3401_v3  ;;  %v8268_v3 = vld [vmem:[%s6387_s14 + $0xc0] sm:$0xff] }
 0x291   : > { %v5726_v28 = vpop.eup %5725  ;;  %5751 = vpow2.f32 %v4702_v49 }
 0x292   : > { %v5728_v61 = vpop.eup %5727  ;;  %5753 = vpow2.f32 %v4701_v59  ;;  %v3406_v51 = vadd.f32 1.0, %v5726_v28  ;;  %v3292_v59 = vadd.f32 %v8093_v58, %v8261_v26  ;;  %v3291_v28 = vadd.f32 %v8091_v15, %v8268_v3 }
 0x293   : > { %v5730_v6 = vpop.eup %5729  ;;  %5755 = vrcp.f32 %v3404_v14  ;;  %v3405_v56 = vadd.f32 1.0, %v5728_v61  ;;  %v4705_v14 = vmul.f32 -1.442695, %v3289_v11 }
 0x294   : > { %v5732_v24 = vpop.eup %5731  ;;  %5757 = vrcp.f32 %v3403_v10  ;;  %v3408_v35 = vadd.f32 1.0, %v5730_v6  ;;  %v8278_v10 = vld [vmem:[%s6387_s14 + $0xd8] sm:$0xff] }
 0x295   : > { %v8265_v48 = vpop.eup %5733  ;;  %5759 = vpow2.f32 %v4704_v13  ;;  %v3407_v49 = vadd.f32 1.0, %v5732_v24  ;;  %v3294_v24 = vadd.f32 %v8105_v31, %v8278_v10 }
 0x296   : > { %v5736_v62 = vpop.eup %5735  ;;  %5761 = vpow2.f32 %v4703_v45 }
 0x297   : > { %v5738_v44 = vpop.eup %5737  ;;  %5763 = vrcp.f32 %v3406_v51  ;;  %v3410_v13 = vadd.f32 1.0, %v5736_v62 }
 0x298   : > { %5765 = vrcp.f32 %v3405_v56  ;;  %v3409_v6 = vadd.f32 1.0, %v5738_v44  ;;  %v4707_v56 = vmul.f32 -1.442695, %v3291_v28 }
 0x299   : > { %5767 = vrcp.f32 %v3408_v35  ;;  %v8295_v35 = vld [vmem:[%s6387_s14 + $0xe8] sm:$0xff] }
 0x29a   : > { %5769 = vrcp.f32 %v3407_v49  ;;  %v8302_v49 = vld [vmem:[%s6387_s14 + $0xe0] sm:$0xff] }
 0x2a4   : > { %v3526_v40 = vpop.permute.xlu0 %3525 }
 0x2a5   : > { %v3620_v8 = vmul.f32 %v8233_v17, %v3526_v40  ;;  %v4706_v40 = vmul.f32 -1.442695, %v3290_v0 }
 0x2a7   : > { %3685 = vrot.lane.b32.xlu1 %v3620_v8, %s6167_s30  ;;  %v8273_v8 = vpop.eup %5739  ;;  %5771 = vpow2.f32 %v4706_v40 }
 0x2a8   : > { %v3524_v47 = vpop.permute.xlu0 %3523  ;;  %v3530_v38 = vpop.permute.xlu1 %3529 }
 0x2a9   : > { %v3619_v39 = vmul.f32 %v8240_v25, %v3524_v47  ;;  %v3622_v34 = vmul.f32 %v8245_v42, %v3530_v38  ;;  %v8281_v61 = vpop.eup %5741  ;;  %v8284_v47 = vld [vmem:[%s6387_s14 + $0xd0] sm:$0xff]  ;;  %5773 = vpow2.f32 %v4705_v14  ;;  %v3296_v14 = vadd.f32 %v8115_v50, %v8295_v35 }
 0x2aa   : > { %v5744_v38 = vpop.eup %5743  ;;  %v3293_v11 = vadd.f32 %v8103_v57, %v8284_v47  ;;  %5775 = vrcp.f32 %v3410_v13 }
 0x2ab   : > { %3689 = vrot.lane.b32.xlu1 %v3622_v34, %s6167_s30  ;;  %3683 = vrot.lane.b32.xlu0 %v3619_v39, %s6167_s30  ;;  %v5746_v15 = vpop.eup %5745  ;;  %v4708_v34 = vmul.f32 -1.442695, %v3292_v59  ;;  %v3412_v62 = vadd.f32 1.0, %v5744_v38  ;;  %5777 = vrcp.f32 %v3409_v6  ;;  %v3295_v38 = vadd.f32 %v8111_v30, %v8302_v49  ;;  %v8313_v6 = vld [vmem:[%s6387_s14 + $0xf8] sm:$0xff] }
 0x2ac   : > { %v3528_v7 = vpop.permute.xlu1 %3527  ;;  %v8290_v0 = vpop.eup %5747  ;;  %v3411_v44 = vadd.f32 1.0, %v5746_v15  ;;  %v8320_v15 = vld [vmem:[%s6387_s14 + $0xf0] sm:$0xff] }
 0x2ad   : > { %v3621_v36 = vmul.f32 %v8265_v48, %v3528_v7  ;;  %v8299_v7 = vpop.eup %5749  ;;  %5779 = vpow2.f32 %v4708_v34 }
 0x2ae   : > { %v3532_v43 = vpop.permute.xlu0 %3531  ;;  %5781 = vpow2.f32 %v4707_v56 }
 0x2af   : > { %3687 = vrot.lane.b32.xlu0 %v3621_v36, %s6167_s30  ;;  %v3623_v45 = vmul.f32 %v8281_v61, %v3532_v43  ;;  %v5752_v36 = vpop.eup %5751  ;;  %v4710_v43 = vmul.f32 -1.442695, %v3294_v24  ;;  %5783 = vrcp.f32 %v3412_v62  ;;  %v4711_v62 = vmul.f32 -1.442695, %v3295_v38 }
 0x2b0   : > { %v3534_v58 = vpop.permute.xlu1 %3533  ;;  %v5754_v59 = vpop.eup %5753  ;;  %5785 = vrcp.f32 %v3411_v44 }
 0x2b1   : > { %v3624_v39 = vmul.f32 %v8273_v8, %v3534_v58  ;;  %v8308_v13 = vpop.eup %5755  ;;  %v4709_v58 = vmul.f32 -1.442695, %v3293_v11  ;;  %v3413_v24 = vadd.f32 1.0, %v5754_v59  ;;  %5787 = vpow2.f32 %v4710_v43 }
 0x2b2   : > { %v3536_v51 = vpop.permute.xlu0 %3535  ;;  %v4712_v11 = vmul.f32 -1.442695, %v3296_v14 }
 0x2b3   : > { %3693 = vrot.lane.b32.xlu1 %v3624_v39, %s6167_s30  ;;  %3691 = vrot.lane.b32.xlu0 %v3623_v45, %s6167_s30  ;;  %v3625_v40 = vmul.f32 %v8299_v7, %v3536_v51  ;;  %v8317_v45 = vpop.eup %5757  ;;  %v3414_v39 = vadd.f32 1.0, %v5752_v36  ;;  %5789 = vpow2.f32 %v4709_v58  ;;  %v3297_v36 = vadd.f32 %v8120_v41, %v8320_v15 }
 0x2b4   : > { %v3538_v31 = vpop.permute.xlu1 %3537  ;;  %v5760_v34 = vpop.eup %5759 }
 0x2b5   : > { %v3626_v57 = vmul.f32 %v8290_v0, %v3538_v31  ;;  %v5762_v56 = vpop.eup %5761  ;;  %v3298_v31 = vadd.f32 %v8124_v53, %v8313_v6  ;;  %5791 = vrcp.f32 %v3414_v39  ;;  %v3416_v59 = vadd.f32 1.0, %v5760_v34 }
 0x2b6   : > { %v3540_v28 = vpop.permute.xlu0 %3539  ;;  %5793 = vrcp.f32 %v3413_v24  ;;  %v3415_v53 = vadd.f32 1.0, %v5762_v56 }
 0x2b7   : > { %3697 = vrot.lane.b32.xlu1 %v3626_v57, %s6167_s30  ;;  %3695 = vrot.lane.b32.xlu0 %v3625_v40, %s6167_s30  ;;  %v3627_v51 = vmul.f32 %v8317_v45, %v3540_v28  ;;  %v8326_v40 = vpop.eup %5763  ;;  %5795 = vpow2.f32 %v4712_v11  ;;  %v4714_v41 = vmul.f32 -1.442695, %v3298_v31 }
 0x2b8   : > { %v3542_v50 = vpop.permute.xlu1 %3541  ;;  %v8332_v44 = vpop.eup %5765  ;;  %5797 = vpow2.f32 %v4711_v62 }
 0x2b9   : > { %v3628_v30 = vmul.f32 %v8308_v13, %v3542_v50  ;;  %v8334_v14 = vpop.eup %5767  ;;  %5799 = vrcp.f32 %v3416_v59 }
 0x2ba   : > { %v3544_v57 = vpop.permute.xlu0 %3543  ;;  %v8338_v38 = vpop.eup %5769  ;;  %5801 = vrcp.f32 %v3415_v53 }
 0x2bb   : > { %3701 = vrot.lane.b32.xlu1 %v3628_v30, %s6167_s30  ;;  %3699 = vrot.lane.b32.xlu0 %v3627_v51, %s6167_s30  ;;  %v3629_v28 = vmul.f32 %v8332_v44, %v3544_v57  ;;  %9347 = vst [vmem:[#allocation64_spill] sm:$0xff] %v8338_v38  ;;  %v5772_v50 = vpop.eup %5771  ;;  %v4713_v51 = vmul.f32 -1.442695, %v3297_v36  ;;  %5803 = vpow2.f32 %v4714_v41 }
 0x2bc   : > { %v3546_v43 = vpop.permute.xlu1 %3545  ;;  %v5774_v39 = vpop.eup %5773  ;;  %v3418_v31 = vadd.f32 1.0, %v5772_v50 }
 0x2bd   : > { %v3630_v58 = vmul.f32 %v8326_v40, %v3546_v43  ;;  %v8342_v24 = vpop.eup %5775  ;;  %v3417_v36 = vadd.f32 1.0, %v5774_v39  ;;  %5805 = vpow2.f32 %v4713_v51 }
 0x2be   : > { %v3548_v30 = vpop.permute.xlu0 %3547  ;;  %9348 = vst [vmem:[#allocation65_spill] sm:$0xff] %v8342_v24  ;;  %v8346_v11 = vpop.eup %5777  ;;  %5807 = vrcp.f32 %v3418_v31 }
 0x2bf   : > { %3705 = vrot.lane.b32.xlu1 %v3630_v58, %s6167_s30  ;;  %3703 = vrot.lane.b32.xlu0 %v3629_v28, %s6167_s30  ;;  %v3631_v56 = vmul.f32 %v8338_v38, %v3548_v30  ;;  %9349 = vst [vmem:[#allocation66_spill] sm:$0xff] %v8346_v11  ;;  %v5780_v62 = vpop.eup %5779  ;;  %5809 = vrcp.f32 %v3417_v36 }
 0x2c0   : > { %v3550_v34 = vpop.permute.xlu1 %3549  ;;  %v5782_v59 = vpop.eup %5781  ;;  %v3420_v41 = vadd.f32 1.0, %v5780_v62 }
 0x2c1   : > { %v3632_v57 = vmul.f32 %v8334_v14, %v3550_v34  ;;  %v8350_v58 = vpop.eup %5783  ;;  %v3419_v51 = vadd.f32 1.0, %v5782_v59 }
 0x2c2   : > { %v3552_v43 = vpop.permute.xlu0 %3551  ;;  %9350 = vst [vmem:[#allocation67_spill] sm:$0xff] %v8350_v58  ;;  %v8354_v34 = vpop.eup %5785  ;;  %5811 = vrcp.f32 %v3420_v41 }
 0x2c3   : > { %3709 = vrot.lane.b32.xlu1 %v3632_v57, %s6167_s30  ;;  %3707 = vrot.lane.b32.xlu0 %v3631_v56, %s6167_s30  ;;  %v3633_v53 = vmul.f32 %v8346_v11, %v3552_v43  ;;  %9351 = vst [vmem:[#allocation74_spill] sm:$0xff] %v8354_v34  ;;  %v5788_v50 = vpop.eup %5787  ;;  %5813 = vrcp.f32 %v3419_v51 }
 0x2c4   : > { %v3554_v28 = vpop.permute.xlu1 %3553  ;;  %v5790_v56 = vpop.eup %5789  ;;  %v3422_v31 = vadd.f32 1.0, %v5788_v50 }
 0x2c5   : > { %v3634_v30 = vmul.f32 %v8342_v24, %v3554_v28  ;;  %v8358_v38 = vpop.eup %5791  ;;  %v3421_v36 = vadd.f32 1.0, %v5790_v56 }
 0x2c6   : > { %v3556_v39 = vpop.permute.xlu0 %3555  ;;  %v8362_v11 = vpop.eup %5793  ;;  %5815 = vrcp.f32 %v3422_v31 }
 0x2c7   : > { %3713 = vrot.lane.b32.xlu1 %v3634_v30, %s6167_s30  ;;  %3711 = vrot.lane.b32.xlu0 %v3633_v53, %s6167_s30  ;;  %v3635_v43 = vmul.f32 %v8354_v34, %v3556_v39  ;;  %9352 = vst [vmem:[#allocation57_spill] sm:$0xff] %v8362_v11  ;;  %v5796_v62 = vpop.eup %5795  ;;  %5817 = vrcp.f32 %v3421_v36 }
 0x2c8   : > { %v3558_v57 = vpop.permute.xlu1 %3557  ;;  %v5798_v53 = vpop.eup %5797  ;;  %v3424_v41 = vadd.f32 1.0, %v5796_v62 }
 0x2c9   : > { %v3636_v28 = vmul.f32 %v8350_v58, %v3558_v57  ;;  %v8366_v24 = vpop.eup %5799  ;;  %v3423_v51 = vadd.f32 1.0, %v5798_v53 }
 0x2ca   : > { %v3560_v59 = vpop.permute.xlu0 %3559  ;;  %v8370_v34 = vpop.eup %5801  ;;  %5819 = vrcp.f32 %v3424_v41 }
 0x2cb   : > { %3717 = vrot.lane.b32.xlu1 %v3636_v28, %s6167_s30  ;;  %3715 = vrot.lane.b32.xlu0 %v3635_v43, %s6167_s30  ;;  %v3637_v39 = vmul.f32 %v8362_v11, %v3560_v59  ;;  %v5804_v50 = vpop.eup %5803  ;;  %5821 = vrcp.f32 %v3423_v51 }
 0x2cc   : > { %v3562_v30 = vpop.permute.xlu1 %3561  ;;  %v5806_v43 = vpop.eup %5805 }
 0x2cd   : > { %v3638_v57 = vmul.f32 %v8358_v38, %v3562_v30  ;;  %v3426_v30 = vadd.f32 1.0, %v5804_v50  ;;  %v8376_v11 = vpop.eup %5807  ;;  %v3425_v31 = vadd.f32 1.0, %v5806_v43 }
 0x2ce   : > { %v3564_v56 = vpop.permute.xlu0 %3563  ;;  %v8380_v36 = vpop.eup %5809 }
 0x2cf   : > { %3721 = vrot.lane.b32.xlu1 %v3638_v57, %s6167_s30  ;;  %3719 = vrot.lane.b32.xlu0 %v3637_v39, %s6167_s30  ;;  %v3639_v58 = vmul.f32 %v8370_v34, %v3564_v56  ;;  %5823 = vrcp.f32 %v3426_v30  ;;  %v8384_v56 = vpop.eup %5811 }
 0x2d0   : > { %v3566_v28 = vpop.permute.xlu1 %3565  ;;  %9353 = vst [vmem:[#allocation26_spill] sm:$0xff] %v8384_v56  ;;  %5825 = vrcp.f32 %v3425_v31  ;;  %v8388_v50 = vpop.eup %5813 }
 0x2d1   : > { %v3640_v59 = vmul.f32 %v8366_v24, %v3566_v28  ;;  %9354 = vst [vmem:[#allocation25_spill] sm:$0xff] %v8388_v50 }
 0x2d2   : > { %v3568_v62 = vpop.permute.xlu0 %3567 }
 0x2d3   : > { %3725 = vrot.lane.b32.xlu1 %v3640_v59, %s6167_s30  ;;  %3723 = vrot.lane.b32.xlu0 %v3639_v58, %s6167_s30  ;;  %v3641_v39 = vmul.f32 %v8380_v36, %v3568_v62  ;;  %v8392_v28 = vpop.eup %5815 }
 0x2d4   : > { %v3570_v53 = vpop.permute.xlu1 %3569  ;;  %v8396_v30 = vpop.eup %5817 }
 0x2d5   : > { %v3642_v57 = vmul.f32 %v8376_v11, %v3570_v53  ;;  %9355 = vst [vmem:[#allocation68_spill] sm:$0xff] %v8396_v30 }
 0x2d6   : > { %v3572_v41 = vpop.permute.xlu0 %3571 }
 0x2d7   : > { %3729 = vrot.lane.b32.xlu1 %v3642_v57, %s6167_s30  ;;  %3727 = vrot.lane.b32.xlu0 %v3641_v39, %s6167_s30  ;;  %v3643_v58 = vmul.f32 %v8388_v50, %v3572_v41  ;;  %v8400_v39 = vpop.eup %5819 }
 0x2d8   : > { %v3574_v51 = vpop.permute.xlu1 %3573  ;;  %9356 = vst [vmem:[#allocation27_spill] sm:$0xff] %v8400_v39  ;;  %v8404_v41 = vpop.eup %5821 }
 0x2d9   : > { %v3644_v43 = vmul.f32 %v8384_v56, %v3574_v51  ;;  %9357 = vst [vmem:[#allocation69_spill] sm:$0xff] %v8404_v41 }
 0x2da   : > { %v3576_v59 = vpop.permute.xlu0 %3575 }
 0x2db   : > { %3733 = vrot.lane.b32.xlu1 %v3644_v43, %s6167_s30  ;;  %3731 = vrot.lane.b32.xlu0 %v3643_v58, %s6167_s30  ;;  %v3645_v62 = vmul.f32 %v8396_v30, %v3576_v59 }
 0x2dc   : > { %v3578_v31 = vpop.permute.xlu1 %3577  ;;  %v8408_v50 = vpop.eup %5823 }
 0x2dd   : > { %v3646_v53 = vmul.f32 %v8392_v28, %v3578_v31  ;;  %v8412_v59 = vpop.eup %5825 }
 0x2de   : > { %v3580_v57 = vpop.permute.xlu0 %3579  ;;  %9358 = vst [vmem:[#allocation28_spill] sm:$0xff] %v8412_v59 }
 0x2df   : > { %3737 = vrot.lane.b32.xlu1 %v3646_v53, %s6167_s30  ;;  %3735 = vrot.lane.b32.xlu0 %v3645_v62, %s6167_s30  ;;  %v3647_v43 = vmul.f32 %v8404_v41, %v3580_v57 }
 0x2e0   : > { %v3582_v51 = vpop.permute.xlu1 %3581 }
 0x2e1   : > { %v3648_v58 = vmul.f32 %v8400_v39, %v3582_v51 }
 0x2e2   : > { %v3584_v56 = vpop.permute.xlu0 %3583 }
 0x2e3   : > { %3741 = vrot.lane.b32.xlu1 %v3648_v58, %s6167_s30  ;;  %3739 = vrot.lane.b32.xlu0 %v3647_v43, %s6167_s30  ;;  %v3649_v53 = vmul.f32 %v8412_v59, %v3584_v56 }
 0x2e4   : > { %v3586_v31 = vpop.permute.xlu1 %3585 }
 0x2e5   : > { %v3650_v62 = vmul.f32 %v8408_v50, %v3586_v31 }
 0x2e7   : > { %3745 = vrot.lane.b32.xlu1 %v3650_v62, %s6167_s30  ;;  %3743 = vrot.lane.b32.xlu0 %v3649_v53, %s6167_s30 }
 0x319   : > { %v3686_v57 = vpop.permute.xlu1 %3685 }
 0x31a   : > { %v3780_v51 = vadd.f32 %v3686_v57, %v8131_v63 }
 0x31c   : > { %5827 = vtanh.f32 %v3780_v51 }
 0x31d   : > { %v3690_v41 = vpop.permute.xlu1 %3689  ;;  %v3684_v39 = vpop.permute.xlu0 %3683 }
 0x31e   : > { %v3782_v58 = vadd.f32 %v3690_v41, %v8139_v19  ;;  %v3779_v43 = vadd.f32 %v3684_v39, %v8136_v37 }
 0x320   : > { %5829 = vtanh.f32 %v3782_v58 }
 0x321   : > { %5831 = vtanh.f32 %v3779_v43  ;;  %v3688_v30 = vpop.permute.xlu0 %3687 }
 0x322   : > { %v3781_v56 = vadd.f32 %v3688_v30, %v8146_v21 }
 0x324   : > { %5833 = vtanh.f32 %v3781_v56 }
 0x325   : > { %v3694_v31 = vpop.permute.xlu1 %3693  ;;  %v3692_v62 = vpop.permute.xlu0 %3691 }
 0x326   : > { %v3784_v53 = vadd.f32 %v3694_v31, %v8151_v23  ;;  %v3783_v59 = vadd.f32 %v3692_v62, %v8154_v29 }
 0x328   : > { %5835 = vtanh.f32 %v3784_v53 }
 0x329   : > { %v5828_v63 = vpop.eup %5827  ;;  %5837 = vtanh.f32 %v3783_v59  ;;  %v3698_v57 = vpop.permute.xlu1 %3697 }
 0x32a   : > { %v3696_v51 = vpop.permute.xlu0 %3695  ;;  %v3786_v19 = vadd.f32 %v3698_v57, %v8161_v22  ;;  %3909 = vrot.lane.b32.xlu1 %v5828_v63, %s6168_s29 }
 0x32b   : > { %v3785_v37 = vadd.f32 %v3696_v51, %v8164_v32 }
 0x32c   : > { %5839 = vtanh.f32 %v3786_v19 }
 0x32d   : > { %v5830_v21 = vpop.eup %5829  ;;  %5841 = vtanh.f32 %v3785_v37  ;;  %v3702_v30 = vpop.permute.xlu1 %3701 }
 0x32e   : > { %v3700_v39 = vpop.permute.xlu0 %3699  ;;  %v5832_v23 = vpop.eup %5831  ;;  %v3788_v29 = vadd.f32 %v3702_v30, %v8171_v55  ;;  %3913 = vrot.lane.b32.xlu1 %v5830_v21, %s6168_s29 }
 0x32f   : > { %v3787_v41 = vadd.f32 %v3700_v39, %v8174_v52  ;;  %3907 = vrot.lane.b32.xlu0 %v5832_v23, %s6168_s29 }
 0x330   : > { %5843 = vtanh.f32 %v3788_v29 }
 0x331   : > { %v5834_v22 = vpop.eup %5833  ;;  %5845 = vtanh.f32 %v3787_v41  ;;  %v3706_v32 = vpop.permute.xlu1 %3705 }
 0x332   : > { %v3704_v59 = vpop.permute.xlu0 %3703  ;;  %v3790_v58 = vadd.f32 %v3706_v32, %v8181_v60 }
 0x333   : > { %v3789_v43 = vadd.f32 %v3704_v59, %v8184_v1  ;;  %3911 = vrot.lane.b32.xlu0 %v5834_v22, %s6168_s29 }
 0x334   : > { %5847 = vtanh.f32 %v3790_v58 }
 0x335   : > { %v5836_v56 = vpop.eup %5835  ;;  %5849 = vtanh.f32 %v3789_v43  ;;  %v3710_v55 = vpop.permute.xlu1 %3709 }
 0x336   : > { %v3708_v52 = vpop.permute.xlu0 %3707  ;;  %v5838_v31 = vpop.eup %5837  ;;  %v3792_v62 = vadd.f32 %v3710_v55, %v8187_v4  ;;  %3917 = vrot.lane.b32.xlu1 %v5836_v56, %s6168_s29 }
 0x337   : > { %v3791_v53 = vadd.f32 %v3708_v52, %v8192_v5  ;;  %3915 = vrot.lane.b32.xlu0 %v5838_v31, %s6168_s29 }
 0x338   : > { %5851 = vtanh.f32 %v3792_v62 }
 0x339   : > { %v5840_v60 = vpop.eup %5839  ;;  %5853 = vtanh.f32 %v3791_v53  ;;  %v3714_v1 = vpop.permute.xlu1 %3713 }
 0x33a   : > { %v3712_v63 = vpop.permute.xlu0 %3711  ;;  %v5842_v57 = vpop.eup %5841  ;;  %v3794_v51 = vadd.f32 %v3714_v1, %v8201_v12  ;;  %3921 = vrot.lane.b32.xlu1 %v5840_v60, %s6168_s29 }
 0x33b   : > { %v3793_v19 = vadd.f32 %v3712_v63, %v8204_v27  ;;  %3919 = vrot.lane.b32.xlu0 %v5842_v57, %s6168_s29 }
 0x33c   : > { %5855 = vtanh.f32 %v3794_v51 }
 0x33d   : > { %v5844_v4 = vpop.eup %5843  ;;  %5857 = vtanh.f32 %v3793_v19  ;;  %v3718_v5 = vpop.permute.xlu1 %3717 }
 0x33e   : > { %v3716_v37 = vpop.permute.xlu0 %3715  ;;  %v5846_v21 = vpop.eup %5845  ;;  %v3796_v30 = vadd.f32 %v3718_v5, %v8211_v9  ;;  %3925 = vrot.lane.b32.xlu1 %v5844_v4, %s6168_s29 }
 0x33f   : > { %v3795_v39 = vadd.f32 %v3716_v37, %v8214_v54  ;;  %3923 = vrot.lane.b32.xlu0 %v5846_v21, %s6168_s29 }
 0x340   : > { %5859 = vtanh.f32 %v3796_v30 }
 0x341   : > { %v5848_v12 = vpop.eup %5847  ;;  %5861 = vtanh.f32 %v3795_v39  ;;  %v3722_v27 = vpop.permute.xlu1 %3721 }
 0x342   : > { %v3720_v23 = vpop.permute.xlu0 %3719  ;;  %v5850_v29 = vpop.eup %5849  ;;  %v3798_v41 = vadd.f32 %v3722_v27, %v8221_v16  ;;  %3929 = vrot.lane.b32.xlu1 %v5848_v12, %s6168_s29 }
 0x343   : > { %v3797_v22 = vadd.f32 %v3720_v23, %v8224_v46  ;;  %3927 = vrot.lane.b32.xlu0 %v5850_v29, %s6168_s29 }
 0x344   : > { %5863 = vtanh.f32 %v3798_v41 }
 0x345   : > { %v5852_v9 = vpop.eup %5851  ;;  %5865 = vtanh.f32 %v3797_v22  ;;  %v3726_v54 = vpop.permute.xlu1 %3725 }
 0x346   : > { %v3724_v32 = vpop.permute.xlu0 %3723  ;;  %v5854_v59 = vpop.eup %5853  ;;  %v3800_v58 = vadd.f32 %v3726_v54, %v8231_v33  ;;  %3933 = vrot.lane.b32.xlu1 %v5852_v9, %s6168_s29  ;;  %v3844_v9 = vsub.f32 1.0, %v8233_v17 }
 0x347   : > { %v3799_v43 = vadd.f32 %v3724_v32, %v8236_v2  ;;  %3931 = vrot.lane.b32.xlu0 %v5854_v59, %s6168_s29  ;;  %v5891_v32 = vld [vmem:[#allocation2 + $0x8] sm:$0xff] }
 0x348   : > { %5867 = vtanh.f32 %v3800_v58  ;;  %v4036_v59 = vmul.f32 %v5891_v32, %v8233_v17 }
 0x349   : > { %v5856_v16 = vpop.eup %5855  ;;  %5869 = vtanh.f32 %v3799_v43  ;;  %v3730_v46 = vpop.permute.xlu1 %3729 }
 0x34a   : > { %v3728_v56 = vpop.permute.xlu0 %3727  ;;  %v5858_v55 = vpop.eup %5857  ;;  %v3802_v52 = vadd.f32 %v3730_v46, %v8248_v20  ;;  %3937 = vrot.lane.b32.xlu1 %v5856_v16, %s6168_s29  ;;  %v3846_v16 = vsub.f32 1.0, %v8245_v42 }
 0x34b   : > { %v3801_v31 = vadd.f32 %v3728_v56, %v8252_v18  ;;  %3935 = vrot.lane.b32.xlu0 %v5858_v55, %s6168_s29  ;;  %v3843_v56 = vsub.f32 1.0, %v8240_v25  ;;  %v5892_v55 = vld [vmem:[#allocation2 + $0x18] sm:$0xff] }
 0x34c   : > { %5871 = vtanh.f32 %v3802_v52  ;;  %v4038_v52 = vmul.f32 %v5892_v55, %v8245_v42 }
 0x34d   : > { %v5860_v33 = vpop.eup %5859  ;;  %5873 = vtanh.f32 %v3801_v31  ;;  %v3734_v2 = vpop.permute.xlu1 %3733 }
 0x34e   : > { %v3732_v62 = vpop.permute.xlu0 %3731  ;;  %v5862_v53 = vpop.eup %5861  ;;  %v3804_v60 = vadd.f32 %v3734_v2, %v8261_v26  ;;  %3941 = vrot.lane.b32.xlu1 %v5860_v33, %s6168_s29  ;;  %v5893_v33 = vld [vmem:[#allocation2] sm:$0xff] }
 0x34f   : > { %v3803_v1 = vadd.f32 %v3732_v62, %v8268_v3  ;;  %3939 = vrot.lane.b32.xlu0 %v5862_v53, %s6168_s29  ;;  %v4035_v2 = vmul.f32 %v5893_v33, %v8240_v25  ;;  %v5894_v25 = vld [vmem:[#allocation2 + $0x10] sm:$0xff] }
 0x350   : > { %5875 = vtanh.f32 %v3804_v60 }
 0x351   : > { %v5864_v20 = vpop.eup %5863  ;;  %5877 = vtanh.f32 %v3803_v1  ;;  %v3738_v18 = vpop.permute.xlu1 %3737  ;;  %v3845_v1 = vsub.f32 1.0, %v8265_v48 }
 0x352   : > { %v3736_v63 = vpop.permute.xlu0 %3735  ;;  %v5866_v57 = vpop.eup %5865  ;;  %v3806_v51 = vadd.f32 %v3738_v18, %v8278_v10  ;;  %3945 = vrot.lane.b32.xlu1 %v5864_v20, %s6168_s29  ;;  %v4037_v20 = vmul.f32 %v5894_v25, %v8265_v48  ;;  %v5896_v48 = vld [vmem:[#allocation2 + $0x20] sm:$0xff]  ;;  %v3856_v25 = vsub.f32 1.0, %v8334_v14 }
 0x353   : > { %v3805_v19 = vadd.f32 %v3736_v63, %v8284_v47  ;;  %3943 = vrot.lane.b32.xlu0 %v5866_v57, %s6168_s29  ;;  %v3848_v63 = vsub.f32 1.0, %v8273_v8 }
 0x354   : > { %5879 = vtanh.f32 %v3806_v51 }
 0x355   : > { %v5868_v26 = vpop.eup %5867  ;;  %5881 = vtanh.f32 %v3805_v19  ;;  %v3742_v3 = vpop.permute.xlu1 %3741  ;;  %v3847_v19 = vsub.f32 1.0, %v8281_v61 }
 0x356   : > { %v3740_v4 = vpop.permute.xlu0 %3739  ;;  %v5870_v5 = vpop.eup %5869  ;;  %v3808_v37 = vadd.f32 %v3742_v3, %v8295_v35  ;;  %3949 = vrot.lane.b32.xlu1 %v5868_v26, %s6168_s29  ;;  %v5895_v26 = vld [vmem:[#allocation2 + $0x28] sm:$0xff] }
 0x357   : > { %v3807_v21 = vadd.f32 %v3740_v4, %v8302_v49  ;;  %3947 = vrot.lane.b32.xlu0 %v5870_v5, %s6168_s29  ;;  %v4040_v3 = vmul.f32 %v5895_v26, %v8273_v8 }
 0x358   : > { %5883 = vtanh.f32 %v3808_v37  ;;  %v4039_v37 = vmul.f32 %v5896_v48, %v8281_v61 }
 0x359   : > { %v5872_v10 = vpop.eup %5871  ;;  %5885 = vtanh.f32 %v3807_v21  ;;  %v3746_v47 = vpop.permute.xlu1 %3745 }
 0x35a   : > { %v3744_v30 = vpop.permute.xlu0 %3743  ;;  %v5874_v39 = vpop.eup %5873  ;;  %v3810_v12 = vadd.f32 %v3746_v47, %v8313_v6  ;;  %3953 = vrot.lane.b32.xlu1 %v5872_v10, %s6168_s29  ;;  %v3850_v47 = vsub.f32 1.0, %v8290_v0 }
 0x35b   : > { %v3809_v27 = vadd.f32 %v3744_v30, %v8320_v15  ;;  %3951 = vrot.lane.b32.xlu0 %v5874_v39, %s6168_s29  ;;  %v3849_v39 = vsub.f32 1.0, %v8299_v7 }
 0x35c   : > { %5887 = vtanh.f32 %v3810_v12  ;;  %v5897_v12 = vld [vmem:[#allocation2 + $0x38] sm:$0xff] }
 0x35d   : > { %v5876_v35 = vpop.eup %5875  ;;  %5889 = vtanh.f32 %v3809_v27  ;;  %v4042_v61 = vmul.f32 %v5897_v12, %v8290_v0  ;;  %v5905_v12 = vld [vmem:[#allocation2 + $0x78] sm:$0xff] }
 0x35e   : > { %v5878_v49 = vpop.eup %5877  ;;  %3957 = vrot.lane.b32.xlu1 %v5876_v35, %s6168_s29 }
 0x35f   : > { %3955 = vrot.lane.b32.xlu0 %v5878_v49, %s6168_s29  ;;  %v5898_v49 = vld [vmem:[#allocation2 + $0x30] sm:$0xff] }
 0x361   : > { %v5880_v23 = vpop.eup %5879 }
 0x362   : > { %v5882_v29 = vpop.eup %5881  ;;  %3961 = vrot.lane.b32.xlu1 %v5880_v23, %s6168_s29  ;;  %v4041_v23 = vmul.f32 %v5898_v49, %v8299_v7  ;;  %v5906_v49 = vld [vmem:[#allocation2 + $0x70] sm:$0xff] }
 0x363   : > { %3959 = vrot.lane.b32.xlu0 %v5882_v29, %s6168_s29 }
 0x365   : > { %v5884_v6 = vpop.eup %5883 }
 0x366   : > { %v5886_v15 = vpop.eup %5885  ;;  %3965 = vrot.lane.b32.xlu1 %v5884_v6, %s6168_s29 }
 0x367   : > { %3963 = vrot.lane.b32.xlu0 %v5886_v15, %s6168_s29  ;;  %v3852_v15 = vsub.f32 1.0, %v8308_v13 }
 0x369   : > { %v5888_v41 = vpop.eup %5887 }
 0x36a   : > { %v5890_v22 = vpop.eup %5889  ;;  %3969 = vrot.lane.b32.xlu1 %v5888_v41, %s6168_s29 }
 0x36b   : > { %3967 = vrot.lane.b32.xlu0 %v5890_v22, %s6168_s29  ;;  %v3851_v22 = vsub.f32 1.0, %v8317_v45 }
 0x39c   : > { %v3910_v54 = vpop.permute.xlu1 %3909 }
 0x39d   : > { %v4004_v58 = vmul.f32 %v3910_v54, %v3844_v9  ;;  %v5899_v9 = vld [vmem:[#allocation2 + $0x48] sm:$0xff] }
 0x39e   : > { %v4044_v7 = vmul.f32 %v5899_v9, %v8308_v13 }
 0x39f   : > { %v8484_v43 = vadd.f32 %v4036_v59, %v4004_v58  ;;  %v5900_v59 = vld [vmem:[#allocation2 + $0x40] sm:$0xff] }
 0x3a0   : > { %v3914_v46 = vpop.permute.xlu1 %3913  ;;  %v4043_v58 = vmul.f32 %v5900_v59, %v8317_v45  ;;  %v5907_v59 = vld [vmem:[#allocation2 + $0x88] sm:$0xff] }
 0x3a1   : > { %4100 = vst.msk [vmem:[#allocation2 + $0x8] sm:$0xff] %vm535_vm2, %v8484_v43  ;;  %4132 = vst.msk [vmem:[%s6400_s9 + $0x8] sm:$0xff] %vm535_vm2, %v8484_v43  ;;  %v4006_v17 = vmul.f32 %v3914_v46, %v3846_v16  ;;  %v3908_v31 = vpop.permute.xlu0 %3907 }
 0x3a2   : > { %v4003_v62 = vmul.f32 %v3908_v31, %v3843_v56  ;;  %v3854_v56 = vsub.f32 1.0, %v8326_v40 }
 0x3a3   : > { %v8495_v53 = vadd.f32 %v4038_v52, %v4006_v17  ;;  %v3853_v52 = vsub.f32 1.0, %v8332_v44  ;;  %v5901_v17 = vld [vmem:[#allocation2 + $0x58] sm:$0xff] }
 0x3a4   : > { %v8497_v60 = vadd.f32 %v4035_v2, %v4003_v62  ;;  %v4046_v45 = vmul.f32 %v5901_v17, %v8326_v40  ;;  %v5902_v2 = vld [vmem:[#allocation2 + $0x50] sm:$0xff] }
 0x3a5   : > { %4102 = vst.msk [vmem:[#allocation2 + $0x18] sm:$0xff] %vm535_vm2, %v8495_v53  ;;  %4134 = vst.msk [vmem:[%s6400_s9 + $0x18] sm:$0xff] %vm535_vm2, %v8495_v53  ;;  %v3912_v42 = vpop.permute.xlu0 %3911  ;;  %v4045_v62 = vmul.f32 %v5902_v2, %v8332_v44 }
 0x3a6   : > { %4099 = vst.msk [vmem:[#allocation2] sm:$0xff] %vm535_vm2, %v8497_v60  ;;  %4131 = vst.msk [vmem:[%s6400_s9] sm:$0xff] %vm535_vm2, %v8497_v60  ;;  %v4005_v18 = vmul.f32 %v3912_v42, %v3845_v1 }
 0x3a8   : > { %v8512_v57 = vadd.f32 %v4037_v20, %v4005_v18  ;;  %v3918_v51 = vpop.permute.xlu1 %3917  ;;  %v9359_v18 = vld [vmem:[#allocation64_spill] sm:$0xff] }
 0x3a9   : > { %v4008_v4 = vmul.f32 %v3918_v51, %v3848_v63  ;;  %v3916_v5 = vpop.permute.xlu0 %3915  ;;  %v3855_v63 = vsub.f32 1.0, %v9359_v18  ;;  %v5903_v51 = vld [vmem:[#allocation2 + $0x68] sm:$0xff] }
 0x3aa   : > { %4101 = vst.msk [vmem:[#allocation2 + $0x10] sm:$0xff] %vm535_vm2, %v8512_v57  ;;  %4133 = vst.msk [vmem:[%s6400_s9 + $0x10] sm:$0xff] %vm535_vm2, %v8512_v57  ;;  %v4007_v21 = vmul.f32 %v3916_v5, %v3847_v19  ;;  %v4048_v44 = vmul.f32 %v5903_v51, %v8334_v14  ;;  %v5910_v51 = vld [vmem:[#allocation2 + $0x90] sm:$0xff] }
 0x3ab   : > { %v8522_v10 = vadd.f32 %v4040_v3, %v4008_v4  ;;  %v5904_v3 = vld [vmem:[#allocation2 + $0x60] sm:$0xff] }
 0x3ac   : > { %v8525_v30 = vadd.f32 %v4039_v37, %v4007_v21  ;;  %v3922_v8 = vpop.permute.xlu1 %3921  ;;  %v4047_v4 = vmul.f32 %v5904_v3, %v9359_v18  ;;  %v9360_v37 = vld [vmem:[#allocation65_spill] sm:$0xff]  ;;  %v3864_v3 = vsub.f32 1.0, %v8366_v24 }
 0x3ad   : > { %4104 = vst.msk [vmem:[#allocation2 + $0x28] sm:$0xff] %vm535_vm2, %v8522_v10  ;;  %4136 = vst.msk [vmem:[%s6400_s9 + $0x28] sm:$0xff] %vm535_vm2, %v8522_v10  ;;  %v4010_v27 = vmul.f32 %v3922_v8, %v3850_v47  ;;  %v3920_v35 = vpop.permute.xlu0 %3919  ;;  %v3858_v21 = vsub.f32 1.0, %v9360_v37  ;;  %v9361_v8 = vld [vmem:[#allocation66_spill] sm:$0xff] }
 0x3ae   : > { %4103 = vst.msk [vmem:[#allocation2 + $0x20] sm:$0xff] %vm535_vm2, %v8525_v30  ;;  %4135 = vst.msk [vmem:[%s6400_s9 + $0x20] sm:$0xff] %vm535_vm2, %v8525_v30  ;;  %v4009_v29 = vmul.f32 %v3920_v35, %v3849_v39  ;;  %v3857_v39 = vsub.f32 1.0, %v9361_v8 }
 0x3af   : > { %v8540_v6 = vadd.f32 %v4042_v61, %v4010_v27  ;;  %v4050_v61 = vmul.f32 %v5905_v12, %v9360_v37  ;;  %v5911_v37 = vld [vmem:[#allocation2 + $0xa8] sm:$0xff] }
 0x3b0   : > { %v8543_v41 = vadd.f32 %v4041_v23, %v4009_v29  ;;  %v3926_v0 = vpop.permute.xlu1 %3925  ;;  %v4049_v23 = vmul.f32 %v5906_v49, %v9361_v8 }
 0x3b1   : > { %4106 = vst.msk [vmem:[#allocation2 + $0x38] sm:$0xff] %vm535_vm2, %v8540_v6  ;;  %4138 = vst.msk [vmem:[%s6400_s9 + $0x38] sm:$0xff] %vm535_vm2, %v8540_v6  ;;  %v4012_v54 = vmul.f32 %v3926_v0, %v3852_v15  ;;  %v3924_v32 = vpop.permute.xlu0 %3923  ;;  %v9362_v0 = vld [vmem:[#allocation67_spill] sm:$0xff] }
 0x3b2   : > { %4105 = vst.msk [vmem:[#allocation2 + $0x30] sm:$0xff] %vm535_vm2, %v8543_v41  ;;  %4137 = vst.msk [vmem:[%s6400_s9 + $0x30] sm:$0xff] %vm535_vm2, %v8543_v41  ;;  %v4011_v16 = vmul.f32 %v3924_v32, %v3851_v22  ;;  %v3860_v22 = vsub.f32 1.0, %v9362_v0 }
 0x3b3   : > { %v8558_v46 = vadd.f32 %v4044_v7, %v4012_v54  ;;  %v9363_v54 = vld [vmem:[#allocation74_spill] sm:$0xff] }
 0x3b4   : > { %v8561_v55 = vadd.f32 %v4043_v58, %v4011_v16  ;;  %v3930_v13 = vpop.permute.xlu1 %3929  ;;  %v3859_v32 = vsub.f32 1.0, %v9363_v54  ;;  %v4052_v58 = vmul.f32 %v5907_v59, %v9362_v0 }
 0x3b5   : > { %4108 = vst.msk [vmem:[#allocation2 + $0x48] sm:$0xff] %vm535_vm2, %v8558_v46  ;;  %4140 = vst.msk [vmem:[%s6400_s9 + $0x48] sm:$0xff] %vm535_vm2, %v8558_v46  ;;  %v4014_v31 = vmul.f32 %v3930_v13, %v3854_v56  ;;  %v3928_v33 = vpop.permute.xlu0 %3927  ;;  %v5908_v13 = vld [vmem:[#allocation2 + $0x80] sm:$0xff] }
 0x3b6   : > { %4107 = vst.msk [vmem:[#allocation2 + $0x40] sm:$0xff] %vm535_vm2, %v8561_v55  ;;  %4139 = vst.msk [vmem:[%s6400_s9 + $0x40] sm:$0xff] %vm535_vm2, %v8561_v55  ;;  %v4013_v1 = vmul.f32 %v3928_v33, %v3853_v52  ;;  %v4051_v52 = vmul.f32 %v5908_v13, %v9363_v54  ;;  %v9366_v13 = vld [vmem:[#allocation25_spill] sm:$0xff] }
 0x3b7   : > { %v8576_v42 = vadd.f32 %v4046_v45, %v4014_v31  ;;  %v3862_v31 = vsub.f32 1.0, %v8358_v38 }
 0x3b8   : > { %v8579_v20 = vadd.f32 %v4045_v62, %v4013_v1  ;;  %v3934_v40 = vpop.permute.xlu1 %3933  ;;  %v9364_v62 = vld [vmem:[#allocation57_spill] sm:$0xff] }
 0x3b9   : > { %4110 = vst.msk [vmem:[#allocation2 + $0x58] sm:$0xff] %vm535_vm2, %v8576_v42  ;;  %4142 = vst.msk [vmem:[%s6400_s9 + $0x58] sm:$0xff] %vm535_vm2, %v8576_v42  ;;  %v4016_v19 = vmul.f32 %v3934_v40, %v3856_v25  ;;  %v3932_v26 = vpop.permute.xlu0 %3931  ;;  %v3861_v1 = vsub.f32 1.0, %v9364_v62  ;;  %v5909_v25 = vld [vmem:[#allocation2 + $0x98] sm:$0xff] }
 0x3ba   : > { %4109 = vst.msk [vmem:[#allocation2 + $0x50] sm:$0xff] %vm535_vm2, %v8579_v20  ;;  %4141 = vst.msk [vmem:[%s6400_s9 + $0x50] sm:$0xff] %vm535_vm2, %v8579_v20  ;;  %v4015_v5 = vmul.f32 %v3932_v26, %v3855_v63  ;;  %v4054_v40 = vmul.f32 %v5909_v25, %v8358_v38 }
 0x3bb   : > { %v8594_v48 = vadd.f32 %v4048_v44, %v4016_v19  ;;  %v4053_v44 = vmul.f32 %v5910_v51, %v9364_v62  ;;  %v5916_v62 = vld [vmem:[#allocation2 + $0xc0] sm:$0xff] }
 0x3bc   : > { %v8597_v47 = vadd.f32 %v4047_v4, %v4015_v5  ;;  %v3938_v14 = vpop.permute.xlu1 %3937  ;;  %v3863_v5 = vsub.f32 1.0, %v8370_v34 }
 0x3bd   : > { %4112 = vst.msk [vmem:[#allocation2 + $0x68] sm:$0xff] %vm535_vm2, %v8594_v48  ;;  %4144 = vst.msk [vmem:[%s6400_s9 + $0x68] sm:$0xff] %vm535_vm2, %v8594_v48  ;;  %v4018_v27 = vmul.f32 %v3938_v14, %v3858_v21  ;;  %v3936_v35 = vpop.permute.xlu0 %3935  ;;  %v4056_v21 = vmul.f32 %v5911_v37, %v8366_v24 }
 0x3be   : > { %4111 = vst.msk [vmem:[#allocation2 + $0x60] sm:$0xff] %vm535_vm2, %v8597_v47  ;;  %4143 = vst.msk [vmem:[%s6400_s9 + $0x60] sm:$0xff] %vm535_vm2, %v8597_v47  ;;  %v4017_v29 = vmul.f32 %v3936_v35, %v3857_v39  ;;  %v5912_v39 = vld [vmem:[#allocation2 + $0xa0] sm:$0xff]  ;;  %v3866_v35 = vsub.f32 1.0, %v8376_v11 }
 0x3bf   : > { %v8612_v15 = vadd.f32 %v4050_v61, %v4018_v27  ;;  %v4055_v12 = vmul.f32 %v5912_v39, %v8370_v34 }
 0x3c0   : > { %v8615_v9 = vadd.f32 %v4049_v23, %v4017_v29  ;;  %v3942_v7 = vpop.permute.xlu1 %3941  ;;  %v3865_v23 = vsub.f32 1.0, %v8380_v36  ;;  %v5913_v29 = vld [vmem:[#allocation2 + $0xb8] sm:$0xff] }
 0x3c1   : > { %4114 = vst.msk [vmem:[#allocation2 + $0x78] sm:$0xff] %vm535_vm2, %v8612_v15  ;;  %4146 = vst.msk [vmem:[%s6400_s9 + $0x78] sm:$0xff] %vm535_vm2, %v8612_v15  ;;  %v4020_v16 = vmul.f32 %v3942_v7, %v3860_v22  ;;  %v3940_v56 = vpop.permute.xlu0 %3939  ;;  %v4058_v34 = vmul.f32 %v5913_v29, %v8376_v11  ;;  %v5914_v7 = vld [vmem:[#allocation2 + $0xb0] sm:$0xff]  ;;  %v5919_v29 = vld [vmem:[#allocation2 + $0xe8] sm:$0xff] }
 0x3c2   : > { %4113 = vst.msk [vmem:[#allocation2 + $0x70] sm:$0xff] %vm535_vm2, %v8615_v9  ;;  %4145 = vst.msk [vmem:[%s6400_s9 + $0x70] sm:$0xff] %vm535_vm2, %v8615_v9  ;;  %v4019_v17 = vmul.f32 %v3940_v56, %v3859_v32  ;;  %v4057_v54 = vmul.f32 %v5914_v7, %v8380_v36  ;;  %v5920_v7 = vld [vmem:[#allocation2 + $0xe0] sm:$0xff] }
 0x3c3   : > { %v8630_v45 = vadd.f32 %v4052_v58, %v4020_v16  ;;  %v9365_v58 = vld [vmem:[#allocation26_spill] sm:$0xff] }
 0x3c4   : > { %v8633_v33 = vadd.f32 %v4051_v52, %v4019_v17  ;;  %v3946_v2 = vpop.permute.xlu1 %3945  ;;  %v3868_v16 = vsub.f32 1.0, %v9365_v58  ;;  %v3867_v52 = vsub.f32 1.0, %v9366_v13  ;;  %v5915_v17 = vld [vmem:[#allocation2 + $0xc8] sm:$0xff] }
 0x3c5   : > { %4116 = vst.msk [vmem:[#allocation2 + $0x88] sm:$0xff] %vm535_vm2, %v8630_v45  ;;  %4148 = vst.msk [vmem:[%s6400_s9 + $0x88] sm:$0xff] %vm535_vm2, %v8630_v45  ;;  %v4022_v18 = vmul.f32 %v3946_v2, %v3862_v31  ;;  %v3944_v63 = vpop.permute.xlu0 %3943  ;;  %v4060_v36 = vmul.f32 %v5915_v17, %v9365_v58 }
 0x3c6   : > { %4115 = vst.msk [vmem:[#allocation2 + $0x80] sm:$0xff] %vm535_vm2, %v8633_v33  ;;  %4147 = vst.msk [vmem:[%s6400_s9 + $0x80] sm:$0xff] %vm535_vm2, %v8633_v33  ;;  %v4021_v19 = vmul.f32 %v3944_v63, %v3861_v1  ;;  %v4059_v1 = vmul.f32 %v5916_v62, %v9366_v13 }
 0x3c7   : > { %v8648_v26 = vadd.f32 %v4054_v40, %v4022_v18  ;;  %v3870_v18 = vsub.f32 1.0, %v8392_v28 }
 0x3c8   : > { %v8651_v4 = vadd.f32 %v4053_v44, %v4021_v19  ;;  %v3950_v38 = vpop.permute.xlu1 %3949  ;;  %v9367_v44 = vld [vmem:[#allocation68_spill] sm:$0xff] }
 0x3c9   : > { %4118 = vst.msk [vmem:[#allocation2 + $0x98] sm:$0xff] %vm535_vm2, %v8648_v26  ;;  %4150 = vst.msk [vmem:[%s6400_s9 + $0x98] sm:$0xff] %vm535_vm2, %v8648_v26  ;;  %v4024_v14 = vmul.f32 %v3950_v38, %v3864_v3  ;;  %v3948_v8 = vpop.permute.xlu0 %3947  ;;  %v3869_v19 = vsub.f32 1.0, %v9367_v44  ;;  %v5917_v3 = vld [vmem:[#allocation2 + $0xd8] sm:$0xff] }
 0x3ca   : > { %4117 = vst.msk [vmem:[#allocation2 + $0x90] sm:$0xff] %vm535_vm2, %v8651_v4  ;;  %4149 = vst.msk [vmem:[%s6400_s9 + $0x90] sm:$0xff] %vm535_vm2, %v8651_v4  ;;  %v4023_v61 = vmul.f32 %v3948_v8, %v3863_v5  ;;  %v4062_v38 = vmul.f32 %v5917_v3, %v8392_v28 }
 0x3cb   : > { %v8666_v27 = vadd.f32 %v4056_v21, %v4024_v14  ;;  %v5918_v21 = vld [vmem:[#allocation2 + $0xd0] sm:$0xff] }
 0x3cc   : > { %v8669_v49 = vadd.f32 %v4055_v12, %v4023_v61  ;;  %v3954_v24 = vpop.permute.xlu1 %3953  ;;  %v4061_v14 = vmul.f32 %v5918_v21, %v9367_v44  ;;  %v9368_v12 = vld [vmem:[#allocation27_spill] sm:$0xff] }
 0x3cd   : > { %4120 = vst.msk [vmem:[#allocation2 + $0xa8] sm:$0xff] %vm535_vm2, %v8666_v27  ;;  %4152 = vst.msk [vmem:[%s6400_s9 + $0xa8] sm:$0xff] %vm535_vm2, %v8666_v27  ;;  %v4026_v0 = vmul.f32 %v3954_v24, %v3866_v35  ;;  %v3952_v22 = vpop.permute.xlu0 %3951  ;;  %v3872_v61 = vsub.f32 1.0, %v9368_v12  ;;  %v9369_v24 = vld [vmem:[#allocation69_spill] sm:$0xff] }
 0x3ce   : > { %4119 = vst.msk [vmem:[#allocation2 + $0xa0] sm:$0xff] %vm535_vm2, %v8669_v49  ;;  %4151 = vst.msk [vmem:[%s6400_s9 + $0xa0] sm:$0xff] %vm535_vm2, %v8669_v49  ;;  %v4025_v32 = vmul.f32 %v3952_v22, %v3865_v23  ;;  %v3871_v23 = vsub.f32 1.0, %v9369_v24 }
 0x3cf   : > { %v8684_v59 = vadd.f32 %v4058_v34, %v4026_v0  ;;  %v4064_v34 = vmul.f32 %v5919_v29, %v9368_v12 }
 0x3d0   : > { %v8687_v56 = vadd.f32 %v4057_v54, %v4025_v32  ;;  %v3958_v11 = vpop.permute.xlu1 %3957  ;;  %v4063_v54 = vmul.f32 %v5920_v7, %v9369_v24 }
 0x3d1   : > { %4122 = vst.msk [vmem:[#allocation2 + $0xb8] sm:$0xff] %vm535_vm2, %v8684_v59  ;;  %4154 = vst.msk [vmem:[%s6400_s9 + $0xb8] sm:$0xff] %vm535_vm2, %v8684_v59  ;;  %v4028_v31 = vmul.f32 %v3958_v11, %v3868_v16  ;;  %v3956_v2 = vpop.permute.xlu0 %3955  ;;  %v3874_v16 = vsub.f32 1.0, %v8408_v50 }
 0x3d2   : > { %4121 = vst.msk [vmem:[#allocation2 + $0xb0] sm:$0xff] %vm535_vm2, %v8687_v56  ;;  %4153 = vst.msk [vmem:[%s6400_s9 + $0xb0] sm:$0xff] %vm535_vm2, %v8687_v56  ;;  %v4027_v25 = vmul.f32 %v3956_v2, %v3867_v52  ;;  %v9370_v52 = vld [vmem:[#allocation28_spill] sm:$0xff] }
 0x3d3   : > { %v8702_v40 = vadd.f32 %v4060_v36, %v4028_v31  ;;  %v3873_v17 = vsub.f32 1.0, %v9370_v52  ;;  %v5921_v36 = vld [vmem:[#allocation2 + $0xf8] sm:$0xff] }
 0x3d4   : > { %v8705_v63 = vadd.f32 %v4059_v1, %v4027_v25  ;;  %v3962_v51 = vpop.permute.xlu1 %3961  ;;  %v4066_v31 = vmul.f32 %v5921_v36, %v8408_v50  ;;  %v5922_v1 = vld [vmem:[#allocation2 + $0xf0] sm:$0xff] }
 0x3d5   : > { %4124 = vst.msk [vmem:[#allocation2 + $0xc8] sm:$0xff] %vm535_vm2, %v8702_v40  ;;  %4156 = vst.msk [vmem:[%s6400_s9 + $0xc8] sm:$0xff] %vm535_vm2, %v8702_v40  ;;  %v4030_v5 = vmul.f32 %v3962_v51, %v3870_v18  ;;  %v3960_v37 = vpop.permute.xlu0 %3959  ;;  %v4065_v25 = vmul.f32 %v5922_v1, %v9370_v52 }
 0x3d6   : > { %4123 = vst.msk [vmem:[#allocation2 + $0xc0] sm:$0xff] %vm535_vm2, %v8705_v63  ;;  %4155 = vst.msk [vmem:[%s6400_s9 + $0xc0] sm:$0xff] %vm535_vm2, %v8705_v63  ;;  %v4029_v8 = vmul.f32 %v3960_v37, %v3869_v19 }
 0x3d7   : > { %v8720_v39 = vadd.f32 %v4062_v38, %v4030_v5 }
 0x3d8   : > { %v8723_v35 = vadd.f32 %v4061_v14, %v4029_v8  ;;  %v3966_v28 = vpop.permute.xlu1 %3965 }
 0x3d9   : > { %4126 = vst.msk [vmem:[#allocation2 + $0xd8] sm:$0xff] %vm535_vm2, %v8720_v39  ;;  %4158 = vst.msk [vmem:[%s6400_s9 + $0xd8] sm:$0xff] %vm535_vm2, %v8720_v39  ;;  %v4032_v0 = vmul.f32 %v3966_v28, %v3872_v61  ;;  %v3964_v22 = vpop.permute.xlu0 %3963 }
 0x3da   : > { %4125 = vst.msk [vmem:[#allocation2 + $0xd0] sm:$0xff] %vm535_vm2, %v8723_v35  ;;  %4157 = vst.msk [vmem:[%s6400_s9 + $0xd0] sm:$0xff] %vm535_vm2, %v8723_v35  ;;  %v4031_v32 = vmul.f32 %v3964_v22, %v3871_v23 }
 0x3db   : > { %v4096_v58 = vadd.f32 %v4064_v34, %v4032_v0 }
 0x3dc   : > { %v4095_v11 = vadd.f32 %v4063_v54, %v4031_v32  ;;  %v3970_v13 = vpop.permute.xlu1 %3969 }
 0x3dd   : > { %4128 = vst.msk [vmem:[#allocation2 + $0xe8] sm:$0xff] %vm535_vm2, %v4096_v58  ;;  %4160 = vst.msk [vmem:[%s6400_s9 + $0xe8] sm:$0xff] %vm535_vm2, %v4096_v58  ;;  %v4034_v2 = vmul.f32 %v3970_v13, %v3874_v16  ;;  %v3968_v62 = vpop.permute.xlu0 %3967 }
 0x3de   : > { %4127 = vst.msk [vmem:[#allocation2 + $0xe0] sm:$0xff] %vm535_vm2, %v4095_v11  ;;  %4159 = vst.msk [vmem:[%s6400_s9 + $0xe0] sm:$0xff] %vm535_vm2, %v4095_v11  ;;  %v4033_v18 = vmul.f32 %v3968_v62, %v3873_v17  ;;  %4166 = sbr.rel (%p4715_p1) target bundleno = 1011 (0x3f3), region = 52 }
 0x3df   : > { %v4098_v51 = vadd.f32 %v4066_v31, %v4034_v2 }
 0x3e0   : > { %v4097_v44 = vadd.f32 %v4065_v25, %v4033_v18 }
 0x3e1   : > { %4130 = vst.msk [vmem:[#allocation2 + $0xf8] sm:$0xff] %vm535_vm2, %v4098_v51  ;;  %4162 = vst.msk [vmem:[%s6400_s9 + $0xf8] sm:$0xff] %vm535_vm2, %v4098_v51 }
 0x3e2   : > { %4129 = vst.msk [vmem:[#allocation2 + $0xf0] sm:$0xff] %vm535_vm2, %v4097_v44  ;;  %4161 = vst.msk [vmem:[%s6400_s9 + $0xf0] sm:$0xff] %vm535_vm2, %v4097_v44 }
 0x3e3   : > { %4167 = vst.msk [vmem:[%s6402_s13] sm:$0xff] %vm535_vm2, %v8497_v60  ;;  %4168 = vst.msk [vmem:[%s6402_s13 + $0x8] sm:$0xff] %vm535_vm2, %v8484_v43 }
 0x3e4   : > { %4169 = vst.msk [vmem:[%s6402_s13 + $0x10] sm:$0xff] %vm535_vm2, %v8512_v57  ;;  %4170 = vst.msk [vmem:[%s6402_s13 + $0x18] sm:$0xff] %vm535_vm2, %v8495_v53 }
 0x3e5   : > { %4171 = vst.msk [vmem:[%s6402_s13 + $0x20] sm:$0xff] %vm535_vm2, %v8525_v30  ;;  %4172 = vst.msk [vmem:[%s6402_s13 + $0x28] sm:$0xff] %vm535_vm2, %v8522_v10 }
 0x3e6   : > { %4173 = vst.msk [vmem:[%s6402_s13 + $0x30] sm:$0xff] %vm535_vm2, %v8543_v41  ;;  %4174 = vst.msk [vmem:[%s6402_s13 + $0x38] sm:$0xff] %vm535_vm2, %v8540_v6 }
 0x3e7   : > { %4175 = vst.msk [vmem:[%s6402_s13 + $0x40] sm:$0xff] %vm535_vm2, %v8561_v55  ;;  %4176 = vst.msk [vmem:[%s6402_s13 + $0x48] sm:$0xff] %vm535_vm2, %v8558_v46 }
 0x3e8   : > { %4177 = vst.msk [vmem:[%s6402_s13 + $0x50] sm:$0xff] %vm535_vm2, %v8579_v20  ;;  %4178 = vst.msk [vmem:[%s6402_s13 + $0x58] sm:$0xff] %vm535_vm2, %v8576_v42 }
 0x3e9   : > { %4179 = vst.msk [vmem:[%s6402_s13 + $0x60] sm:$0xff] %vm535_vm2, %v8597_v47  ;;  %4180 = vst.msk [vmem:[%s6402_s13 + $0x68] sm:$0xff] %vm535_vm2, %v8594_v48 }
 0x3ea   : > { %4181 = vst.msk [vmem:[%s6402_s13 + $0x70] sm:$0xff] %vm535_vm2, %v8615_v9  ;;  %4182 = vst.msk [vmem:[%s6402_s13 + $0x78] sm:$0xff] %vm535_vm2, %v8612_v15 }
 0x3eb   : > { %4183 = vst.msk [vmem:[%s6402_s13 + $0x80] sm:$0xff] %vm535_vm2, %v8633_v33  ;;  %4184 = vst.msk [vmem:[%s6402_s13 + $0x88] sm:$0xff] %vm535_vm2, %v8630_v45 }
 0x3ec   : > { %4185 = vst.msk [vmem:[%s6402_s13 + $0x90] sm:$0xff] %vm535_vm2, %v8651_v4  ;;  %4186 = vst.msk [vmem:[%s6402_s13 + $0x98] sm:$0xff] %vm535_vm2, %v8648_v26 }
 0x3ed   : > { %4187 = vst.msk [vmem:[%s6402_s13 + $0xa0] sm:$0xff] %vm535_vm2, %v8669_v49  ;;  %4188 = vst.msk [vmem:[%s6402_s13 + $0xa8] sm:$0xff] %vm535_vm2, %v8666_v27 }
 0x3ee   : > { %4189 = vst.msk [vmem:[%s6402_s13 + $0xb0] sm:$0xff] %vm535_vm2, %v8687_v56  ;;  %4190 = vst.msk [vmem:[%s6402_s13 + $0xb8] sm:$0xff] %vm535_vm2, %v8684_v59 }
 0x3ef   : > { %4191 = vst.msk [vmem:[%s6402_s13 + $0xc0] sm:$0xff] %vm535_vm2, %v8705_v63  ;;  %4192 = vst.msk [vmem:[%s6402_s13 + $0xc8] sm:$0xff] %vm535_vm2, %v8702_v40 }
 0x3f0   : > { %4193 = vst.msk [vmem:[%s6402_s13 + $0xd0] sm:$0xff] %vm535_vm2, %v8723_v35  ;;  %4194 = vst.msk [vmem:[%s6402_s13 + $0xd8] sm:$0xff] %vm535_vm2, %v8720_v39 }
 0x3f1   : > { %4195 = vst.msk [vmem:[%s6402_s13 + $0xe0] sm:$0xff] %vm535_vm2, %v4095_v11  ;;  %4196 = vst.msk [vmem:[%s6402_s13 + $0xe8] sm:$0xff] %vm535_vm2, %v4096_v58 }
 0x3f2   : > { %4197 = vst.msk [vmem:[%s6402_s13 + $0xf0] sm:$0xff] %vm535_vm2, %v4097_v44  ;;  %4198 = vst.msk [vmem:[%s6402_s13 + $0xf8] sm:$0xff] %vm535_vm2, %v4098_v51 }
 0x3f3 PF: > { %s9372_s10 = sld [smem:[#allocation19_spill]]  ;;  %s4220_s3 = sshll.u32 %s6400_s9, 4  ;;  %s8850_s3 = int_to_ptr.vmem [resolvable:$true] %s4220_s3 }
 0x3f4   : > { %s9373_s11 = sld [smem:[#allocation18_spill]]  ;;  %s4200_s28 = scalar_lea.sflag [#allocation5], %s6383_s15 }
 0x3f5   : > { %s9374_s4 = sld [smem:[#allocation24_spill]]  ;;  %s6003_s30 = scalar_lea.vmem %s8850_s3, 4096 }
 0x3f6   : > { %s9375_s7 = sld [smem:[#allocation88_spill]]  ;;  %p6004_p4 = scmp.ne.s32.totalorder %s8850_s3, %s6003_s30 }
 0x3f7   : > { %s6169_s29 = smov [#allocation9]  }
 0x3f8   : > { %s6007_s9 = sshll.u32 %s6169_s29, 4  ;;  %s6008_s9 = int_to_ptr.vmem [resolvable:$false] %s6007_s9 }
 0x3f9   : > { %s4718_s18 = sshll.u32 %s9372_s10, 5  ;;  %s6009_s27 = scalar_lea.vmem %s6008_s9, 8192 }
 0x3fa   : > { %s4719_s5 = sshll.u32 %s9373_s11, 6  ;;  %p6010_p8 = scmp.lt.s32.totalorder %s8850_s3, %s6008_s9 }
 0x3fb   : > { %s4217_s22 = sadd.s32 %s4719_s5, %s4718_s18  ;;  %p9376_p12 = scmp.ne.s32.totalorder %s9374_s4, 0 }
 0x3fc   : > { %s4720_s6 = sshll.u32 %s4217_s22, 7  ;;  %p6011_p2 = scmp.lt.s32.totalorder %s6009_s27, %s6003_s30 }
 0x3fd   : > { %s8855_s26 = scalar_lea.hbm %s9375_s7, %s4720_s6  ;;  %p6005_p0 = pnand %p6004_p4, %p9376_p12 }
 0x3fe   : > { %p6012_p3 = por %p6011_p2, %p6010_p8 }
 0x3ff   : > { %p6006_p5 = pneg %p6005_p0 }
 0x401   : > { %p6013_p6 = pnand %p6012_p3, %p6006_p5 }
 0x403   : > { %6016 = shalt.err (!%p6013_p6)
}
 0x404   : > { %s6017_s11 = scalar_lea.hbm %s8855_s26, 4096  ;;  %s6021_s22 = scalar_lea.hbm %s9375_s7, 65536 }
 0x405   : > { %p6018_p7 = scmp.ne.s32.totalorder %s8855_s26, %s6017_s11  ;;  %p6022_p13 = scmp.lt.s32.totalorder %s8855_s26, %s9375_s7 }
 0x406   : > { %p6023_p9 = scmp.lt.s32.totalorder %s6021_s22, %s6017_s11 }
 0x407   : > { %p6019_p11 = pnand %p6018_p7, %p9376_p12 }
 0x408   : > { %p6024_p1 = por %p6023_p9, %p6022_p13 }
 0x409   : > { %p6020_p10 = pneg %p6019_p11 }
 0x40b   : > { %p6025_p4 = pnand %p6024_p1, %p6020_p10 }
 0x40d   : > { %6028 = shalt.err (!%p6025_p4)
}
 0x40e   : > { %s6170_s14 = smov 128   ;;  %s9377_s30 = sld [smem:[#allocation21_spill]] }
 0x40f   : > { %s6171_s29 = smov 8   ;;  %s4725_s9 = sshll.u32 %s9372_s10, 12 }
 0x410   : > { %5572 = dma.vmem_to_hbm [thread:$0]  (%p9376_p12), %s8850_s3, 4096, %s8855_s26, %s4200_s28, %s6170_s14, %s6170_s14, %s6171_s29  }
 0x411   : > { %s9378_s18 = sld [smem:[#allocation89_spill]]  ;;  %s4236_s6 = sshll.u32 %s6402_s13, 4  ;;  %s8890_s6 = int_to_ptr.vmem [resolvable:$true] %s4236_s6 }
 0x412   : > { %s4205_s12 = scalar_lea.sflag [#allocation11], %s269_s21  ;;  %s6029_s4 = scalar_lea.vmem %s8890_s6, 4096 }
 0x413   : > { %p6030_p0 = scmp.ne.s32.totalorder %s8890_s6, %s6029_s4  ;;  %s6172_s15 = smov [#allocation10]  }
 0x414   : > { %p9380_p5 = scmp.ne.s32.totalorder %s9377_s30, 0  ;;  %s6033_s10 = sshll.u32 %s6172_s15, 4  ;;  %s6034_s10 = int_to_ptr.vmem [resolvable:$false] %s6033_s10 }
 0x415   : > { %s6035_s3 = scalar_lea.vmem %s6034_s10, 8192  ;;  %p6036_p12 = scmp.lt.s32.totalorder %s8890_s6, %s6034_s10 }
 0x416   : > { %p6031_p8 = pnand %p6030_p0, %p9380_p5  ;;  %p6037_p3 = scmp.lt.s32.totalorder %s6035_s3, %s6029_s4 }
 0x417   : > { %s9379_s5 = smov %s9378_s18  ;;  %s8887_s22 = scalar_lea.hbm %s9378_s18, %s4725_s9 }
 0x418   : > { %p6032_p2 = pneg %p6031_p8  ;;  %p6038_p6 = por %p6037_p3, %p6036_p12 }
 0x41a   : > { %p6039_p7 = pnand %p6038_p6, %p6032_p2 }
 0x41c   : > { %6042 = shalt.err (!%p6039_p7)
}
 0x41d   : > { %s6043_s13 = scalar_lea.hbm %s8887_s22, 4096  ;;  %s6047_s28 = scalar_lea.hbm %s9379_s5, 8192 }
 0x41e   : > { %p6044_p11 = scmp.ne.s32.totalorder %s8887_s22, %s6043_s13  ;;  %p6048_p9 = scmp.lt.s32.totalorder %s8887_s22, %s9379_s5 }
 0x41f   : > { %p6049_p1 = scmp.lt.s32.totalorder %s6047_s28, %s6043_s13 }
 0x420   : > { %p6045_p10 = pnand %p6044_p11, %p9380_p5 }
 0x421   : > { %p6050_p4 = por %p6049_p1, %p6048_p9 }
 0x422   : > { %p6046_p13 = pneg %p6045_p10 }
 0x424   : > { %p6051_p0 = pnand %p6050_p4, %p6046_p13 }
 0x426   : > { %6054 = shalt.err (!%p6051_p0)
}
 0x427   : > { %5573 = dma.vmem_to_hbm [thread:$0]  (%p9380_p5), %s8890_s6, 4096, %s8887_s22, %s4205_s12, %s6170_s14, %s6170_s14, %s6171_s29  }
 0x428 PF: > { %s9381_s11 = sld [smem:[#allocation17_spill]]  ;;  %p5599_p8 = scmp.ge.s32.totalorder %s6157_s25, 2 }
 0x429   : > { %s9382_s18 = sld [smem:[#allocation20_spill]] }
 0x42e   : > { %s4251_s4 = sand.u32 1, %s9381_s11  }
 0x42f   : > { %p9383_p2 = scmp.ne.s32.totalorder %s9382_s18, 0  ;;  %s4252_s15 = scalar_lea.sflag [#allocation5], %s4251_s4 }
 0x431   : > { %p5588_p12 = pnand %p5599_p8, %p9383_p2 }
 0x433   : > { %p5589_p3 = pneg %p5588_p12 }
 0x435   : > { %6108 = dma.done.wait (%p5589_p3), %s4252_s15, 4096  }
 0x436   : > { %6110 = vsyncadd (%p5589_p3), %s4252_s15, 4294963200  ;;  %s9384_s10 = sld [smem:[#allocation16_spill]] }
 0x437   : > { %s9385_s30 = sld [smem:[#allocation22_spill]] }
 0x43c   : > { %s4260_s3 = sand.u32 1, %s9384_s10  }
 0x43d   : > { %p9386_p6 = scmp.ne.s32.totalorder %s9385_s30, 0  ;;  %s4261_s13 = scalar_lea.sflag [#allocation11], %s4260_s3 }
 0x43f   : > { %p5591_p7 = pnand %p5599_p8, %p9386_p6 }
 0x441   : > { %p5592_p11 = pneg %p5591_p7 }
 0x443   : > { %6112 = dma.done.wait (%p5592_p11), %s4261_s13, 4096  }
 0x444   : > { %6114 = vsyncadd (%p5592_p11), %s4261_s13, 4294963200  ;;  %s25_s25 = sadd.s32 1, %s6157_s25   ;;  %s9387_s14 = sld [smem:[#allocation23_spill]] }
 0x445   : > { %p22_p5 = scmp.ge.s32.totalorder %s25_s25, 18   ;;  %s9388_s15 = smov %s6121_s16 }
 0x446   : > { %s9389_s16 = smov %s6125_s17  ;;  %s9390_s17 = smov %s6356_s1 }
 0x447   : > { %s9391_s18 = smov %s6133_s19  ;;  %s9392_s19 = smov %s6137_s20 }
 0x448   : > { %s9393_s20 = smov %s6359_s2  ;;  %s9394_s21 = smov %s6149_s23 }
 0x449   : > { %s9395_s22 = smov %s6153_s24  ;;  %s9397_s24 = smov %s9403_s8 }
 0x44a   : > { %s9396_s23 = smov %s9387_s14  ;;  %24 = sbr.rel (!%p22_p5) target bundleno = 17 (0x11), region = 118 }
 0x44f   :  { %4266 = vsyncpa [#allocation4], 1 }
 0x450   :  { %4268 = vsyncpa [#allocation4 + $0x1], 1 }
 0x451   :  { %4269 = vsyncpa [#allocation7], 1 }
 0x452   :  { %4270 = vsyncpa [#allocation5], 1 }
 0x453   :  { %4272 = vsyncpa [#allocation5 + $0x1], 1 }
 0x454   :  { %4273 = vsyncpa [#allocation11], 1 }
 0x455   :  { %4275 = vsyncpa [#allocation11 + $0x1], 1 }

</bundles_post_ra>
